<compile_context>
chip_gen: v5e
topology: v5e:2x2
jax: 0.10.0
libtpu: 0.0.40
codegen_flags: <defaults>
</compile_context>

<pallas_src>
import functools

import numpy as np

import jax
import jax.numpy as jnp
from jax.experimental import pallas as pl
from jax.experimental.pallas import tpu as pltpu


# ----------------------------------------------------------------------------
# Constants for the synthetic detection / recognition networks
# ----------------------------------------------------------------------------
PAGE_H = 32
PAGE_W = 32
GRID = 4                        # 4x4 grid of boxes per page
RH = PAGE_H // GRID             # 8
RW = PAGE_W // GRID             # 8
CHANNELS = 3
DET_HIDDEN = 8                  # conv1 output channels
CHARSET = "abcdefghijklmnop"    # vocab = 16
VOCAB = len(CHARSET)
SEQ_LEN = 4
RECO_HIDDEN = 64
NOUT = SEQ_LEN * VOCAB          # 64

# Safe on every generation (v7x has only 64 MiB physical / 32 MiB scoped default).
VMEM_LIMIT_BYTES = 32 * 1024 * 1024


# ----------------------------------------------------------------------------
# Fused det + crop + reco kernel (one page block per grid step)
# ----------------------------------------------------------------------------
def _ocr_page_block_kernel(
    x_ref,            # (B, C, H, W) f32     page block
    s_ref,            # (3, H, H)    f32     row-shift matrices (dy = -1, 0, +1)
    bb1_ref,          # (C, W, 3*H1*W) f32   conv1 banded weights, cols = (dy, o, v)
    b1w_ref,          # (1, H1*W)    f32     conv1 bias, lanes = (o, v)
    c2_ref,           # (H1*W, 3*W)  f32     conv2 banded weights, cols = (dy, v)
    b2d_ref,          # (1, 1)       f32     conv2 bias
    pool_l_ref,       # (G, H)       f32     row-pool (already / RH)
    pool_r_ref,       # (W, G)       f32     col-pool (already / RW)
    p_ref,            # (RH, G, H)   f32     crop-row selection matrices
    w1r_ref,          # (C, W, RH*G*HID) bf16 reco layer-1 block-diag weights
    b1rw_ref,         # (1, G*HID)   f32
    w2bd_ref,         # (G*HID, G*NOUT) bf16 reco layer-2 block-diag weights
    b2rw_ref,         # (1, G*NOUT)  f32
    scores_ref,       # (B, 1, G*G)  f32     out: det scores
    idx_ref,          # (B, G, G*SEQ) int32  out: word char indices
    conf_ref,         # (B, G, G)    f32     out: word confidences
    *, B, C, H, W, H1, G, HID, SEQ, V, NOUT_,
):
    f32 = jnp.float32
    RH_ = H // G
    x = x_ref[...]                                              # (B, C, H, W)

    # Hoisted broadcasts (shared across the unrolled loops below).
    s_mats = s_ref[...]                                         # (3, H, H)
    s_b = [jnp.broadcast_to(s_mats[d], (B, H, H)) for d in range(3)]

    # ---------------- detection: conv1 -> ReLU -> conv2 -> sigmoid -> mean pool ----
    # conv1 as (x @ banded_dx_weights) followed by row-shift matmuls (handles the
    # dy taps and the "same" zero padding).  Lanes of f1 are (out_ch, col): dense.
    g_acc = jnp.zeros((B * H, 3 * H1 * W), f32)
    for c in range(C):
        xc = x[:, c].reshape(B * H, W)                          # leading-dim reshape
        g_acc = g_acc + jnp.dot(xc, bb1_ref[c], preferred_element_type=f32)
    g_acc = g_acc.reshape(B, H, 3 * H1 * W)
    f1 = jnp.zeros((B, H, H1 * W), f32)
    for d in range(3):
        f1 = f1 + jnp.einsum(
            'byh,bhv->byv', s_b[d], g_acc[:, :, d * H1 * W:(d + 1) * H1 * W],
            preferred_element_type=f32)
    f1 = jnp.maximum(f1 + b1w_ref[...], 0.0)                    # (B, H, H1*W)

    # conv2 (8 -> 1) the same way.
    t = jnp.dot(f1.reshape(B * H, H1 * W), c2_ref[...], preferred_element_type=f32)
    t = t.reshape(B, H, 3 * W)
    pre = jnp.zeros((B, H, W), f32)
    for d in range(3):
        pre = pre + jnp.einsum(
            'byh,bhw->byw', s_b[d], t[:, :, d * W:(d + 1) * W],
            preferred_element_type=f32)
    prob = jax.nn.sigmoid(pre + b2d_ref[...])                   # (B, H, W)

    # G x G mean pooling as two small matmuls (pool matrices precomputed host-side).
    pool_l_b = jnp.broadcast_to(pool_l_ref[...], (B, G, H))
    rowp = jnp.einsum('bgh,bhw->bgw', pool_l_b, prob, preferred_element_type=f32)
    pooled = jnp.dot(rowp.reshape(B * G, W), pool_r_ref[...],
                     preferred_element_type=f32).reshape(B, G, G)
    scores = jnp.concatenate([pooled[:, g, :] for g in range(G)], axis=-1)  # (B, G*G)
    scores_ref[...] = scores[:, None, :]                        # single 16-lane store

    # ---------------- recognition: crops -> MLP -> softmax/argmax/conf -------------
    # Layer 1: the crop gather + (192 -> HID) matmul is folded into block-diagonal
    # weights (contract over columns within each gx block) plus row-selection
    # matmuls (pick row 8*gy + i).  Lanes of H are (gx, hid): dense.
    GH = G * HID
    v_acc = jnp.zeros((B * H, RH_ * GH), f32)
    for c in range(C):
        xc = x[:, c].reshape(B * H, W).astype(jnp.bfloat16)
        v_acc = v_acc + jnp.dot(xc, w1r_ref[c], preferred_element_type=f32)
    v_acc = v_acc.reshape(B, H, RH_ * GH)

    p_mats = p_ref[...]                                         # (RH, G, H)
    h_acc = jnp.zeros((B, G, GH), f32)
    for i in range(RH_):
        p_b = jnp.broadcast_to(p_mats[i], (B, G, H))
        h_acc = h_acc + jnp.einsum(
            'bgh,bhv->bgv', p_b, v_acc[:, :, i * GH:(i + 1) * GH],
            preferred_element_type=f32)
    h_act = jnp.maximum(h_acc + b1rw_ref[...], 0.0)             # (B, G, G*HID)

    # Layer 2 (block-diagonal over gx), bf16 MXU inputs, f32 accumulate.
    logits = jnp.dot(h_act.reshape(B * G, GH).astype(jnp.bfloat16), w2bd_ref[...],
                     preferred_element_type=f32).reshape(B, G, G * NOUT_)
    logits = logits + b2rw_ref[...]                             # lanes = (gx, s, v)

    # Per-crop / per-position softmax, first-occurrence argmax, min confidence.
    # Results are assembled in registers and written with ONE store per output.
    lane_idx = jax.lax.broadcasted_iota(jnp.int32, (B, G, G * SEQ), 2)
    lane_gx = jax.lax.broadcasted_iota(jnp.int32, (B, G, G), 2)
    idx_out = jnp.zeros((B, G, G * SEQ), f32)
    conf_out = jnp.zeros((B, G, G), f32)
    for gx in range(G):
        conf_gx = None
        for s in range(SEQ):
            lo = gx * NOUT_ + s * V
            ls = logits[:, :, lo:lo + V]                        # (B, G, V)
            m = jnp.max(ls, axis=-1, keepdims=True)
            e = jnp.exp(ls - m)
            denom = jnp.sum(e, axis=-1, keepdims=True)
            pmax = 1.0 / denom                                  # max softmax prob
            vlane = jax.lax.broadcasted_iota(jnp.int32, ls.shape, 2).astype(f32)
            cand = jnp.where(ls >= m, vlane, jnp.float32(V))
            amax = jnp.min(cand, axis=-1, keepdims=True)        # (B, G, 1)
            idx_out = idx_out + jnp.where(lane_idx == (gx * SEQ + s), amax, 0.0)
            conf_gx = pmax if conf_gx is None else jnp.minimum(conf_gx, pmax)
        conf_out = conf_out + jnp.where(lane_gx == gx, conf_gx, 0.0)
    idx_ref[...] = idx_out.astype(jnp.int32)
    conf_ref[...] = conf_out


# ----------------------------------------------------------------------------
# Host-side precomputation of the matmul-form weights (done once)
# ----------------------------------------------------------------------------
def _banded(wdx, width):
    """band[w, v] = wdx[(w - v) + 1] when |w - v| <= 1, else 0."""
    m = np.zeros((width, width), np.float32)
    for dx in (-1, 0, 1):
        m += float(wdx[dx + 1]) * np.eye(width, k=-dx, dtype=np.float32)
    return m


def prepare_kernel_params(raw):
    w1 = np.asarray(raw["det_w1"], np.float32)
    b1 = np.asarray(raw["det_b1"], np.float32)
    w2 = np.asarray(raw["det_w2"], np.float32)
    b2 = np.asarray(raw["det_b2"], np.float32)
    rw1 = np.asarray(raw["reco_w1"], np.float32)
    rb1 = np.asarray(raw["reco_b1"], np.float32)
    rw2 = np.asarray(raw["reco_w2"], np.float32)
    rb2 = np.asarray(raw["reco_b2"], np.float32)

    H, W, G, C, H1, HID = PAGE_H, PAGE_W, GRID, CHANNELS, DET_HIDDEN, RECO_HIDDEN

    # Row-shift matrices: s[d][y, h] = 1 iff h == y + (d - 1).
    s = np.stack([np.eye(H, k=d - 1, dtype=np.float32) for d in range(3)])

    # conv1 banded weights: bb1[c][w, d*H1*W + o*W + v] = w1[o, c, d, (w - v) + 1].
    bb1 = np.zeros((C, W, 3 * H1 * W), np.float32)
    for c in range(C):
        for d in range(3):
            for o in range(H1):
                col = d * H1 * W + o * W
                bb1[c, :, col:col + W] = _banded(w1[o, c, d], W)
    b1w = np.repeat(b1, W)[None, :]                              # (1, H1*W)

    # conv2 banded weights: c2[o*W + u, d*W + v] = w2[0, o, d, (u - v) + 1].
    c2 = np.zeros((H1 * W, 3 * W), np.float32)
    for o in range(H1):
        for d in range(3):
            c2[o * W:(o + 1) * W, d * W:(d + 1) * W] = _banded(w2[0, o, d], W)
    b2d = b2.reshape(1, 1)

    # Mean-pool matrices.
    pool_l = np.zeros((G, H), np.float32)
    pool_r = np.zeros((W, G), np.float32)
    for g in range(G):
        pool_l[g, g * RH:(g + 1) * RH] = 1.0 / RH
        pool_r[g * RW:(g + 1) * RW, g] = 1.0 / RW

    # Crop-row selection matrices: p[i][gy, h] = 1 iff h == gy*RH + i.
    p = np.zeros((RH, G, H), np.float32)
    for i in range(RH):
        for gy in range(G):
            p[i, gy, gy * RH + i] = 1.0

    # Reco layer-1 block-diagonal weights (feature order = (c, i, j)):
    # w1r[c][gx*RW + j, i*(G*HID) + gx*HID + h] = rw1[c*RH*RW + i*RW + j, h].
    w1r = np.zeros((C, W, RH * G * HID), np.float32)
    for c in range(C):
        for i in range(RH):
            rows = rw1[c * RH * RW + i * RW:c * RH * RW + (i + 1) * RW, :]  # (RW, HID)
            for gx in range(G):
                w1r[c, gx * RW:(gx + 1) * RW,
                    i * G * HID + gx * HID:i * G * HID + (gx + 1) * HID] = rows
    b1rw = np.tile(rb1, G)[None, :]                              # (1, G*HID)

    # Reco layer-2 block-diagonal weights.
    w2bd = np.zeros((G * HID, G * NOUT), np.float32)
    for gx in range(G):
        w2bd[gx * HID:(gx + 1) * HID, gx * NOUT:(gx + 1) * NOUT] = rw2
    b2rw = np.tile(rb2, G)[None, :]                              # (1, G*NOUT)

    return {
        "s": jnp.asarray(s),
        "bb1": jnp.asarray(bb1),
        "b1w": jnp.asarray(b1w),
        "c2": jnp.asarray(c2),
        "b2d": jnp.asarray(b2d),
        "pool_l": jnp.asarray(pool_l),
        "pool_r": jnp.asarray(pool_r),
        "p": jnp.asarray(p),
        "w1r": jnp.asarray(w1r).astype(jnp.bfloat16),   # bf16 MXU inputs (v6e/v7x)
        "b1rw": jnp.asarray(b1rw),
        "w2bd": jnp.asarray(w2bd).astype(jnp.bfloat16),
        "b2rw": jnp.asarray(b2rw),
    }


# ----------------------------------------------------------------------------
# Device-side pipeline: one fused pallas_call over page blocks
# ----------------------------------------------------------------------------
def _pick_page_block(n):
    """Largest B <= 8 dividing n that still leaves >= 2 grid steps (megacore)."""
    best = 1
    for b in range(1, min(8, n) + 1):
        if n % b == 0 and (n // b >= 2 or n == 1):
            best = b
    return best


def _const_spec(arr):
    nd = arr.ndim
    return pl.BlockSpec(arr.shape, lambda n, _nd=nd: (0,) * _nd)


@jax.jit
def ocr_device_pipeline(pages, prep):
    N, C, H, W = pages.shape
    assert C == CHANNELS and H == PAGE_H and W == PAGE_W
    B = _pick_page_block(N)
    G = GRID

    kernel = functools.partial(
        _ocr_page_block_kernel,
        B=B, C=C, H=H, W=W, H1=DET_HIDDEN, G=G, HID=RECO_HIDDEN,
        SEQ=SEQ_LEN, V=VOCAB, NOUT_=NOUT)

    grid_spec = pltpu.PrefetchScalarGridSpec(
        num_scalar_prefetch=0,
        grid=(N // B,),
        in_specs=[
            pl.BlockSpec((B, C, H, W), lambda n: (n, 0, 0, 0)),
            _const_spec(prep["s"]),
            _const_spec(prep["bb1"]),
            _const_spec(prep["b1w"]),
            _const_spec(prep["c2"]),
            _const_spec(prep["b2d"]),
            _const_spec(prep["pool_l"]),
            _const_spec(prep["pool_r"]),
            _const_spec(prep["p"]),
            _const_spec(prep["w1r"]),
            _const_spec(prep["b1rw"]),
            _const_spec(prep["w2bd"]),
            _const_spec(prep["b2rw"]),
        ],
        out_specs=(
            pl.BlockSpec((B, 1, G * G), lambda n: (n, 0, 0)),
            pl.BlockSpec((B, G, G * SEQ_LEN), lambda n: (n, 0, 0)),
            pl.BlockSpec((B, G, G), lambda n: (n, 0, 0)),
        ),
    )

    scores, word_idx, word_conf = pl.pallas_call(
        kernel,
        out_shape=(
            jax.ShapeDtypeStruct((N, 1, G * G), jnp.float32),
            jax.ShapeDtypeStruct((N, G, G * SEQ_LEN), jnp.int32),
            jax.ShapeDtypeStruct((N, G, G), jnp.float32),
        ),
        grid_spec=grid_spec,
        compiler_params=pltpu.CompilerParams(
            dimension_semantics=("parallel",),   # page blocks shard across TCs
            vmem_limit_bytes=VMEM_LIMIT_BYTES,
        ),
    )(pages, prep["s"], prep["bb1"], prep["b1w"], prep["c2"], prep["b2d"],
      prep["pool_l"], prep["pool_r"], prep["p"], prep["w1r"], prep["b1rw"],
      prep["w2bd"], prep["b2rw"])
    return scores, word_idx, word_conf


# ----------------------------------------------------------------------------
# Host-side document builder (mirrors doctr DocumentBuilder output)
# ----------------------------------------------------------------------------
def build_document(scores, word_idx, word_conf, page_shapes, grid=GRID):
    scores_h, idx_h, conf_h = jax.device_get((scores, word_idx, word_conf))
    doc = []
    for n, shape in enumerate(page_shapes):
        words = []
        for gy in range(grid):
            for gx in range(grid):
                chars = "".join(
                    CHARSET[int(idx_h[n, gy, gx * SEQ_LEN + s])] for s in range(SEQ_LEN))
                words.append({
                    "value": chars,
                    "confidence": float(conf_h[n, gy, gx]),
                    "geometry": (gx / grid, gy / grid, (gx + 1) / grid, (gy + 1) / grid),
                    "det_score": float(scores_h[n, 0, gy * grid + gx]),
                })
        doc.append({"dimensions": shape, "words": words})
    return doc


def ocr_predictor_forward(pages, prep):
    assert pages.ndim == 4, "pages expected as stacked (N, C, H, W)"
    scores, word_idx, word_conf = ocr_device_pipeline(pages, prep)
    jax.block_until_ready((scores, word_idx, word_conf))
    page_shapes = [tuple(pages.shape[-2:])] * pages.shape[0]
    return build_document(scores, word_idx, word_conf, page_shapes)


# ----------------------------------------------------------------------------
# Deterministic parameter init + pure-JAX reference (for a light self-check)
# ----------------------------------------------------------------------------
def init_raw_params(key):
    k = jax.random.split(key, 8)
    feat = CHANNELS * RH * RW
    return {
        "det_w1": jax.random.normal(k[0], (DET_HIDDEN, CHANNELS, 3, 3), jnp.float32) * 0.1,
        "det_b1": jax.random.normal(k[1], (DET_HIDDEN,), jnp.float32) * 0.01,
        "det_w2": jax.random.normal(k[2], (1, DET_HIDDEN, 3, 3), jnp.float32) * 0.1,
        "det_b2": jax.random.normal(k[3], (1,), jnp.float32) * 0.01,
        "reco_w1": jax.random.normal(k[4], (feat, RECO_HIDDEN), jnp.float32) * 0.05,
        "reco_b1": jax.random.normal(k[5], (RECO_HIDDEN,), jnp.float32) * 0.01,
        "reco_w2": jax.random.normal(k[6], (RECO_HIDDEN, NOUT), jnp.float32) * 0.05,
        "reco_b2": jax.random.normal(k[7], (NOUT,), jnp.float32) * 0.01,
    }


def reference_pipeline(pages, raw):
    N = pages.shape[0]
    dn = ("NCHW", "OIHW", "NCHW")
    f1 = jax.lax.conv_general_dilated(pages, raw["det_w1"], (1, 1), "SAME",
                                      dimension_numbers=dn)
    f1 = jax.nn.relu(f1 + raw["det_b1"][None, :, None, None])
    f2 = jax.lax.conv_general_dilated(f1, raw["det_w2"], (1, 1), "SAME",
                                      dimension_numbers=dn)
    prob = jax.nn.sigmoid(f2 + raw["det_b2"][None, :, None, None])[:, 0]
    scores = prob.reshape(N, GRID, RH, GRID, RW).mean(axis=(2, 4)).reshape(N, GRID * GRID)
    crops = pages.reshape(N, CHANNELS, GRID, RH, GRID, RW).transpose(0, 2, 4, 1, 3, 5)
    feats = crops.reshape(N * GRID * GRID, CHANNELS * RH * RW)
    h = jax.nn.relu(feats @ raw["reco_w1"] + raw["reco_b1"][None, :])
    logits = (h @ raw["reco_w2"] + raw["reco_b2"][None, :]).reshape(
        N, GRID, GRID, SEQ_LEN, VOCAB)
    pmax = jax.nn.softmax(logits, axis=-1).max(axis=-1)
    conf = pmax.min(axis=-1)
    idx = jnp.argmax(logits, axis=-1)
    return scores, idx, conf


if __name__ == "__main__":
    key = jax.random.PRNGKey(0)
    kp, kx = jax.random.split(key)
    raw = init_raw_params(kp)
    prep = prepare_kernel_params(raw)

    # 2 pages, 3 channels, 32x32 spatial (small synthetic documents)
    pages = jax.random.uniform(kx, (2, CHANNELS, PAGE_H, PAGE_W), jnp.float32)

    scores, word_idx, word_conf = ocr_device_pipeline(pages, prep)
    jax.block_until_ready((scores, word_idx, word_conf))

    # Light numerical self-check against a pure-JAX reference (tolerances cover
    # the bf16 MXU inputs used for the recognition matmuls).
    ref_scores, ref_idx, ref_conf = reference_pipeline(pages, raw)
    assert np.allclose(np.asarray(scores)[:, 0, :], np.asarray(ref_scores), atol=2e-2)
    assert np.allclose(np.asarray(word_conf), np.asarray(ref_conf), atol=3e-2)
    wi = np.asarray(word_idx)
    assert wi.min() >= 0 and wi.max() < VOCAB

    page_shapes = [tuple(pages.shape[-2:])] * pages.shape[0]
    doc = build_document(scores, word_idx, word_conf, page_shapes)

    assert len(doc) == 2
    assert len(doc[0]["words"]) == GRID * GRID
    assert all(len(w["value"]) == SEQ_LEN for w in doc[0]["words"])
    assert all(0.0 <= w["det_score"] <= 1.0 for w in doc[0]["words"])
    assert all(0.0 < w["confidence"] <= 1.0 for w in doc[0]["words"])
    print("KERNEL_OK")
</pallas_src>

<mosaic_0001>
module attributes {stable_mosaic.version = 11 : i64} {
  func.func @_ocr_page_block_kernel(%arg0: i32, %arg1: memref<1x3x32x32xf32, #tpu.memory_space<vmem>>, %arg2: memref<3x32x32xf32, #tpu.memory_space<vmem>>, %arg3: memref<3x32x768xf32, #tpu.memory_space<vmem>>, %arg4: memref<1x256xf32, #tpu.memory_space<vmem>>, %arg5: memref<256x96xf32, #tpu.memory_space<vmem>>, %arg6: memref<1x1xf32, #tpu.memory_space<vmem>>, %arg7: memref<4x32xf32, #tpu.memory_space<vmem>>, %arg8: memref<32x4xf32, #tpu.memory_space<vmem>>, %arg9: memref<8x4x32xf32, #tpu.memory_space<vmem>>, %arg10: memref<3x32x2048xbf16, #tpu.memory_space<vmem>>, %arg11: memref<1x256xf32, #tpu.memory_space<vmem>>, %arg12: memref<256x256xbf16, #tpu.memory_space<vmem>>, %arg13: memref<1x256xf32, #tpu.memory_space<vmem>>, %arg14: memref<1x1x16xf32, #tpu.memory_space<vmem>>, %arg15: memref<1x4x16xi32, #tpu.memory_space<vmem>>, %arg16: memref<1x4x4xf32, #tpu.memory_space<vmem>>) attributes {dimension_semantics = [#tpu.dimension_semantics<parallel>], iteration_bounds = array<i64: 2>, scalar_prefetch = 0 : i64, scratch_operands = 0 : i64, tpu.core_type = #tpu.core_type<tc>, window_params = [{transform_indices = @transform_0, window_bounds = array<i64: 1, 3, 32, 32>}, {pipeline_mode = #tpu.pipeline_mode<synchronous>, transform_indices = @transform_1, window_bounds = array<i64: 3, 32, 32>}, {pipeline_mode = #tpu.pipeline_mode<synchronous>, transform_indices = @transform_2, window_bounds = array<i64: 3, 32, 768>}, {pipeline_mode = #tpu.pipeline_mode<synchronous>, transform_indices = @transform_3, window_bounds = array<i64: 1, 256>}, {pipeline_mode = #tpu.pipeline_mode<synchronous>, transform_indices = @transform_4, window_bounds = array<i64: 256, 96>}, {pipeline_mode = #tpu.pipeline_mode<synchronous>, transform_indices = @transform_5, window_bounds = array<i64: 1, 1>}, {pipeline_mode = #tpu.pipeline_mode<synchronous>, transform_indices = @transform_6, window_bounds = array<i64: 4, 32>}, {pipeline_mode = #tpu.pipeline_mode<synchronous>, transform_indices = @transform_7, window_bounds = array<i64: 32, 4>}, {pipeline_mode = #tpu.pipeline_mode<synchronous>, transform_indices = @transform_8, window_bounds = array<i64: 8, 4, 32>}, {pipeline_mode = #tpu.pipeline_mode<synchronous>, transform_indices = @transform_9, window_bounds = array<i64: 3, 32, 2048>}, {pipeline_mode = #tpu.pipeline_mode<synchronous>, transform_indices = @transform_10, window_bounds = array<i64: 1, 256>}, {pipeline_mode = #tpu.pipeline_mode<synchronous>, transform_indices = @transform_11, window_bounds = array<i64: 256, 256>}, {pipeline_mode = #tpu.pipeline_mode<synchronous>, transform_indices = @transform_12, window_bounds = array<i64: 1, 256>}, {transform_indices = @transform_13, window_bounds = array<i64: 1, 1, 16>}, {transform_indices = @transform_14, window_bounds = array<i64: 1, 4, 16>}, {transform_indices = @transform_15, window_bounds = array<i64: 1, 4, 4>}]} {
    %c0 = arith.constant 0 : index
    %c0_0 = arith.constant 0 : index
    %c0_1 = arith.constant 0 : index
    %c0_2 = arith.constant 0 : index
    %0 = vector.load %arg1[%c0, %c0_0, %c0_1, %c0_2] : memref<1x3x32x32xf32, #tpu.memory_space<vmem>>, vector<1x3x32x32xf32>
    %c0_3 = arith.constant 0 : index
    %c0_4 = arith.constant 0 : index
    %c0_5 = arith.constant 0 : index
    %1 = vector.load %arg2[%c0_3, %c0_4, %c0_5] : memref<3x32x32xf32, #tpu.memory_space<vmem>>, vector<3x32x32xf32>
    %2 = vector.extract_strided_slice %1 {offsets = [0, 0, 0], sizes = [1, 32, 32], strides = [1, 1, 1]} : vector<3x32x32xf32> to vector<1x32x32xf32>
    %3 = vector.shape_cast %2 : vector<1x32x32xf32> to vector<32x32xf32>
    %4 = vector.shape_cast %3 : vector<32x32xf32> to vector<1x32x32xf32>
    %5 = vector.extract_strided_slice %1 {offsets = [1, 0, 0], sizes = [1, 32, 32], strides = [1, 1, 1]} : vector<3x32x32xf32> to vector<1x32x32xf32>
    %6 = vector.shape_cast %5 : vector<1x32x32xf32> to vector<32x32xf32>
    %7 = vector.shape_cast %6 : vector<32x32xf32> to vector<1x32x32xf32>
    %8 = vector.extract_strided_slice %1 {offsets = [2, 0, 0], sizes = [1, 32, 32], strides = [1, 1, 1]} : vector<3x32x32xf32> to vector<1x32x32xf32>
    %9 = vector.shape_cast %8 : vector<1x32x32xf32> to vector<32x32xf32>
    %10 = vector.shape_cast %9 : vector<32x32xf32> to vector<1x32x32xf32>
    %cst = arith.constant 0.000000e+00 : f32
    %11 = vector.broadcast %cst : f32 to vector<32x768xf32>
    %12 = vector.extract_strided_slice %0 {offsets = [0, 0, 0, 0], sizes = [1, 1, 32, 32], strides = [1, 1, 1, 1]} : vector<1x3x32x32xf32> to vector<1x1x32x32xf32>
    %13 = vector.shape_cast %12 : vector<1x1x32x32xf32> to vector<1x32x32xf32>
    %14 = vector.shape_cast %13 : vector<1x32x32xf32> to vector<32x32xf32>
    %c0_6 = arith.constant 0 : index
    %c0_7 = arith.constant 0 : index
    %c0_8 = arith.constant 0 : index
    %15 = vector.load %arg3[%c0_6, %c0_7, %c0_8] : memref<3x32x768xf32, #tpu.memory_space<vmem>>, vector<1x32x768xf32>
    %16 = vector.shape_cast %15 : vector<1x32x768xf32> to vector<32x768xf32>
    %cst_9 = arith.constant dense<0.000000e+00> : vector<32x768xf32>
    %17 = tpu.matmul %14, %16, %cst_9 {dimension_numbers = #tpu.dot_dimension_numbers<[1], [0], [0], [1], [0, 0, 1, 1], [], []>} : vector<32x32xf32>, vector<32x768xf32>, vector<32x768xf32> -> vector<32x768xf32>
    %18 = arith.addf %11, %17 : vector<32x768xf32>
    %19 = vector.extract_strided_slice %0 {offsets = [0, 1, 0, 0], sizes = [1, 1, 32, 32], strides = [1, 1, 1, 1]} : vector<1x3x32x32xf32> to vector<1x1x32x32xf32>
    %20 = vector.shape_cast %19 : vector<1x1x32x32xf32> to vector<1x32x32xf32>
    %21 = vector.shape_cast %20 : vector<1x32x32xf32> to vector<32x32xf32>
    %c1 = arith.constant 1 : index
    %c0_10 = arith.constant 0 : index
    %c0_11 = arith.constant 0 : index
    %22 = vector.load %arg3[%c1, %c0_10, %c0_11] : memref<3x32x768xf32, #tpu.memory_space<vmem>>, vector<1x32x768xf32>
    %23 = vector.shape_cast %22 : vector<1x32x768xf32> to vector<32x768xf32>
    %cst_12 = arith.constant dense<0.000000e+00> : vector<32x768xf32>
    %24 = tpu.matmul %21, %23, %cst_12 {dimension_numbers = #tpu.dot_dimension_numbers<[1], [0], [0], [1], [0, 0, 1, 1], [], []>} : vector<32x32xf32>, vector<32x768xf32>, vector<32x768xf32> -> vector<32x768xf32>
    %25 = arith.addf %18, %24 : vector<32x768xf32>
    %26 = vector.extract_strided_slice %0 {offsets = [0, 2, 0, 0], sizes = [1, 1, 32, 32], strides = [1, 1, 1, 1]} : vector<1x3x32x32xf32> to vector<1x1x32x32xf32>
    %27 = vector.shape_cast %26 : vector<1x1x32x32xf32> to vector<1x32x32xf32>
    %28 = vector.shape_cast %27 : vector<1x32x32xf32> to vector<32x32xf32>
    %c2 = arith.constant 2 : index
    %c0_13 = arith.constant 0 : index
    %c0_14 = arith.constant 0 : index
    %29 = vector.load %arg3[%c2, %c0_13, %c0_14] : memref<3x32x768xf32, #tpu.memory_space<vmem>>, vector<1x32x768xf32>
    %30 = vector.shape_cast %29 : vector<1x32x768xf32> to vector<32x768xf32>
    %cst_15 = arith.constant dense<0.000000e+00> : vector<32x768xf32>
    %31 = tpu.matmul %28, %30, %cst_15 {dimension_numbers = #tpu.dot_dimension_numbers<[1], [0], [0], [1], [0, 0, 1, 1], [], []>} : vector<32x32xf32>, vector<32x768xf32>, vector<32x768xf32> -> vector<32x768xf32>
    %32 = arith.addf %25, %31 : vector<32x768xf32>
    %33 = vector.shape_cast %32 : vector<32x768xf32> to vector<1x32x768xf32>
    %cst_16 = arith.constant 0.000000e+00 : f32
    %34 = vector.broadcast %cst_16 : f32 to vector<1x32x256xf32>
    %35 = vector.extract_strided_slice %33 {offsets = [0, 0, 0], sizes = [1, 32, 256], strides = [1, 1, 1]} : vector<1x32x768xf32> to vector<1x32x256xf32>
    "tpu.trace_start"() <{level = 10 : i32, message = "byh,bhv->byv"}> : () -> ()
    %cst_17 = arith.constant dense<0.000000e+00> : vector<1x32x256xf32>
    %36 = tpu.matmul %4, %35, %cst_17 {dimension_numbers = #tpu.dot_dimension_numbers<[2], [1], [1], [2], [0, 0, 0, 1, 1, 2], [0], [0]>} : vector<1x32x32xf32>, vector<1x32x256xf32>, vector<1x32x256xf32> -> vector<1x32x256xf32>
    "tpu.trace_stop"() : () -> ()
    %37 = arith.addf %34, %36 : vector<1x32x256xf32>
    %38 = vector.extract_strided_slice %33 {offsets = [0, 0, 256], sizes = [1, 32, 256], strides = [1, 1, 1]} : vector<1x32x768xf32> to vector<1x32x256xf32>
    "tpu.trace_start"() <{level = 10 : i32, message = "byh,bhv->byv"}> : () -> ()
    %cst_18 = arith.constant dense<0.000000e+00> : vector<1x32x256xf32>
    %39 = tpu.matmul %7, %38, %cst_18 {dimension_numbers = #tpu.dot_dimension_numbers<[2], [1], [1], [2], [0, 0, 0, 1, 1, 2], [0], [0]>} : vector<1x32x32xf32>, vector<1x32x256xf32>, vector<1x32x256xf32> -> vector<1x32x256xf32>
    "tpu.trace_stop"() : () -> ()
    %40 = arith.addf %37, %39 : vector<1x32x256xf32>
    %41 = vector.extract_strided_slice %33 {offsets = [0, 0, 512], sizes = [1, 32, 256], strides = [1, 1, 1]} : vector<1x32x768xf32> to vector<1x32x256xf32>
    "tpu.trace_start"() <{level = 10 : i32, message = "byh,bhv->byv"}> : () -> ()
    %cst_19 = arith.constant dense<0.000000e+00> : vector<1x32x256xf32>
    %42 = tpu.matmul %10, %41, %cst_19 {dimension_numbers = #tpu.dot_dimension_numbers<[2], [1], [1], [2], [0, 0, 0, 1, 1, 2], [0], [0]>} : vector<1x32x32xf32>, vector<1x32x256xf32>, vector<1x32x256xf32> -> vector<1x32x256xf32>
    "tpu.trace_stop"() : () -> ()
    %43 = arith.addf %40, %42 : vector<1x32x256xf32>
    %c0_20 = arith.constant 0 : index
    %c0_21 = arith.constant 0 : index
    %44 = vector.load %arg4[%c0_20, %c0_21] : memref<1x256xf32, #tpu.memory_space<vmem>>, vector<1x256xf32>
    %45 = vector.shape_cast %44 : vector<1x256xf32> to vector<1x1x256xf32>
    %46 = vector.broadcast %45 : vector<1x1x256xf32> to vector<1x32x256xf32>
    %47 = arith.addf %43, %46 : vector<1x32x256xf32>
    %cst_22 = arith.constant 0.000000e+00 : f32
    %48 = vector.broadcast %cst_22 : f32 to vector<1x32x256xf32>
    %49 = arith.maximumf %47, %48 : vector<1x32x256xf32>
    %50 = vector.shape_cast %49 : vector<1x32x256xf32> to vector<32x256xf32>
    %c0_23 = arith.constant 0 : index
    %c0_24 = arith.constant 0 : index
    %51 = vector.load %arg5[%c0_23, %c0_24] : memref<256x96xf32, #tpu.memory_space<vmem>>, vector<256x96xf32>
    %cst_25 = arith.constant dense<0.000000e+00> : vector<32x96xf32>
    %52 = tpu.matmul %50, %51, %cst_25 {dimension_numbers = #tpu.dot_dimension_numbers<[1], [0], [0], [1], [0, 0, 1, 1], [], []>} : vector<32x256xf32>, vector<256x96xf32>, vector<32x96xf32> -> vector<32x96xf32>
    %53 = vector.shape_cast %52 : vector<32x96xf32> to vector<1x32x96xf32>
    %cst_26 = arith.constant 0.000000e+00 : f32
    %54 = vector.broadcast %cst_26 : f32 to vector<1x32x32xf32>
    %55 = vector.extract_strided_slice %53 {offsets = [0, 0, 0], sizes = [1, 32, 32], strides = [1, 1, 1]} : vector<1x32x96xf32> to vector<1x32x32xf32>
    "tpu.trace_start"() <{level = 10 : i32, message = "byh,bhw->byw"}> : () -> ()
    %cst_27 = arith.constant dense<0.000000e+00> : vector<1x32x32xf32>
    %56 = tpu.matmul %4, %55, %cst_27 {dimension_numbers = #tpu.dot_dimension_numbers<[2], [1], [1], [2], [0, 0, 0, 1, 1, 2], [0], [0]>} : vector<1x32x32xf32>, vector<1x32x32xf32>, vector<1x32x32xf32> -> vector<1x32x32xf32>
    "tpu.trace_stop"() : () -> ()
    %57 = arith.addf %54, %56 : vector<1x32x32xf32>
    %58 = vector.extract_strided_slice %53 {offsets = [0, 0, 32], sizes = [1, 32, 32], strides = [1, 1, 1]} : vector<1x32x96xf32> to vector<1x32x32xf32>
    "tpu.trace_start"() <{level = 10 : i32, message = "byh,bhw->byw"}> : () -> ()
    %cst_28 = arith.constant dense<0.000000e+00> : vector<1x32x32xf32>
    %59 = tpu.matmul %7, %58, %cst_28 {dimension_numbers = #tpu.dot_dimension_numbers<[2], [1], [1], [2], [0, 0, 0, 1, 1, 2], [0], [0]>} : vector<1x32x32xf32>, vector<1x32x32xf32>, vector<1x32x32xf32> -> vector<1x32x32xf32>
    "tpu.trace_stop"() : () -> ()
    %60 = arith.addf %57, %59 : vector<1x32x32xf32>
    %61 = vector.extract_strided_slice %53 {offsets = [0, 0, 64], sizes = [1, 32, 32], strides = [1, 1, 1]} : vector<1x32x96xf32> to vector<1x32x32xf32>
    "tpu.trace_start"() <{level = 10 : i32, message = "byh,bhw->byw"}> : () -> ()
    %cst_29 = arith.constant dense<0.000000e+00> : vector<1x32x32xf32>
    %62 = tpu.matmul %10, %61, %cst_29 {dimension_numbers = #tpu.dot_dimension_numbers<[2], [1], [1], [2], [0, 0, 0, 1, 1, 2], [0], [0]>} : vector<1x32x32xf32>, vector<1x32x32xf32>, vector<1x32x32xf32> -> vector<1x32x32xf32>
    "tpu.trace_stop"() : () -> ()
    %63 = arith.addf %60, %62 : vector<1x32x32xf32>
    %c0_30 = arith.constant 0 : index
    %c0_31 = arith.constant 0 : index
    %64 = vector.load %arg6[%c0_30, %c0_31] : memref<1x1xf32, #tpu.memory_space<vmem>>, vector<1x1xf32>
    %65 = vector.shape_cast %64 : vector<1x1xf32> to vector<1x1x1xf32>
    %66 = vector.broadcast %65 : vector<1x1x1xf32> to vector<1x32x32xf32>
    %67 = arith.addf %63, %66 : vector<1x32x32xf32>
    %68 = arith.negf %67 : vector<1x32x32xf32>
    %69 = math.exp %68 : vector<1x32x32xf32>
    %cst_32 = arith.constant 1.000000e+00 : f32
    %70 = vector.broadcast %cst_32 : f32 to vector<1x32x32xf32>
    %71 = arith.addf %70, %69 : vector<1x32x32xf32>
    %72 = arith.divf %70, %71 : vector<1x32x32xf32>
    %c0_33 = arith.constant 0 : index
    %c0_34 = arith.constant 0 : index
    %73 = vector.load %arg7[%c0_33, %c0_34] : memref<4x32xf32, #tpu.memory_space<vmem>>, vector<4x32xf32>
    %74 = vector.shape_cast %73 : vector<4x32xf32> to vector<1x4x32xf32>
    "tpu.trace_start"() <{level = 10 : i32, message = "bgh,bhw->bgw"}> : () -> ()
    %cst_35 = arith.constant dense<0.000000e+00> : vector<1x4x32xf32>
    %75 = tpu.matmul %74, %72, %cst_35 {dimension_numbers = #tpu.dot_dimension_numbers<[2], [1], [1], [2], [0, 0, 0, 1, 1, 2], [0], [0]>} : vector<1x4x32xf32>, vector<1x32x32xf32>, vector<1x4x32xf32> -> vector<1x4x32xf32>
    "tpu.trace_stop"() : () -> ()
    %76 = vector.shape_cast %75 : vector<1x4x32xf32> to vector<4x32xf32>
    %c0_36 = arith.constant 0 : index
    %c0_37 = arith.constant 0 : index
    %77 = vector.load %arg8[%c0_36, %c0_37] : memref<32x4xf32, #tpu.memory_space<vmem>>, vector<32x4xf32>
    %cst_38 = arith.constant dense<0.000000e+00> : vector<4x4xf32>
    %78 = tpu.matmul %76, %77, %cst_38 {dimension_numbers = #tpu.dot_dimension_numbers<[1], [0], [0], [1], [0, 0, 1, 1], [], []>} : vector<4x32xf32>, vector<32x4xf32>, vector<4x4xf32> -> vector<4x4xf32>
    %79 = vector.shape_cast %78 : vector<4x4xf32> to vector<1x4x4xf32>
    %80 = vector.extract_strided_slice %79 {offsets = [0, 0, 0], sizes = [1, 1, 4], strides = [1, 1, 1]} : vector<1x4x4xf32> to vector<1x1x4xf32>
    %81 = vector.shape_cast %80 : vector<1x1x4xf32> to vector<1x4xf32>
    %82 = vector.extract_strided_slice %79 {offsets = [0, 1, 0], sizes = [1, 1, 4], strides = [1, 1, 1]} : vector<1x4x4xf32> to vector<1x1x4xf32>
    %83 = vector.shape_cast %82 : vector<1x1x4xf32> to vector<1x4xf32>
    %84 = vector.extract_strided_slice %79 {offsets = [0, 2, 0], sizes = [1, 1, 4], strides = [1, 1, 1]} : vector<1x4x4xf32> to vector<1x1x4xf32>
    %85 = vector.shape_cast %84 : vector<1x1x4xf32> to vector<1x4xf32>
    %86 = vector.extract_strided_slice %79 {offsets = [0, 3, 0], sizes = [1, 1, 4], strides = [1, 1, 1]} : vector<1x4x4xf32> to vector<1x1x4xf32>
    %87 = vector.shape_cast %86 : vector<1x1x4xf32> to vector<1x4xf32>
    %88 = tpu.concatenate %81, %83, %85, %87 in 1 : vector<1x4xf32>, vector<1x4xf32>, vector<1x4xf32>, vector<1x4xf32> -> vector<1x16xf32>
    %89 = vector.shape_cast %88 : vector<1x16xf32> to vector<1x1x16xf32>
    %c0_39 = arith.constant 0 : index
    %c0_40 = arith.constant 0 : index
    %c0_41 = arith.constant 0 : index
    %90 = vector.load %arg14[%c0_39, %c0_40, %c0_41] : memref<1x1x16xf32, #tpu.memory_space<vmem>>, vector<1x1x16xf32>
    tpu.vector_store %arg14[%c0_39, %c0_40, %c0_41], %89 {strides = array<i32>} : memref<1x1x16xf32, #tpu.memory_space<vmem>>, vector<1x1x16xf32>,
    %cst_42 = arith.constant 0.000000e+00 : f32
    %91 = vector.broadcast %cst_42 : f32 to vector<32x2048xf32>
    %92 = vector.extract_strided_slice %0 {offsets = [0, 0, 0, 0], sizes = [1, 1, 32, 32], strides = [1, 1, 1, 1]} : vector<1x3x32x32xf32> to vector<1x1x32x32xf32>
    %93 = vector.shape_cast %92 : vector<1x1x32x32xf32> to vector<1x32x32xf32>
    %94 = vector.shape_cast %93 : vector<1x32x32xf32> to vector<32x32xf32>
    %95 = arith.truncf %94 : vector<32x32xf32> to vector<32x32xbf16>
    %c0_43 = arith.constant 0 : index
    %c0_44 = arith.constant 0 : index
    %c0_45 = arith.constant 0 : index
    %96 = vector.load %arg10[%c0_43, %c0_44, %c0_45] : memref<3x32x2048xbf16, #tpu.memory_space<vmem>>, vector<1x32x2048xbf16>
    %97 = vector.shape_cast %96 : vector<1x32x2048xbf16> to vector<32x2048xbf16>
    %cst_46 = arith.constant dense<0.000000e+00> : vector<32x2048xf32>
    %98 = tpu.matmul %95, %97, %cst_46 {dimension_numbers = #tpu.dot_dimension_numbers<[1], [0], [0], [1], [0, 0, 1, 1], [], []>} : vector<32x32xbf16>, vector<32x2048xbf16>, vector<32x2048xf32> -> vector<32x2048xf32>
    %99 = arith.addf %91, %98 : vector<32x2048xf32>
    %100 = vector.extract_strided_slice %0 {offsets = [0, 1, 0, 0], sizes = [1, 1, 32, 32], strides = [1, 1, 1, 1]} : vector<1x3x32x32xf32> to vector<1x1x32x32xf32>
    %101 = vector.shape_cast %100 : vector<1x1x32x32xf32> to vector<1x32x32xf32>
    %102 = vector.shape_cast %101 : vector<1x32x32xf32> to vector<32x32xf32>
    %103 = arith.truncf %102 : vector<32x32xf32> to vector<32x32xbf16>
    %c1_47 = arith.constant 1 : index
    %c0_48 = arith.constant 0 : index
    %c0_49 = arith.constant 0 : index
    %104 = vector.load %arg10[%c1_47, %c0_48, %c0_49] : memref<3x32x2048xbf16, #tpu.memory_space<vmem>>, vector<1x32x2048xbf16>
    %105 = vector.shape_cast %104 : vector<1x32x2048xbf16> to vector<32x2048xbf16>
    %cst_50 = arith.constant dense<0.000000e+00> : vector<32x2048xf32>
    %106 = tpu.matmul %103, %105, %cst_50 {dimension_numbers = #tpu.dot_dimension_numbers<[1], [0], [0], [1], [0, 0, 1, 1], [], []>} : vector<32x32xbf16>, vector<32x2048xbf16>, vector<32x2048xf32> -> vector<32x2048xf32>
    %107 = arith.addf %99, %106 : vector<32x2048xf32>
    %108 = vector.extract_strided_slice %0 {offsets = [0, 2, 0, 0], sizes = [1, 1, 32, 32], strides = [1, 1, 1, 1]} : vector<1x3x32x32xf32> to vector<1x1x32x32xf32>
    %109 = vector.shape_cast %108 : vector<1x1x32x32xf32> to vector<1x32x32xf32>
    %110 = vector.shape_cast %109 : vector<1x32x32xf32> to vector<32x32xf32>
    %111 = arith.truncf %110 : vector<32x32xf32> to vector<32x32xbf16>
    %c2_51 = arith.constant 2 : index
    %c0_52 = arith.constant 0 : index
    %c0_53 = arith.constant 0 : index
    %112 = vector.load %arg10[%c2_51, %c0_52, %c0_53] : memref<3x32x2048xbf16, #tpu.memory_space<vmem>>, vector<1x32x2048xbf16>
    %113 = vector.shape_cast %112 : vector<1x32x2048xbf16> to vector<32x2048xbf16>
    %cst_54 = arith.constant dense<0.000000e+00> : vector<32x2048xf32>
    %114 = tpu.matmul %111, %113, %cst_54 {dimension_numbers = #tpu.dot_dimension_numbers<[1], [0], [0], [1], [0, 0, 1, 1], [], []>} : vector<32x32xbf16>, vector<32x2048xbf16>, vector<32x2048xf32> -> vector<32x2048xf32>
    %115 = arith.addf %107, %114 : vector<32x2048xf32>
    %116 = vector.shape_cast %115 : vector<32x2048xf32> to vector<1x32x2048xf32>
    %c0_55 = arith.constant 0 : index
    %c0_56 = arith.constant 0 : index
    %c0_57 = arith.constant 0 : index
    %117 = vector.load %arg9[%c0_55, %c0_56, %c0_57] : memref<8x4x32xf32, #tpu.memory_space<vmem>>, vector<8x4x32xf32>
    %cst_58 = arith.constant 0.000000e+00 : f32
    %118 = vector.broadcast %cst_58 : f32 to vector<1x4x256xf32>
    %119 = vector.extract_strided_slice %117 {offsets = [0, 0, 0], sizes = [1, 4, 32], strides = [1, 1, 1]} : vector<8x4x32xf32> to vector<1x4x32xf32>
    %120 = vector.shape_cast %119 : vector<1x4x32xf32> to vector<4x32xf32>
    %121 = vector.shape_cast %120 : vector<4x32xf32> to vector<1x4x32xf32>
    %122 = vector.extract_strided_slice %116 {offsets = [0, 0, 0], sizes = [1, 32, 256], strides = [1, 1, 1]} : vector<1x32x2048xf32> to vector<1x32x256xf32>
    "tpu.trace_start"() <{level = 10 : i32, message = "bgh,bhv->bgv"}> : () -> ()
    %cst_59 = arith.constant dense<0.000000e+00> : vector<1x4x256xf32>
    %123 = tpu.matmul %121, %122, %cst_59 {dimension_numbers = #tpu.dot_dimension_numbers<[2], [1], [1], [2], [0, 0, 0, 1, 1, 2], [0], [0]>} : vector<1x4x32xf32>, vector<1x32x256xf32>, vector<1x4x256xf32> -> vector<1x4x256xf32>
    "tpu.trace_stop"() : () -> ()
    %124 = arith.addf %118, %123 : vector<1x4x256xf32>
    %125 = vector.extract_strided_slice %117 {offsets = [1, 0, 0], sizes = [1, 4, 32], strides = [1, 1, 1]} : vector<8x4x32xf32> to vector<1x4x32xf32>
    %126 = vector.shape_cast %125 : vector<1x4x32xf32> to vector<4x32xf32>
    %127 = vector.shape_cast %126 : vector<4x32xf32> to vector<1x4x32xf32>
    %128 = vector.extract_strided_slice %116 {offsets = [0, 0, 256], sizes = [1, 32, 256], strides = [1, 1, 1]} : vector<1x32x2048xf32> to vector<1x32x256xf32>
    "tpu.trace_start"() <{level = 10 : i32, message = "bgh,bhv->bgv"}> : () -> ()
    %cst_60 = arith.constant dense<0.000000e+00> : vector<1x4x256xf32>
    %129 = tpu.matmul %127, %128, %cst_60 {dimension_numbers = #tpu.dot_dimension_numbers<[2], [1], [1], [2], [0, 0, 0, 1, 1, 2], [0], [0]>} : vector<1x4x32xf32>, vector<1x32x256xf32>, vector<1x4x256xf32> -> vector<1x4x256xf32>
    "tpu.trace_stop"() : () -> ()
    %130 = arith.addf %124, %129 : vector<1x4x256xf32>
    %131 = vector.extract_strided_slice %117 {offsets = [2, 0, 0], sizes = [1, 4, 32], strides = [1, 1, 1]} : vector<8x4x32xf32> to vector<1x4x32xf32>
    %132 = vector.shape_cast %131 : vector<1x4x32xf32> to vector<4x32xf32>
    %133 = vector.shape_cast %132 : vector<4x32xf32> to vector<1x4x32xf32>
    %134 = vector.extract_strided_slice %116 {offsets = [0, 0, 512], sizes = [1, 32, 256], strides = [1, 1, 1]} : vector<1x32x2048xf32> to vector<1x32x256xf32>
    "tpu.trace_start"() <{level = 10 : i32, message = "bgh,bhv->bgv"}> : () -> ()
    %cst_61 = arith.constant dense<0.000000e+00> : vector<1x4x256xf32>
    %135 = tpu.matmul %133, %134, %cst_61 {dimension_numbers = #tpu.dot_dimension_numbers<[2], [1], [1], [2], [0, 0, 0, 1, 1, 2], [0], [0]>} : vector<1x4x32xf32>, vector<1x32x256xf32>, vector<1x4x256xf32> -> vector<1x4x256xf32>
    "tpu.trace_stop"() : () -> ()
    %136 = arith.addf %130, %135 : vector<1x4x256xf32>
    %137 = vector.extract_strided_slice %117 {offsets = [3, 0, 0], sizes = [1, 4, 32], strides = [1, 1, 1]} : vector<8x4x32xf32> to vector<1x4x32xf32>
    %138 = vector.shape_cast %137 : vector<1x4x32xf32> to vector<4x32xf32>
    %139 = vector.shape_cast %138 : vector<4x32xf32> to vector<1x4x32xf32>
    %140 = vector.extract_strided_slice %116 {offsets = [0, 0, 768], sizes = [1, 32, 256], strides = [1, 1, 1]} : vector<1x32x2048xf32> to vector<1x32x256xf32>
    "tpu.trace_start"() <{level = 10 : i32, message = "bgh,bhv->bgv"}> : () -> ()
    %cst_62 = arith.constant dense<0.000000e+00> : vector<1x4x256xf32>
    %141 = tpu.matmul %139, %140, %cst_62 {dimension_numbers = #tpu.dot_dimension_numbers<[2], [1], [1], [2], [0, 0, 0, 1, 1, 2], [0], [0]>} : vector<1x4x32xf32>, vector<1x32x256xf32>, vector<1x4x256xf32> -> vector<1x4x256xf32>
    "tpu.trace_stop"() : () -> ()
    %142 = arith.addf %136, %141 : vector<1x4x256xf32>
    %143 = vector.extract_strided_slice %117 {offsets = [4, 0, 0], sizes = [1, 4, 32], strides = [1, 1, 1]} : vector<8x4x32xf32> to vector<1x4x32xf32>
    %144 = vector.shape_cast %143 : vector<1x4x32xf32> to vector<4x32xf32>
    %145 = vector.shape_cast %144 : vector<4x32xf32> to vector<1x4x32xf32>
    %146 = vector.extract_strided_slice %116 {offsets = [0, 0, 1024], sizes = [1, 32, 256], strides = [1, 1, 1]} : vector<1x32x2048xf32> to vector<1x32x256xf32>
    "tpu.trace_start"() <{level = 10 : i32, message = "bgh,bhv->bgv"}> : () -> ()
    %cst_63 = arith.constant dense<0.000000e+00> : vector<1x4x256xf32>
    %147 = tpu.matmul %145, %146, %cst_63 {dimension_numbers = #tpu.dot_dimension_numbers<[2], [1], [1], [2], [0, 0, 0, 1, 1, 2], [0], [0]>} : vector<1x4x32xf32>, vector<1x32x256xf32>, vector<1x4x256xf32> -> vector<1x4x256xf32>
    "tpu.trace_stop"() : () -> ()
    %148 = arith.addf %142, %147 : vector<1x4x256xf32>
    %149 = vector.extract_strided_slice %117 {offsets = [5, 0, 0], sizes = [1, 4, 32], strides = [1, 1, 1]} : vector<8x4x32xf32> to vector<1x4x32xf32>
    %150 = vector.shape_cast %149 : vector<1x4x32xf32> to vector<4x32xf32>
    %151 = vector.shape_cast %150 : vector<4x32xf32> to vector<1x4x32xf32>
    %152 = vector.extract_strided_slice %116 {offsets = [0, 0, 1280], sizes = [1, 32, 256], strides = [1, 1, 1]} : vector<1x32x2048xf32> to vector<1x32x256xf32>
    "tpu.trace_start"() <{level = 10 : i32, message = "bgh,bhv->bgv"}> : () -> ()
    %cst_64 = arith.constant dense<0.000000e+00> : vector<1x4x256xf32>
    %153 = tpu.matmul %151, %152, %cst_64 {dimension_numbers = #tpu.dot_dimension_numbers<[2], [1], [1], [2], [0, 0, 0, 1, 1, 2], [0], [0]>} : vector<1x4x32xf32>, vector<1x32x256xf32>, vector<1x4x256xf32> -> vector<1x4x256xf32>
    "tpu.trace_stop"() : () -> ()
    %154 = arith.addf %148, %153 : vector<1x4x256xf32>
    %155 = vector.extract_strided_slice %117 {offsets = [6, 0, 0], sizes = [1, 4, 32], strides = [1, 1, 1]} : vector<8x4x32xf32> to vector<1x4x32xf32>
    %156 = vector.shape_cast %155 : vector<1x4x32xf32> to vector<4x32xf32>
    %157 = vector.shape_cast %156 : vector<4x32xf32> to vector<1x4x32xf32>
    %158 = vector.extract_strided_slice %116 {offsets = [0, 0, 1536], sizes = [1, 32, 256], strides = [1, 1, 1]} : vector<1x32x2048xf32> to vector<1x32x256xf32>
    "tpu.trace_start"() <{level = 10 : i32, message = "bgh,bhv->bgv"}> : () -> ()
    %cst_65 = arith.constant dense<0.000000e+00> : vector<1x4x256xf32>
    %159 = tpu.matmul %157, %158, %cst_65 {dimension_numbers = #tpu.dot_dimension_numbers<[2], [1], [1], [2], [0, 0, 0, 1, 1, 2], [0], [0]>} : vector<1x4x32xf32>, vector<1x32x256xf32>, vector<1x4x256xf32> -> vector<1x4x256xf32>
    "tpu.trace_stop"() : () -> ()
    %160 = arith.addf %154, %159 : vector<1x4x256xf32>
    %161 = vector.extract_strided_slice %117 {offsets = [7, 0, 0], sizes = [1, 4, 32], strides = [1, 1, 1]} : vector<8x4x32xf32> to vector<1x4x32xf32>
    %162 = vector.shape_cast %161 : vector<1x4x32xf32> to vector<4x32xf32>
    %163 = vector.shape_cast %162 : vector<4x32xf32> to vector<1x4x32xf32>
    %164 = vector.extract_strided_slice %116 {offsets = [0, 0, 1792], sizes = [1, 32, 256], strides = [1, 1, 1]} : vector<1x32x2048xf32> to vector<1x32x256xf32>
    "tpu.trace_start"() <{level = 10 : i32, message = "bgh,bhv->bgv"}> : () -> ()
    %cst_66 = arith.constant dense<0.000000e+00> : vector<1x4x256xf32>
    %165 = tpu.matmul %163, %164, %cst_66 {dimension_numbers = #tpu.dot_dimension_numbers<[2], [1], [1], [2], [0, 0, 0, 1, 1, 2], [0], [0]>} : vector<1x4x32xf32>, vector<1x32x256xf32>, vector<1x4x256xf32> -> vector<1x4x256xf32>
    "tpu.trace_stop"() : () -> ()
    %166 = arith.addf %160, %165 : vector<1x4x256xf32>
    %c0_67 = arith.constant 0 : index
    %c0_68 = arith.constant 0 : index
    %167 = vector.load %arg11[%c0_67, %c0_68] : memref<1x256xf32, #tpu.memory_space<vmem>>, vector<1x256xf32>
    %168 = vector.shape_cast %167 : vector<1x256xf32> to vector<1x1x256xf32>
    %169 = vector.broadcast %168 : vector<1x1x256xf32> to vector<1x4x256xf32>
    %170 = arith.addf %166, %169 : vector<1x4x256xf32>
    %cst_69 = arith.constant 0.000000e+00 : f32
    %171 = vector.broadcast %cst_69 : f32 to vector<1x4x256xf32>
    %172 = arith.maximumf %170, %171 : vector<1x4x256xf32>
    %173 = vector.shape_cast %172 : vector<1x4x256xf32> to vector<4x256xf32>
    %174 = arith.truncf %173 : vector<4x256xf32> to vector<4x256xbf16>
    %c0_70 = arith.constant 0 : index
    %c0_71 = arith.constant 0 : index
    %175 = vector.load %arg12[%c0_70, %c0_71] : memref<256x256xbf16, #tpu.memory_space<vmem>>, vector<256x256xbf16>
    %cst_72 = arith.constant dense<0.000000e+00> : vector<4x256xf32>
    %176 = tpu.matmul %174, %175, %cst_72 {dimension_numbers = #tpu.dot_dimension_numbers<[1], [0], [0], [1], [0, 0, 1, 1], [], []>} : vector<4x256xbf16>, vector<256x256xbf16>, vector<4x256xf32> -> vector<4x256xf32>
    %177 = vector.shape_cast %176 : vector<4x256xf32> to vector<1x4x256xf32>
    %c0_73 = arith.constant 0 : index
    %c0_74 = arith.constant 0 : index
    %178 = vector.load %arg13[%c0_73, %c0_74] : memref<1x256xf32, #tpu.memory_space<vmem>>, vector<1x256xf32>
    %179 = vector.shape_cast %178 : vector<1x256xf32> to vector<1x1x256xf32>
    %180 = vector.broadcast %179 : vector<1x1x256xf32> to vector<1x4x256xf32>
    %181 = arith.addf %177, %180 : vector<1x4x256xf32>
    %182 = tpu.iota {dimensions = array<i32: 2>} : vector<1x4x16xi32>
    %183 = tpu.iota {dimensions = array<i32: 2>} : vector<1x4x4xi32>
    %cst_75 = arith.constant 0.000000e+00 : f32
    %184 = vector.broadcast %cst_75 : f32 to vector<1x4x16xf32>
    %cst_76 = arith.constant 0.000000e+00 : f32
    %185 = vector.broadcast %cst_76 : f32 to vector<1x4x4xf32>
    %186 = vector.extract_strided_slice %181 {offsets = [0, 0, 0], sizes = [1, 4, 16], strides = [1, 1, 1]} : vector<1x4x256xf32> to vector<1x4x16xf32>
    %cst_77 = arith.constant dense<0xFF800000> : vector<1x4xf32>
    %187 = vector.multi_reduction <maximumf>, %186, %cst_77 [2] : vector<1x4x16xf32> to vector<1x4xf32>
    %188 = vector.shape_cast %187 : vector<1x4xf32> to vector<1x4x1xf32>
    %189 = vector.broadcast %188 : vector<1x4x1xf32> to vector<1x4x16xf32>
    %190 = arith.subf %186, %189 : vector<1x4x16xf32>
    %191 = math.exp %190 : vector<1x4x16xf32>
    %cst_78 = arith.constant dense<0.000000e+00> : vector<1x4xf32>
    %192 = vector.multi_reduction <add>, %191, %cst_78 [2] : vector<1x4x16xf32> to vector<1x4xf32>
    %193 = vector.shape_cast %192 : vector<1x4xf32> to vector<1x4x1xf32>
    %cst_79 = arith.constant 1.000000e+00 : f32
    %194 = vector.broadcast %cst_79 : f32 to vector<1x4x1xf32>
    %195 = arith.divf %194, %193 : vector<1x4x1xf32>
    %196 = tpu.iota {dimensions = array<i32: 2>} : vector<1x4x16xi32>
    %197 = arith.sitofp %196 : vector<1x4x16xi32> to vector<1x4x16xf32>
    %198 = vector.broadcast %188 : vector<1x4x1xf32> to vector<1x4x16xf32>
    %199 = arith.cmpf oge, %186, %198 : vector<1x4x16xf32>
    %cst_80 = arith.constant 1.600000e+01 : f32
    %200 = vector.broadcast %cst_80 : f32 to vector<1x4x16xf32>
    %201 = arith.select %199, %197, %200 : vector<1x4x16xi1>, vector<1x4x16xf32>
    %cst_81 = arith.constant dense<0x7F800000> : vector<1x4xf32>
    %202 = vector.multi_reduction <minimumf>, %201, %cst_81 [2] : vector<1x4x16xf32> to vector<1x4xf32>
    %203 = vector.shape_cast %202 : vector<1x4xf32> to vector<1x4x1xf32>
    %c0_i32 = arith.constant 0 : i32
    %204 = vector.broadcast %c0_i32 : i32 to vector<1x4x16xi32>
    %205 = arith.cmpi eq, %182, %204 : vector<1x4x16xi32>
    %cst_82 = arith.constant 0.000000e+00 : f32
    %206 = vector.shape_cast %203 : vector<1x4x1xf32> to vector<1x4x1xf32>
    %207 = vector.broadcast %206 : vector<1x4x1xf32> to vector<1x4x16xf32>
    %208 = vector.broadcast %cst_82 : f32 to vector<1x4x16xf32>
    %209 = arith.select %205, %207, %208 : vector<1x4x16xi1>, vector<1x4x16xf32>
    %210 = arith.addf %184, %209 : vector<1x4x16xf32>
    %211 = vector.extract_strided_slice %181 {offsets = [0, 0, 16], sizes = [1, 4, 16], strides = [1, 1, 1]} : vector<1x4x256xf32> to vector<1x4x16xf32>
    %cst_83 = arith.constant dense<0xFF800000> : vector<1x4xf32>
    %212 = vector.multi_reduction <maximumf>, %211, %cst_83 [2] : vector<1x4x16xf32> to vector<1x4xf32>
    %213 = vector.shape_cast %212 : vector<1x4xf32> to vector<1x4x1xf32>
    %214 = vector.broadcast %213 : vector<1x4x1xf32> to vector<1x4x16xf32>
    %215 = arith.subf %211, %214 : vector<1x4x16xf32>
    %216 = math.exp %215 : vector<1x4x16xf32>
    %cst_84 = arith.constant dense<0.000000e+00> : vector<1x4xf32>
    %217 = vector.multi_reduction <add>, %216, %cst_84 [2] : vector<1x4x16xf32> to vector<1x4xf32>
    %218 = vector.shape_cast %217 : vector<1x4xf32> to vector<1x4x1xf32>
    %cst_85 = arith.constant 1.000000e+00 : f32
    %219 = vector.broadcast %cst_85 : f32 to vector<1x4x1xf32>
    %220 = arith.divf %219, %218 : vector<1x4x1xf32>
    %221 = tpu.iota {dimensions = array<i32: 2>} : vector<1x4x16xi32>
    %222 = arith.sitofp %221 : vector<1x4x16xi32> to vector<1x4x16xf32>
    %223 = vector.broadcast %213 : vector<1x4x1xf32> to vector<1x4x16xf32>
    %224 = arith.cmpf oge, %211, %223 : vector<1x4x16xf32>
    %cst_86 = arith.constant 1.600000e+01 : f32
    %225 = vector.broadcast %cst_86 : f32 to vector<1x4x16xf32>
    %226 = arith.select %224, %222, %225 : vector<1x4x16xi1>, vector<1x4x16xf32>
    %cst_87 = arith.constant dense<0x7F800000> : vector<1x4xf32>
    %227 = vector.multi_reduction <minimumf>, %226, %cst_87 [2] : vector<1x4x16xf32> to vector<1x4xf32>
    %228 = vector.shape_cast %227 : vector<1x4xf32> to vector<1x4x1xf32>
    %c1_i32 = arith.constant 1 : i32
    %229 = vector.broadcast %c1_i32 : i32 to vector<1x4x16xi32>
    %230 = arith.cmpi eq, %182, %229 : vector<1x4x16xi32>
    %cst_88 = arith.constant 0.000000e+00 : f32
    %231 = vector.shape_cast %228 : vector<1x4x1xf32> to vector<1x4x1xf32>
    %232 = vector.broadcast %231 : vector<1x4x1xf32> to vector<1x4x16xf32>
    %233 = vector.broadcast %cst_88 : f32 to vector<1x4x16xf32>
    %234 = arith.select %230, %232, %233 : vector<1x4x16xi1>, vector<1x4x16xf32>
    %235 = arith.addf %210, %234 : vector<1x4x16xf32>
    %236 = arith.minimumf %195, %220 : vector<1x4x1xf32>
    %237 = vector.extract_strided_slice %181 {offsets = [0, 0, 32], sizes = [1, 4, 16], strides = [1, 1, 1]} : vector<1x4x256xf32> to vector<1x4x16xf32>
    %cst_89 = arith.constant dense<0xFF800000> : vector<1x4xf32>
    %238 = vector.multi_reduction <maximumf>, %237, %cst_89 [2] : vector<1x4x16xf32> to vector<1x4xf32>
    %239 = vector.shape_cast %238 : vector<1x4xf32> to vector<1x4x1xf32>
    %240 = vector.broadcast %239 : vector<1x4x1xf32> to vector<1x4x16xf32>
    %241 = arith.subf %237, %240 : vector<1x4x16xf32>
    %242 = math.exp %241 : vector<1x4x16xf32>
    %cst_90 = arith.constant dense<0.000000e+00> : vector<1x4xf32>
    %243 = vector.multi_reduction <add>, %242, %cst_90 [2] : vector<1x4x16xf32> to vector<1x4xf32>
    %244 = vector.shape_cast %243 : vector<1x4xf32> to vector<1x4x1xf32>
    %cst_91 = arith.constant 1.000000e+00 : f32
    %245 = vector.broadcast %cst_91 : f32 to vector<1x4x1xf32>
    %246 = arith.divf %245, %244 : vector<1x4x1xf32>
    %247 = tpu.iota {dimensions = array<i32: 2>} : vector<1x4x16xi32>
    %248 = arith.sitofp %247 : vector<1x4x16xi32> to vector<1x4x16xf32>
    %249 = vector.broadcast %239 : vector<1x4x1xf32> to vector<1x4x16xf32>
    %250 = arith.cmpf oge, %237, %249 : vector<1x4x16xf32>
    %cst_92 = arith.constant 1.600000e+01 : f32
    %251 = vector.broadcast %cst_92 : f32 to vector<1x4x16xf32>
    %252 = arith.select %250, %248, %251 : vector<1x4x16xi1>, vector<1x4x16xf32>
    %cst_93 = arith.constant dense<0x7F800000> : vector<1x4xf32>
    %253 = vector.multi_reduction <minimumf>, %252, %cst_93 [2] : vector<1x4x16xf32> to vector<1x4xf32>
    %254 = vector.shape_cast %253 : vector<1x4xf32> to vector<1x4x1xf32>
    %c2_i32 = arith.constant 2 : i32
    %255 = vector.broadcast %c2_i32 : i32 to vector<1x4x16xi32>
    %256 = arith.cmpi eq, %182, %255 : vector<1x4x16xi32>
    %cst_94 = arith.constant 0.000000e+00 : f32
    %257 = vector.shape_cast %254 : vector<1x4x1xf32> to vector<1x4x1xf32>
    %258 = vector.broadcast %257 : vector<1x4x1xf32> to vector<1x4x16xf32>
    %259 = vector.broadcast %cst_94 : f32 to vector<1x4x16xf32>
    %260 = arith.select %256, %258, %259 : vector<1x4x16xi1>, vector<1x4x16xf32>
    %261 = arith.addf %235, %260 : vector<1x4x16xf32>
    %262 = arith.minimumf %236, %246 : vector<1x4x1xf32>
    %263 = vector.extract_strided_slice %181 {offsets = [0, 0, 48], sizes = [1, 4, 16], strides = [1, 1, 1]} : vector<1x4x256xf32> to vector<1x4x16xf32>
    %cst_95 = arith.constant dense<0xFF800000> : vector<1x4xf32>
    %264 = vector.multi_reduction <maximumf>, %263, %cst_95 [2] : vector<1x4x16xf32> to vector<1x4xf32>
    %265 = vector.shape_cast %264 : vector<1x4xf32> to vector<1x4x1xf32>
    %266 = vector.broadcast %265 : vector<1x4x1xf32> to vector<1x4x16xf32>
    %267 = arith.subf %263, %266 : vector<1x4x16xf32>
    %268 = math.exp %267 : vector<1x4x16xf32>
    %cst_96 = arith.constant dense<0.000000e+00> : vector<1x4xf32>
    %269 = vector.multi_reduction <add>, %268, %cst_96 [2] : vector<1x4x16xf32> to vector<1x4xf32>
    %270 = vector.shape_cast %269 : vector<1x4xf32> to vector<1x4x1xf32>
    %cst_97 = arith.constant 1.000000e+00 : f32
    %271 = vector.broadcast %cst_97 : f32 to vector<1x4x1xf32>
    %272 = arith.divf %271, %270 : vector<1x4x1xf32>
    %273 = tpu.iota {dimensions = array<i32: 2>} : vector<1x4x16xi32>
    %274 = arith.sitofp %273 : vector<1x4x16xi32> to vector<1x4x16xf32>
    %275 = vector.broadcast %265 : vector<1x4x1xf32> to vector<1x4x16xf32>
    %276 = arith.cmpf oge, %263, %275 : vector<1x4x16xf32>
    %cst_98 = arith.constant 1.600000e+01 : f32
    %277 = vector.broadcast %cst_98 : f32 to vector<1x4x16xf32>
    %278 = arith.select %276, %274, %277 : vector<1x4x16xi1>, vector<1x4x16xf32>
    %cst_99 = arith.constant dense<0x7F800000> : vector<1x4xf32>
    %279 = vector.multi_reduction <minimumf>, %278, %cst_99 [2] : vector<1x4x16xf32> to vector<1x4xf32>
    %280 = vector.shape_cast %279 : vector<1x4xf32> to vector<1x4x1xf32>
    %c3_i32 = arith.constant 3 : i32
    %281 = vector.broadcast %c3_i32 : i32 to vector<1x4x16xi32>
    %282 = arith.cmpi eq, %182, %281 : vector<1x4x16xi32>
    %cst_100 = arith.constant 0.000000e+00 : f32
    %283 = vector.shape_cast %280 : vector<1x4x1xf32> to vector<1x4x1xf32>
    %284 = vector.broadcast %283 : vector<1x4x1xf32> to vector<1x4x16xf32>
    %285 = vector.broadcast %cst_100 : f32 to vector<1x4x16xf32>
    %286 = arith.select %282, %284, %285 : vector<1x4x16xi1>, vector<1x4x16xf32>
    %287 = arith.addf %261, %286 : vector<1x4x16xf32>
    %288 = arith.minimumf %262, %272 : vector<1x4x1xf32>
    %c0_i32_101 = arith.constant 0 : i32
    %289 = vector.broadcast %c0_i32_101 : i32 to vector<1x4x4xi32>
    %290 = arith.cmpi eq, %183, %289 : vector<1x4x4xi32>
    %cst_102 = arith.constant 0.000000e+00 : f32
    %291 = vector.shape_cast %288 : vector<1x4x1xf32> to vector<1x4x1xf32>
    %292 = vector.broadcast %291 : vector<1x4x1xf32> to vector<1x4x4xf32>
    %293 = vector.broadcast %cst_102 : f32 to vector<1x4x4xf32>
    %294 = arith.select %290, %292, %293 : vector<1x4x4xi1>, vector<1x4x4xf32>
    %295 = arith.addf %185, %294 : vector<1x4x4xf32>
    %296 = vector.extract_strided_slice %181 {offsets = [0, 0, 64], sizes = [1, 4, 16], strides = [1, 1, 1]} : vector<1x4x256xf32> to vector<1x4x16xf32>
    %cst_103 = arith.constant dense<0xFF800000> : vector<1x4xf32>
    %297 = vector.multi_reduction <maximumf>, %296, %cst_103 [2] : vector<1x4x16xf32> to vector<1x4xf32>
    %298 = vector.shape_cast %297 : vector<1x4xf32> to vector<1x4x1xf32>
    %299 = vector.broadcast %298 : vector<1x4x1xf32> to vector<1x4x16xf32>
    %300 = arith.subf %296, %299 : vector<1x4x16xf32>
    %301 = math.exp %300 : vector<1x4x16xf32>
    %cst_104 = arith.constant dense<0.000000e+00> : vector<1x4xf32>
    %302 = vector.multi_reduction <add>, %301, %cst_104 [2] : vector<1x4x16xf32> to vector<1x4xf32>
    %303 = vector.shape_cast %302 : vector<1x4xf32> to vector<1x4x1xf32>
    %cst_105 = arith.constant 1.000000e+00 : f32
    %304 = vector.broadcast %cst_105 : f32 to vector<1x4x1xf32>
    %305 = arith.divf %304, %303 : vector<1x4x1xf32>
    %306 = tpu.iota {dimensions = array<i32: 2>} : vector<1x4x16xi32>
    %307 = arith.sitofp %306 : vector<1x4x16xi32> to vector<1x4x16xf32>
    %308 = vector.broadcast %298 : vector<1x4x1xf32> to vector<1x4x16xf32>
    %309 = arith.cmpf oge, %296, %308 : vector<1x4x16xf32>
    %cst_106 = arith.constant 1.600000e+01 : f32
    %310 = vector.broadcast %cst_106 : f32 to vector<1x4x16xf32>
    %311 = arith.select %309, %307, %310 : vector<1x4x16xi1>, vector<1x4x16xf32>
    %cst_107 = arith.constant dense<0x7F800000> : vector<1x4xf32>
    %312 = vector.multi_reduction <minimumf>, %311, %cst_107 [2] : vector<1x4x16xf32> to vector<1x4xf32>
    %313 = vector.shape_cast %312 : vector<1x4xf32> to vector<1x4x1xf32>
    %c4_i32 = arith.constant 4 : i32
    %314 = vector.broadcast %c4_i32 : i32 to vector<1x4x16xi32>
    %315 = arith.cmpi eq, %182, %314 : vector<1x4x16xi32>
    %cst_108 = arith.constant 0.000000e+00 : f32
    %316 = vector.shape_cast %313 : vector<1x4x1xf32> to vector<1x4x1xf32>
    %317 = vector.broadcast %316 : vector<1x4x1xf32> to vector<1x4x16xf32>
    %318 = vector.broadcast %cst_108 : f32 to vector<1x4x16xf32>
    %319 = arith.select %315, %317, %318 : vector<1x4x16xi1>, vector<1x4x16xf32>
    %320 = arith.addf %287, %319 : vector<1x4x16xf32>
    %321 = vector.extract_strided_slice %181 {offsets = [0, 0, 80], sizes = [1, 4, 16], strides = [1, 1, 1]} : vector<1x4x256xf32> to vector<1x4x16xf32>
    %cst_109 = arith.constant dense<0xFF800000> : vector<1x4xf32>
    %322 = vector.multi_reduction <maximumf>, %321, %cst_109 [2] : vector<1x4x16xf32> to vector<1x4xf32>
    %323 = vector.shape_cast %322 : vector<1x4xf32> to vector<1x4x1xf32>
    %324 = vector.broadcast %323 : vector<1x4x1xf32> to vector<1x4x16xf32>
    %325 = arith.subf %321, %324 : vector<1x4x16xf32>
    %326 = math.exp %325 : vector<1x4x16xf32>
    %cst_110 = arith.constant dense<0.000000e+00> : vector<1x4xf32>
    %327 = vector.multi_reduction <add>, %326, %cst_110 [2] : vector<1x4x16xf32> to vector<1x4xf32>
    %328 = vector.shape_cast %327 : vector<1x4xf32> to vector<1x4x1xf32>
    %cst_111 = arith.constant 1.000000e+00 : f32
    %329 = vector.broadcast %cst_111 : f32 to vector<1x4x1xf32>
    %330 = arith.divf %329, %328 : vector<1x4x1xf32>
    %331 = tpu.iota {dimensions = array<i32: 2>} : vector<1x4x16xi32>
    %332 = arith.sitofp %331 : vector<1x4x16xi32> to vector<1x4x16xf32>
    %333 = vector.broadcast %323 : vector<1x4x1xf32> to vector<1x4x16xf32>
    %334 = arith.cmpf oge, %321, %333 : vector<1x4x16xf32>
    %cst_112 = arith.constant 1.600000e+01 : f32
    %335 = vector.broadcast %cst_112 : f32 to vector<1x4x16xf32>
    %336 = arith.select %334, %332, %335 : vector<1x4x16xi1>, vector<1x4x16xf32>
    %cst_113 = arith.constant dense<0x7F800000> : vector<1x4xf32>
    %337 = vector.multi_reduction <minimumf>, %336, %cst_113 [2] : vector<1x4x16xf32> to vector<1x4xf32>
    %338 = vector.shape_cast %337 : vector<1x4xf32> to vector<1x4x1xf32>
    %c5_i32 = arith.constant 5 : i32
    %339 = vector.broadcast %c5_i32 : i32 to vector<1x4x16xi32>
    %340 = arith.cmpi eq, %182, %339 : vector<1x4x16xi32>
    %cst_114 = arith.constant 0.000000e+00 : f32
    %341 = vector.shape_cast %338 : vector<1x4x1xf32> to vector<1x4x1xf32>
    %342 = vector.broadcast %341 : vector<1x4x1xf32> to vector<1x4x16xf32>
    %343 = vector.broadcast %cst_114 : f32 to vector<1x4x16xf32>
    %344 = arith.select %340, %342, %343 : vector<1x4x16xi1>, vector<1x4x16xf32>
    %345 = arith.addf %320, %344 : vector<1x4x16xf32>
    %346 = arith.minimumf %305, %330 : vector<1x4x1xf32>
    %347 = vector.extract_strided_slice %181 {offsets = [0, 0, 96], sizes = [1, 4, 16], strides = [1, 1, 1]} : vector<1x4x256xf32> to vector<1x4x16xf32>
    %cst_115 = arith.constant dense<0xFF800000> : vector<1x4xf32>
    %348 = vector.multi_reduction <maximumf>, %347, %cst_115 [2] : vector<1x4x16xf32> to vector<1x4xf32>
    %349 = vector.shape_cast %348 : vector<1x4xf32> to vector<1x4x1xf32>
    %350 = vector.broadcast %349 : vector<1x4x1xf32> to vector<1x4x16xf32>
    %351 = arith.subf %347, %350 : vector<1x4x16xf32>
    %352 = math.exp %351 : vector<1x4x16xf32>
    %cst_116 = arith.constant dense<0.000000e+00> : vector<1x4xf32>
    %353 = vector.multi_reduction <add>, %352, %cst_116 [2] : vector<1x4x16xf32> to vector<1x4xf32>
    %354 = vector.shape_cast %353 : vector<1x4xf32> to vector<1x4x1xf32>
    %cst_117 = arith.constant 1.000000e+00 : f32
    %355 = vector.broadcast %cst_117 : f32 to vector<1x4x1xf32>
    %356 = arith.divf %355, %354 : vector<1x4x1xf32>
    %357 = tpu.iota {dimensions = array<i32: 2>} : vector<1x4x16xi32>
    %358 = arith.sitofp %357 : vector<1x4x16xi32> to vector<1x4x16xf32>
    %359 = vector.broadcast %349 : vector<1x4x1xf32> to vector<1x4x16xf32>
    %360 = arith.cmpf oge, %347, %359 : vector<1x4x16xf32>
    %cst_118 = arith.constant 1.600000e+01 : f32
    %361 = vector.broadcast %cst_118 : f32 to vector<1x4x16xf32>
    %362 = arith.select %360, %358, %361 : vector<1x4x16xi1>, vector<1x4x16xf32>
    %cst_119 = arith.constant dense<0x7F800000> : vector<1x4xf32>
    %363 = vector.multi_reduction <minimumf>, %362, %cst_119 [2] : vector<1x4x16xf32> to vector<1x4xf32>
    %364 = vector.shape_cast %363 : vector<1x4xf32> to vector<1x4x1xf32>
    %c6_i32 = arith.constant 6 : i32
    %365 = vector.broadcast %c6_i32 : i32 to vector<1x4x16xi32>
    %366 = arith.cmpi eq, %182, %365 : vector<1x4x16xi32>
    %cst_120 = arith.constant 0.000000e+00 : f32
    %367 = vector.shape_cast %364 : vector<1x4x1xf32> to vector<1x4x1xf32>
    %368 = vector.broadcast %367 : vector<1x4x1xf32> to vector<1x4x16xf32>
    %369 = vector.broadcast %cst_120 : f32 to vector<1x4x16xf32>
    %370 = arith.select %366, %368, %369 : vector<1x4x16xi1>, vector<1x4x16xf32>
    %371 = arith.addf %345, %370 : vector<1x4x16xf32>
    %372 = arith.minimumf %346, %356 : vector<1x4x1xf32>
    %373 = vector.extract_strided_slice %181 {offsets = [0, 0, 112], sizes = [1, 4, 16], strides = [1, 1, 1]} : vector<1x4x256xf32> to vector<1x4x16xf32>
    %cst_121 = arith.constant dense<0xFF800000> : vector<1x4xf32>
    %374 = vector.multi_reduction <maximumf>, %373, %cst_121 [2] : vector<1x4x16xf32> to vector<1x4xf32>
    %375 = vector.shape_cast %374 : vector<1x4xf32> to vector<1x4x1xf32>
    %376 = vector.broadcast %375 : vector<1x4x1xf32> to vector<1x4x16xf32>
    %377 = arith.subf %373, %376 : vector<1x4x16xf32>
    %378 = math.exp %377 : vector<1x4x16xf32>
    %cst_122 = arith.constant dense<0.000000e+00> : vector<1x4xf32>
    %379 = vector.multi_reduction <add>, %378, %cst_122 [2] : vector<1x4x16xf32> to vector<1x4xf32>
    %380 = vector.shape_cast %379 : vector<1x4xf32> to vector<1x4x1xf32>
    %cst_123 = arith.constant 1.000000e+00 : f32
    %381 = vector.broadcast %cst_123 : f32 to vector<1x4x1xf32>
    %382 = arith.divf %381, %380 : vector<1x4x1xf32>
    %383 = tpu.iota {dimensions = array<i32: 2>} : vector<1x4x16xi32>
    %384 = arith.sitofp %383 : vector<1x4x16xi32> to vector<1x4x16xf32>
    %385 = vector.broadcast %375 : vector<1x4x1xf32> to vector<1x4x16xf32>
    %386 = arith.cmpf oge, %373, %385 : vector<1x4x16xf32>
    %cst_124 = arith.constant 1.600000e+01 : f32
    %387 = vector.broadcast %cst_124 : f32 to vector<1x4x16xf32>
    %388 = arith.select %386, %384, %387 : vector<1x4x16xi1>, vector<1x4x16xf32>
    %cst_125 = arith.constant dense<0x7F800000> : vector<1x4xf32>
    %389 = vector.multi_reduction <minimumf>, %388, %cst_125 [2] : vector<1x4x16xf32> to vector<1x4xf32>
    %390 = vector.shape_cast %389 : vector<1x4xf32> to vector<1x4x1xf32>
    %c7_i32 = arith.constant 7 : i32
    %391 = vector.broadcast %c7_i32 : i32 to vector<1x4x16xi32>
    %392 = arith.cmpi eq, %182, %391 : vector<1x4x16xi32>
    %cst_126 = arith.constant 0.000000e+00 : f32
    %393 = vector.shape_cast %390 : vector<1x4x1xf32> to vector<1x4x1xf32>
    %394 = vector.broadcast %393 : vector<1x4x1xf32> to vector<1x4x16xf32>
    %395 = vector.broadcast %cst_126 : f32 to vector<1x4x16xf32>
    %396 = arith.select %392, %394, %395 : vector<1x4x16xi1>, vector<1x4x16xf32>
    %397 = arith.addf %371, %396 : vector<1x4x16xf32>
    %398 = arith.minimumf %372, %382 : vector<1x4x1xf32>
    %c1_i32_127 = arith.constant 1 : i32
    %399 = vector.broadcast %c1_i32_127 : i32 to vector<1x4x4xi32>
    %400 = arith.cmpi eq, %183, %399 : vector<1x4x4xi32>
    %cst_128 = arith.constant 0.000000e+00 : f32
    %401 = vector.shape_cast %398 : vector<1x4x1xf32> to vector<1x4x1xf32>
    %402 = vector.broadcast %401 : vector<1x4x1xf32> to vector<1x4x4xf32>
    %403 = vector.broadcast %cst_128 : f32 to vector<1x4x4xf32>
    %404 = arith.select %400, %402, %403 : vector<1x4x4xi1>, vector<1x4x4xf32>
    %405 = arith.addf %295, %404 : vector<1x4x4xf32>
    %406 = vector.extract_strided_slice %181 {offsets = [0, 0, 128], sizes = [1, 4, 16], strides = [1, 1, 1]} : vector<1x4x256xf32> to vector<1x4x16xf32>
    %cst_129 = arith.constant dense<0xFF800000> : vector<1x4xf32>
    %407 = vector.multi_reduction <maximumf>, %406, %cst_129 [2] : vector<1x4x16xf32> to vector<1x4xf32>
    %408 = vector.shape_cast %407 : vector<1x4xf32> to vector<1x4x1xf32>
    %409 = vector.broadcast %408 : vector<1x4x1xf32> to vector<1x4x16xf32>
    %410 = arith.subf %406, %409 : vector<1x4x16xf32>
    %411 = math.exp %410 : vector<1x4x16xf32>
    %cst_130 = arith.constant dense<0.000000e+00> : vector<1x4xf32>
    %412 = vector.multi_reduction <add>, %411, %cst_130 [2] : vector<1x4x16xf32> to vector<1x4xf32>
    %413 = vector.shape_cast %412 : vector<1x4xf32> to vector<1x4x1xf32>
    %cst_131 = arith.constant 1.000000e+00 : f32
    %414 = vector.broadcast %cst_131 : f32 to vector<1x4x1xf32>
    %415 = arith.divf %414, %413 : vector<1x4x1xf32>
    %416 = tpu.iota {dimensions = array<i32: 2>} : vector<1x4x16xi32>
    %417 = arith.sitofp %416 : vector<1x4x16xi32> to vector<1x4x16xf32>
    %418 = vector.broadcast %408 : vector<1x4x1xf32> to vector<1x4x16xf32>
    %419 = arith.cmpf oge, %406, %418 : vector<1x4x16xf32>
    %cst_132 = arith.constant 1.600000e+01 : f32
    %420 = vector.broadcast %cst_132 : f32 to vector<1x4x16xf32>
    %421 = arith.select %419, %417, %420 : vector<1x4x16xi1>, vector<1x4x16xf32>
    %cst_133 = arith.constant dense<0x7F800000> : vector<1x4xf32>
    %422 = vector.multi_reduction <minimumf>, %421, %cst_133 [2] : vector<1x4x16xf32> to vector<1x4xf32>
    %423 = vector.shape_cast %422 : vector<1x4xf32> to vector<1x4x1xf32>
    %c8_i32 = arith.constant 8 : i32
    %424 = vector.broadcast %c8_i32 : i32 to vector<1x4x16xi32>
    %425 = arith.cmpi eq, %182, %424 : vector<1x4x16xi32>
    %cst_134 = arith.constant 0.000000e+00 : f32
    %426 = vector.shape_cast %423 : vector<1x4x1xf32> to vector<1x4x1xf32>
    %427 = vector.broadcast %426 : vector<1x4x1xf32> to vector<1x4x16xf32>
    %428 = vector.broadcast %cst_134 : f32 to vector<1x4x16xf32>
    %429 = arith.select %425, %427, %428 : vector<1x4x16xi1>, vector<1x4x16xf32>
    %430 = arith.addf %397, %429 : vector<1x4x16xf32>
    %431 = vector.extract_strided_slice %181 {offsets = [0, 0, 144], sizes = [1, 4, 16], strides = [1, 1, 1]} : vector<1x4x256xf32> to vector<1x4x16xf32>
    %cst_135 = arith.constant dense<0xFF800000> : vector<1x4xf32>
    %432 = vector.multi_reduction <maximumf>, %431, %cst_135 [2] : vector<1x4x16xf32> to vector<1x4xf32>
    %433 = vector.shape_cast %432 : vector<1x4xf32> to vector<1x4x1xf32>
    %434 = vector.broadcast %433 : vector<1x4x1xf32> to vector<1x4x16xf32>
    %435 = arith.subf %431, %434 : vector<1x4x16xf32>
    %436 = math.exp %435 : vector<1x4x16xf32>
    %cst_136 = arith.constant dense<0.000000e+00> : vector<1x4xf32>
    %437 = vector.multi_reduction <add>, %436, %cst_136 [2] : vector<1x4x16xf32> to vector<1x4xf32>
    %438 = vector.shape_cast %437 : vector<1x4xf32> to vector<1x4x1xf32>
    %cst_137 = arith.constant 1.000000e+00 : f32
    %439 = vector.broadcast %cst_137 : f32 to vector<1x4x1xf32>
    %440 = arith.divf %439, %438 : vector<1x4x1xf32>
    %441 = tpu.iota {dimensions = array<i32: 2>} : vector<1x4x16xi32>
    %442 = arith.sitofp %441 : vector<1x4x16xi32> to vector<1x4x16xf32>
    %443 = vector.broadcast %433 : vector<1x4x1xf32> to vector<1x4x16xf32>
    %444 = arith.cmpf oge, %431, %443 : vector<1x4x16xf32>
    %cst_138 = arith.constant 1.600000e+01 : f32
    %445 = vector.broadcast %cst_138 : f32 to vector<1x4x16xf32>
    %446 = arith.select %444, %442, %445 : vector<1x4x16xi1>, vector<1x4x16xf32>
    %cst_139 = arith.constant dense<0x7F800000> : vector<1x4xf32>
    %447 = vector.multi_reduction <minimumf>, %446, %cst_139 [2] : vector<1x4x16xf32> to vector<1x4xf32>
    %448 = vector.shape_cast %447 : vector<1x4xf32> to vector<1x4x1xf32>
    %c9_i32 = arith.constant 9 : i32
    %449 = vector.broadcast %c9_i32 : i32 to vector<1x4x16xi32>
    %450 = arith.cmpi eq, %182, %449 : vector<1x4x16xi32>
    %cst_140 = arith.constant 0.000000e+00 : f32
    %451 = vector.shape_cast %448 : vector<1x4x1xf32> to vector<1x4x1xf32>
    %452 = vector.broadcast %451 : vector<1x4x1xf32> to vector<1x4x16xf32>
    %453 = vector.broadcast %cst_140 : f32 to vector<1x4x16xf32>
    %454 = arith.select %450, %452, %453 : vector<1x4x16xi1>, vector<1x4x16xf32>
    %455 = arith.addf %430, %454 : vector<1x4x16xf32>
    %456 = arith.minimumf %415, %440 : vector<1x4x1xf32>
    %457 = vector.extract_strided_slice %181 {offsets = [0, 0, 160], sizes = [1, 4, 16], strides = [1, 1, 1]} : vector<1x4x256xf32> to vector<1x4x16xf32>
    %cst_141 = arith.constant dense<0xFF800000> : vector<1x4xf32>
    %458 = vector.multi_reduction <maximumf>, %457, %cst_141 [2] : vector<1x4x16xf32> to vector<1x4xf32>
    %459 = vector.shape_cast %458 : vector<1x4xf32> to vector<1x4x1xf32>
    %460 = vector.broadcast %459 : vector<1x4x1xf32> to vector<1x4x16xf32>
    %461 = arith.subf %457, %460 : vector<1x4x16xf32>
    %462 = math.exp %461 : vector<1x4x16xf32>
    %cst_142 = arith.constant dense<0.000000e+00> : vector<1x4xf32>
    %463 = vector.multi_reduction <add>, %462, %cst_142 [2] : vector<1x4x16xf32> to vector<1x4xf32>
    %464 = vector.shape_cast %463 : vector<1x4xf32> to vector<1x4x1xf32>
    %cst_143 = arith.constant 1.000000e+00 : f32
    %465 = vector.broadcast %cst_143 : f32 to vector<1x4x1xf32>
    %466 = arith.divf %465, %464 : vector<1x4x1xf32>
    %467 = tpu.iota {dimensions = array<i32: 2>} : vector<1x4x16xi32>
    %468 = arith.sitofp %467 : vector<1x4x16xi32> to vector<1x4x16xf32>
    %469 = vector.broadcast %459 : vector<1x4x1xf32> to vector<1x4x16xf32>
    %470 = arith.cmpf oge, %457, %469 : vector<1x4x16xf32>
    %cst_144 = arith.constant 1.600000e+01 : f32
    %471 = vector.broadcast %cst_144 : f32 to vector<1x4x16xf32>
    %472 = arith.select %470, %468, %471 : vector<1x4x16xi1>, vector<1x4x16xf32>
    %cst_145 = arith.constant dense<0x7F800000> : vector<1x4xf32>
    %473 = vector.multi_reduction <minimumf>, %472, %cst_145 [2] : vector<1x4x16xf32> to vector<1x4xf32>
    %474 = vector.shape_cast %473 : vector<1x4xf32> to vector<1x4x1xf32>
    %c10_i32 = arith.constant 10 : i32
    %475 = vector.broadcast %c10_i32 : i32 to vector<1x4x16xi32>
    %476 = arith.cmpi eq, %182, %475 : vector<1x4x16xi32>
    %cst_146 = arith.constant 0.000000e+00 : f32
    %477 = vector.shape_cast %474 : vector<1x4x1xf32> to vector<1x4x1xf32>
    %478 = vector.broadcast %477 : vector<1x4x1xf32> to vector<1x4x16xf32>
    %479 = vector.broadcast %cst_146 : f32 to vector<1x4x16xf32>
    %480 = arith.select %476, %478, %479 : vector<1x4x16xi1>, vector<1x4x16xf32>
    %481 = arith.addf %455, %480 : vector<1x4x16xf32>
    %482 = arith.minimumf %456, %466 : vector<1x4x1xf32>
    %483 = vector.extract_strided_slice %181 {offsets = [0, 0, 176], sizes = [1, 4, 16], strides = [1, 1, 1]} : vector<1x4x256xf32> to vector<1x4x16xf32>
    %cst_147 = arith.constant dense<0xFF800000> : vector<1x4xf32>
    %484 = vector.multi_reduction <maximumf>, %483, %cst_147 [2] : vector<1x4x16xf32> to vector<1x4xf32>
    %485 = vector.shape_cast %484 : vector<1x4xf32> to vector<1x4x1xf32>
    %486 = vector.broadcast %485 : vector<1x4x1xf32> to vector<1x4x16xf32>
    %487 = arith.subf %483, %486 : vector<1x4x16xf32>
    %488 = math.exp %487 : vector<1x4x16xf32>
    %cst_148 = arith.constant dense<0.000000e+00> : vector<1x4xf32>
    %489 = vector.multi_reduction <add>, %488, %cst_148 [2] : vector<1x4x16xf32> to vector<1x4xf32>
    %490 = vector.shape_cast %489 : vector<1x4xf32> to vector<1x4x1xf32>
    %cst_149 = arith.constant 1.000000e+00 : f32
    %491 = vector.broadcast %cst_149 : f32 to vector<1x4x1xf32>
    %492 = arith.divf %491, %490 : vector<1x4x1xf32>
    %493 = tpu.iota {dimensions = array<i32: 2>} : vector<1x4x16xi32>
    %494 = arith.sitofp %493 : vector<1x4x16xi32> to vector<1x4x16xf32>
    %495 = vector.broadcast %485 : vector<1x4x1xf32> to vector<1x4x16xf32>
    %496 = arith.cmpf oge, %483, %495 : vector<1x4x16xf32>
    %cst_150 = arith.constant 1.600000e+01 : f32
    %497 = vector.broadcast %cst_150 : f32 to vector<1x4x16xf32>
    %498 = arith.select %496, %494, %497 : vector<1x4x16xi1>, vector<1x4x16xf32>
    %cst_151 = arith.constant dense<0x7F800000> : vector<1x4xf32>
    %499 = vector.multi_reduction <minimumf>, %498, %cst_151 [2] : vector<1x4x16xf32> to vector<1x4xf32>
    %500 = vector.shape_cast %499 : vector<1x4xf32> to vector<1x4x1xf32>
    %c11_i32 = arith.constant 11 : i32
    %501 = vector.broadcast %c11_i32 : i32 to vector<1x4x16xi32>
    %502 = arith.cmpi eq, %182, %501 : vector<1x4x16xi32>
    %cst_152 = arith.constant 0.000000e+00 : f32
    %503 = vector.shape_cast %500 : vector<1x4x1xf32> to vector<1x4x1xf32>
    %504 = vector.broadcast %503 : vector<1x4x1xf32> to vector<1x4x16xf32>
    %505 = vector.broadcast %cst_152 : f32 to vector<1x4x16xf32>
    %506 = arith.select %502, %504, %505 : vector<1x4x16xi1>, vector<1x4x16xf32>
    %507 = arith.addf %481, %506 : vector<1x4x16xf32>
    %508 = arith.minimumf %482, %492 : vector<1x4x1xf32>
    %c2_i32_153 = arith.constant 2 : i32
    %509 = vector.broadcast %c2_i32_153 : i32 to vector<1x4x4xi32>
    %510 = arith.cmpi eq, %183, %509 : vector<1x4x4xi32>
    %cst_154 = arith.constant 0.000000e+00 : f32
    %511 = vector.shape_cast %508 : vector<1x4x1xf32> to vector<1x4x1xf32>
    %512 = vector.broadcast %511 : vector<1x4x1xf32> to vector<1x4x4xf32>
    %513 = vector.broadcast %cst_154 : f32 to vector<1x4x4xf32>
    %514 = arith.select %510, %512, %513 : vector<1x4x4xi1>, vector<1x4x4xf32>
    %515 = arith.addf %405, %514 : vector<1x4x4xf32>
    %516 = vector.extract_strided_slice %181 {offsets = [0, 0, 192], sizes = [1, 4, 16], strides = [1, 1, 1]} : vector<1x4x256xf32> to vector<1x4x16xf32>
    %cst_155 = arith.constant dense<0xFF800000> : vector<1x4xf32>
    %517 = vector.multi_reduction <maximumf>, %516, %cst_155 [2] : vector<1x4x16xf32> to vector<1x4xf32>
    %518 = vector.shape_cast %517 : vector<1x4xf32> to vector<1x4x1xf32>
    %519 = vector.broadcast %518 : vector<1x4x1xf32> to vector<1x4x16xf32>
    %520 = arith.subf %516, %519 : vector<1x4x16xf32>
    %521 = math.exp %520 : vector<1x4x16xf32>
    %cst_156 = arith.constant dense<0.000000e+00> : vector<1x4xf32>
    %522 = vector.multi_reduction <add>, %521, %cst_156 [2] : vector<1x4x16xf32> to vector<1x4xf32>
    %523 = vector.shape_cast %522 : vector<1x4xf32> to vector<1x4x1xf32>
    %cst_157 = arith.constant 1.000000e+00 : f32
    %524 = vector.broadcast %cst_157 : f32 to vector<1x4x1xf32>
    %525 = arith.divf %524, %523 : vector<1x4x1xf32>
    %526 = tpu.iota {dimensions = array<i32: 2>} : vector<1x4x16xi32>
    %527 = arith.sitofp %526 : vector<1x4x16xi32> to vector<1x4x16xf32>
    %528 = vector.broadcast %518 : vector<1x4x1xf32> to vector<1x4x16xf32>
    %529 = arith.cmpf oge, %516, %528 : vector<1x4x16xf32>
    %cst_158 = arith.constant 1.600000e+01 : f32
    %530 = vector.broadcast %cst_158 : f32 to vector<1x4x16xf32>
    %531 = arith.select %529, %527, %530 : vector<1x4x16xi1>, vector<1x4x16xf32>
    %cst_159 = arith.constant dense<0x7F800000> : vector<1x4xf32>
    %532 = vector.multi_reduction <minimumf>, %531, %cst_159 [2] : vector<1x4x16xf32> to vector<1x4xf32>
    %533 = vector.shape_cast %532 : vector<1x4xf32> to vector<1x4x1xf32>
    %c12_i32 = arith.constant 12 : i32
    %534 = vector.broadcast %c12_i32 : i32 to vector<1x4x16xi32>
    %535 = arith.cmpi eq, %182, %534 : vector<1x4x16xi32>
    %cst_160 = arith.constant 0.000000e+00 : f32
    %536 = vector.shape_cast %533 : vector<1x4x1xf32> to vector<1x4x1xf32>
    %537 = vector.broadcast %536 : vector<1x4x1xf32> to vector<1x4x16xf32>
    %538 = vector.broadcast %cst_160 : f32 to vector<1x4x16xf32>
    %539 = arith.select %535, %537, %538 : vector<1x4x16xi1>, vector<1x4x16xf32>
    %540 = arith.addf %507, %539 : vector<1x4x16xf32>
    %541 = vector.extract_strided_slice %181 {offsets = [0, 0, 208], sizes = [1, 4, 16], strides = [1, 1, 1]} : vector<1x4x256xf32> to vector<1x4x16xf32>
    %cst_161 = arith.constant dense<0xFF800000> : vector<1x4xf32>
    %542 = vector.multi_reduction <maximumf>, %541, %cst_161 [2] : vector<1x4x16xf32> to vector<1x4xf32>
    %543 = vector.shape_cast %542 : vector<1x4xf32> to vector<1x4x1xf32>
    %544 = vector.broadcast %543 : vector<1x4x1xf32> to vector<1x4x16xf32>
    %545 = arith.subf %541, %544 : vector<1x4x16xf32>
    %546 = math.exp %545 : vector<1x4x16xf32>
    %cst_162 = arith.constant dense<0.000000e+00> : vector<1x4xf32>
    %547 = vector.multi_reduction <add>, %546, %cst_162 [2] : vector<1x4x16xf32> to vector<1x4xf32>
    %548 = vector.shape_cast %547 : vector<1x4xf32> to vector<1x4x1xf32>
    %cst_163 = arith.constant 1.000000e+00 : f32
    %549 = vector.broadcast %cst_163 : f32 to vector<1x4x1xf32>
    %550 = arith.divf %549, %548 : vector<1x4x1xf32>
    %551 = tpu.iota {dimensions = array<i32: 2>} : vector<1x4x16xi32>
    %552 = arith.sitofp %551 : vector<1x4x16xi32> to vector<1x4x16xf32>
    %553 = vector.broadcast %543 : vector<1x4x1xf32> to vector<1x4x16xf32>
    %554 = arith.cmpf oge, %541, %553 : vector<1x4x16xf32>
    %cst_164 = arith.constant 1.600000e+01 : f32
    %555 = vector.broadcast %cst_164 : f32 to vector<1x4x16xf32>
    %556 = arith.select %554, %552, %555 : vector<1x4x16xi1>, vector<1x4x16xf32>
    %cst_165 = arith.constant dense<0x7F800000> : vector<1x4xf32>
    %557 = vector.multi_reduction <minimumf>, %556, %cst_165 [2] : vector<1x4x16xf32> to vector<1x4xf32>
    %558 = vector.shape_cast %557 : vector<1x4xf32> to vector<1x4x1xf32>
    %c13_i32 = arith.constant 13 : i32
    %559 = vector.broadcast %c13_i32 : i32 to vector<1x4x16xi32>
    %560 = arith.cmpi eq, %182, %559 : vector<1x4x16xi32>
    %cst_166 = arith.constant 0.000000e+00 : f32
    %561 = vector.shape_cast %558 : vector<1x4x1xf32> to vector<1x4x1xf32>
    %562 = vector.broadcast %561 : vector<1x4x1xf32> to vector<1x4x16xf32>
    %563 = vector.broadcast %cst_166 : f32 to vector<1x4x16xf32>
    %564 = arith.select %560, %562, %563 : vector<1x4x16xi1>, vector<1x4x16xf32>
    %565 = arith.addf %540, %564 : vector<1x4x16xf32>
    %566 = arith.minimumf %525, %550 : vector<1x4x1xf32>
    %567 = vector.extract_strided_slice %181 {offsets = [0, 0, 224], sizes = [1, 4, 16], strides = [1, 1, 1]} : vector<1x4x256xf32> to vector<1x4x16xf32>
    %cst_167 = arith.constant dense<0xFF800000> : vector<1x4xf32>
    %568 = vector.multi_reduction <maximumf>, %567, %cst_167 [2] : vector<1x4x16xf32> to vector<1x4xf32>
    %569 = vector.shape_cast %568 : vector<1x4xf32> to vector<1x4x1xf32>
    %570 = vector.broadcast %569 : vector<1x4x1xf32> to vector<1x4x16xf32>
    %571 = arith.subf %567, %570 : vector<1x4x16xf32>
    %572 = math.exp %571 : vector<1x4x16xf32>
    %cst_168 = arith.constant dense<0.000000e+00> : vector<1x4xf32>
    %573 = vector.multi_reduction <add>, %572, %cst_168 [2] : vector<1x4x16xf32> to vector<1x4xf32>
    %574 = vector.shape_cast %573 : vector<1x4xf32> to vector<1x4x1xf32>
    %cst_169 = arith.constant 1.000000e+00 : f32
    %575 = vector.broadcast %cst_169 : f32 to vector<1x4x1xf32>
    %576 = arith.divf %575, %574 : vector<1x4x1xf32>
    %577 = tpu.iota {dimensions = array<i32: 2>} : vector<1x4x16xi32>
    %578 = arith.sitofp %577 : vector<1x4x16xi32> to vector<1x4x16xf32>
    %579 = vector.broadcast %569 : vector<1x4x1xf32> to vector<1x4x16xf32>
    %580 = arith.cmpf oge, %567, %579 : vector<1x4x16xf32>
    %cst_170 = arith.constant 1.600000e+01 : f32
    %581 = vector.broadcast %cst_170 : f32 to vector<1x4x16xf32>
    %582 = arith.select %580, %578, %581 : vector<1x4x16xi1>, vector<1x4x16xf32>
    %cst_171 = arith.constant dense<0x7F800000> : vector<1x4xf32>
    %583 = vector.multi_reduction <minimumf>, %582, %cst_171 [2] : vector<1x4x16xf32> to vector<1x4xf32>
    %584 = vector.shape_cast %583 : vector<1x4xf32> to vector<1x4x1xf32>
    %c14_i32 = arith.constant 14 : i32
    %585 = vector.broadcast %c14_i32 : i32 to vector<1x4x16xi32>
    %586 = arith.cmpi eq, %182, %585 : vector<1x4x16xi32>
    %cst_172 = arith.constant 0.000000e+00 : f32
    %587 = vector.shape_cast %584 : vector<1x4x1xf32> to vector<1x4x1xf32>
    %588 = vector.broadcast %587 : vector<1x4x1xf32> to vector<1x4x16xf32>
    %589 = vector.broadcast %cst_172 : f32 to vector<1x4x16xf32>
    %590 = arith.select %586, %588, %589 : vector<1x4x16xi1>, vector<1x4x16xf32>
    %591 = arith.addf %565, %590 : vector<1x4x16xf32>
    %592 = arith.minimumf %566, %576 : vector<1x4x1xf32>
    %593 = vector.extract_strided_slice %181 {offsets = [0, 0, 240], sizes = [1, 4, 16], strides = [1, 1, 1]} : vector<1x4x256xf32> to vector<1x4x16xf32>
    %cst_173 = arith.constant dense<0xFF800000> : vector<1x4xf32>
    %594 = vector.multi_reduction <maximumf>, %593, %cst_173 [2] : vector<1x4x16xf32> to vector<1x4xf32>
    %595 = vector.shape_cast %594 : vector<1x4xf32> to vector<1x4x1xf32>
    %596 = vector.broadcast %595 : vector<1x4x1xf32> to vector<1x4x16xf32>
    %597 = arith.subf %593, %596 : vector<1x4x16xf32>
    %598 = math.exp %597 : vector<1x4x16xf32>
    %cst_174 = arith.constant dense<0.000000e+00> : vector<1x4xf32>
    %599 = vector.multi_reduction <add>, %598, %cst_174 [2] : vector<1x4x16xf32> to vector<1x4xf32>
    %600 = vector.shape_cast %599 : vector<1x4xf32> to vector<1x4x1xf32>
    %cst_175 = arith.constant 1.000000e+00 : f32
    %601 = vector.broadcast %cst_175 : f32 to vector<1x4x1xf32>
    %602 = arith.divf %601, %600 : vector<1x4x1xf32>
    %603 = tpu.iota {dimensions = array<i32: 2>} : vector<1x4x16xi32>
    %604 = arith.sitofp %603 : vector<1x4x16xi32> to vector<1x4x16xf32>
    %605 = vector.broadcast %595 : vector<1x4x1xf32> to vector<1x4x16xf32>
    %606 = arith.cmpf oge, %593, %605 : vector<1x4x16xf32>
    %cst_176 = arith.constant 1.600000e+01 : f32
    %607 = vector.broadcast %cst_176 : f32 to vector<1x4x16xf32>
    %608 = arith.select %606, %604, %607 : vector<1x4x16xi1>, vector<1x4x16xf32>
    %cst_177 = arith.constant dense<0x7F800000> : vector<1x4xf32>
    %609 = vector.multi_reduction <minimumf>, %608, %cst_177 [2] : vector<1x4x16xf32> to vector<1x4xf32>
    %610 = vector.shape_cast %609 : vector<1x4xf32> to vector<1x4x1xf32>
    %c15_i32 = arith.constant 15 : i32
    %611 = vector.broadcast %c15_i32 : i32 to vector<1x4x16xi32>
    %612 = arith.cmpi eq, %182, %611 : vector<1x4x16xi32>
    %cst_178 = arith.constant 0.000000e+00 : f32
    %613 = vector.shape_cast %610 : vector<1x4x1xf32> to vector<1x4x1xf32>
    %614 = vector.broadcast %613 : vector<1x4x1xf32> to vector<1x4x16xf32>
    %615 = vector.broadcast %cst_178 : f32 to vector<1x4x16xf32>
    %616 = arith.select %612, %614, %615 : vector<1x4x16xi1>, vector<1x4x16xf32>
    %617 = arith.addf %591, %616 : vector<1x4x16xf32>
    %618 = arith.minimumf %592, %602 : vector<1x4x1xf32>
    %c3_i32_179 = arith.constant 3 : i32
    %619 = vector.broadcast %c3_i32_179 : i32 to vector<1x4x4xi32>
    %620 = arith.cmpi eq, %183, %619 : vector<1x4x4xi32>
    %cst_180 = arith.constant 0.000000e+00 : f32
    %621 = vector.shape_cast %618 : vector<1x4x1xf32> to vector<1x4x1xf32>
    %622 = vector.broadcast %621 : vector<1x4x1xf32> to vector<1x4x4xf32>
    %623 = vector.broadcast %cst_180 : f32 to vector<1x4x4xf32>
    %624 = arith.select %620, %622, %623 : vector<1x4x4xi1>, vector<1x4x4xf32>
    %625 = arith.addf %515, %624 : vector<1x4x4xf32>
    %626 = arith.fptosi %617 : vector<1x4x16xf32> to vector<1x4x16xi32>
    %c0_181 = arith.constant 0 : index
    %c0_182 = arith.constant 0 : index
    %c0_183 = arith.constant 0 : index
    %627 = vector.load %arg15[%c0_181, %c0_182, %c0_183] : memref<1x4x16xi32, #tpu.memory_space<vmem>>, vector<1x4x16xi32>
    tpu.vector_store %arg15[%c0_181, %c0_182, %c0_183], %626 {strides = array<i32>} : memref<1x4x16xi32, #tpu.memory_space<vmem>>, vector<1x4x16xi32>,
    %c0_184 = arith.constant 0 : index
    %c0_185 = arith.constant 0 : index
    %c0_186 = arith.constant 0 : index
    %628 = vector.load %arg16[%c0_184, %c0_185, %c0_186] : memref<1x4x4xf32, #tpu.memory_space<vmem>>, vector<1x4x4xf32>
    tpu.vector_store %arg16[%c0_184, %c0_185, %c0_186], %625 {strides = array<i32>} : memref<1x4x4xf32, #tpu.memory_space<vmem>>, vector<1x4x4xf32>,
    return
  }
  func.func @transform_0(%arg0: i32) -> (i32, i32, i32, i32) {
    %c0_i32 = arith.constant 0 : i32
    %c0_i32_0 = arith.constant 0 : i32
    %c0_i32_1 = arith.constant 0 : i32
    %c0_i32_2 = arith.constant 0 : i32
    return %arg0, %c0_i32, %c0_i32_0, %c0_i32_1 : i32, i32, i32, i32
  }
  func.func @transform_1(%arg0: i32) -> (i32, i32, i32) {
    %c0_i32 = arith.constant 0 : i32
    %c0_i32_0 = arith.constant 0 : i32
    %c0_i32_1 = arith.constant 0 : i32
    %c0_i32_2 = arith.constant 0 : i32
    return %c0_i32, %c0_i32_0, %c0_i32_1 : i32, i32, i32
  }
  func.func @transform_2(%arg0: i32) -> (i32, i32, i32) {
    %c0_i32 = arith.constant 0 : i32
    %c0_i32_0 = arith.constant 0 : i32
    %c0_i32_1 = arith.constant 0 : i32
    %c0_i32_2 = arith.constant 0 : i32
    return %c0_i32, %c0_i32_0, %c0_i32_1 : i32, i32, i32
  }
  func.func @transform_3(%arg0: i32) -> (i32, i32) {
    %c0_i32 = arith.constant 0 : i32
    %c0_i32_0 = arith.constant 0 : i32
    %c0_i32_1 = arith.constant 0 : i32
    return %c0_i32, %c0_i32_0 : i32, i32
  }
  func.func @transform_4(%arg0: i32) -> (i32, i32) {
    %c0_i32 = arith.constant 0 : i32
    %c0_i32_0 = arith.constant 0 : i32
    %c0_i32_1 = arith.constant 0 : i32
    return %c0_i32, %c0_i32_0 : i32, i32
  }
  func.func @transform_5(%arg0: i32) -> (i32, i32) {
    %c0_i32 = arith.constant 0 : i32
    %c0_i32_0 = arith.constant 0 : i32
    %c0_i32_1 = arith.constant 0 : i32
    return %c0_i32, %c0_i32_0 : i32, i32
  }
  func.func @transform_6(%arg0: i32) -> (i32, i32) {
    %c0_i32 = arith.constant 0 : i32
    %c0_i32_0 = arith.constant 0 : i32
    %c0_i32_1 = arith.constant 0 : i32
    return %c0_i32, %c0_i32_0 : i32, i32
  }
  func.func @transform_7(%arg0: i32) -> (i32, i32) {
    %c0_i32 = arith.constant 0 : i32
    %c0_i32_0 = arith.constant 0 : i32
    %c0_i32_1 = arith.constant 0 : i32
    return %c0_i32, %c0_i32_0 : i32, i32
  }
  func.func @transform_8(%arg0: i32) -> (i32, i32, i32) {
    %c0_i32 = arith.constant 0 : i32
    %c0_i32_0 = arith.constant 0 : i32
    %c0_i32_1 = arith.constant 0 : i32
    %c0_i32_2 = arith.constant 0 : i32
    return %c0_i32, %c0_i32_0, %c0_i32_1 : i32, i32, i32
  }
  func.func @transform_9(%arg0: i32) -> (i32, i32, i32) {
    %c0_i32 = arith.constant 0 : i32
    %c0_i32_0 = arith.constant 0 : i32
    %c0_i32_1 = arith.constant 0 : i32
    %c0_i32_2 = arith.constant 0 : i32
    return %c0_i32, %c0_i32_0, %c0_i32_1 : i32, i32, i32
  }
  func.func @transform_10(%arg0: i32) -> (i32, i32) {
    %c0_i32 = arith.constant 0 : i32
    %c0_i32_0 = arith.constant 0 : i32
    %c0_i32_1 = arith.constant 0 : i32
    return %c0_i32, %c0_i32_0 : i32, i32
  }
  func.func @transform_11(%arg0: i32) -> (i32, i32) {
    %c0_i32 = arith.constant 0 : i32
    %c0_i32_0 = arith.constant 0 : i32
    %c0_i32_1 = arith.constant 0 : i32
    return %c0_i32, %c0_i32_0 : i32, i32
  }
  func.func @transform_12(%arg0: i32) -> (i32, i32) {
    %c0_i32 = arith.constant 0 : i32
    %c0_i32_0 = arith.constant 0 : i32
    %c0_i32_1 = arith.constant 0 : i32
    return %c0_i32, %c0_i32_0 : i32, i32
  }
  func.func @transform_13(%arg0: i32) -> (i32, i32, i32) {
    %c0_i32 = arith.constant 0 : i32
    %c0_i32_0 = arith.constant 0 : i32
    %c0_i32_1 = arith.constant 0 : i32
    return %arg0, %c0_i32, %c0_i32_0 : i32, i32, i32
  }
  func.func @transform_14(%arg0: i32) -> (i32, i32, i32) {
    %c0_i32 = arith.constant 0 : i32
    %c0_i32_0 = arith.constant 0 : i32
    %c0_i32_1 = arith.constant 0 : i32
    return %arg0, %c0_i32, %c0_i32_0 : i32, i32, i32
  }
  func.func @transform_15(%arg0: i32) -> (i32, i32, i32) {
    %c0_i32 = arith.constant 0 : i32
    %c0_i32_0 = arith.constant 0 : i32
    %c0_i32_1 = arith.constant 0 : i32
    return %arg0, %c0_i32, %c0_i32_0 : i32, i32, i32
  }
}

</mosaic_0001>

<bundles_post_ra>
// kernel: ocr_device_pipeline.1
= control target key start
LH: loop header
LB: loop body
LE: loop exit
PB: predicated region body
PF: predicated region fallthrough
CT: control target
= control target key end

     0   :  { %s8691_s0 = inlined_call_operand.vmem [shape: f32[2,3,32,32], index: 0, kind: input, shape index: {}]   ;;  %s8692_s1 = inlined_call_operand.hbm [shape: f32[3,32,32], index: 1, kind: input, shape index: {}]   ;;  %s8693_s2 = inlined_call_operand.hbm [shape: f32[3,32,768], index: 2, kind: input, shape index: {}]   ;;  %s8694_s3 = inlined_call_operand.vmem [shape: f32[1,256], index: 3, kind: input, shape index: {}]   ;;  %s8695_s4 = inlined_call_operand.vmem [shape: f32[256,96], index: 4, kind: input, shape index: {}]   ;;  %s8696_s5 = inlined_call_operand.<no memory space> [shape: f32[1,1], index: 5, kind: input, shape index: {}]   ;;  %s8697_s6 = inlined_call_operand.vmem [shape: f32[4,32], index: 6, kind: input, shape index: {}]   ;;  %s8698_s7 = inlined_call_operand.vmem [shape: f32[32,4], index: 7, kind: input, shape index: {}]   ;;  %s8699_s8 = inlined_call_operand.vmem [shape: f32[8,4,32], index: 8, kind: input, shape index: {}]   ;;  %s8700_s9 = inlined_call_operand.hbm [shape: bf16[3,32,2048], index: 9, kind: input, shape index: {}]   ;;  %s8701_s10 = inlined_call_operand.hbm [shape: f32[1,256], index: 10, kind: input, shape index: {}]   ;;  %s8702_s11 = inlined_call_operand.vmem [shape: bf16[256,256], index: 11, kind: input, shape index: {}]   ;;  %s8703_s12 = inlined_call_operand.hbm [shape: f32[1,256], index: 12, kind: input, shape index: {}]   ;;  %s8704_s13 = inlined_call_operand.hbm [shape: f32[2,1,16], index: 13, kind: output, shape index: {0}]   ;;  %s8705_s14 = inlined_call_operand.hbm [shape: s32[2,4,16], index: 14, kind: output, shape index: {1}]   ;;  %s8706_s15 = inlined_call_operand.hbm [shape: f32[2,4,4], index: 15, kind: output, shape index: {2}]  }
   0x1   :  { %8744 = sst [smem:[#allocation86_spill]] %s8691_s0  ;;  %v21_v0 = vstv %s8696_s5 }
   0x2   :  { %8745 = sst [smem:[#allocation87_spill]] %s8693_s2  ;;  %22 = vst [vmem:[#allocation2] sm:$0x1] %v21_v0 }
   0x3   :  { %8746 = sst [smem:[#allocation88_spill]] %s8701_s10 }
   0x4   :  { %8747 = sst [smem:[#allocation89_spill]] %s8705_s14 }
   0x5   :  { %8748 = sst [smem:[#allocation90_spill]] %s8706_s15 }
   0x6   :  { %23 = vsyncpa [#allocation4], 0 }
   0x7   :  { %24 = vsyncpa [#allocation7], 0 }
   0x8   :  { %25 = vsyncpa [#allocation10], 0 }
   0x9   :  { %26 = vsyncpa [#allocation5], 0 }
   0xa   :  { %28 = vsyncpa [#allocation5 + $0x1], 0 }
   0xb   :  { %29 = vsyncpa [#allocation14], 0 }
   0xc   :  { %31 = vsyncpa [#allocation14 + $0x1], 0  ;;  %s6437_s20 = smov 0   ;;  %s6439_s21 = smov 0  }
   0xd   :  { %s6441_s22 = smov 0   ;;  %s6443_s23 = smov 0  }
   0xe LB: > { %8749 = sst [smem:[#allocation21_spill]] %s6318_s20  ;;  %s6458_s5 = sadd.s32 4294967295, %s6330_s23   ;;  %s6330_s23 = sphi %s6443_s23, %s8961_s23   ;;  %s6326_s22 = sphi %s6441_s22, %s8963_s22   ;;  %s6322_s21 = sphi %s6439_s21, %s8965_s21   ;;  %s6318_s20 = sphi %s6437_s20, %s8964_s20  }
   0xf   : > { %8750 = sst [smem:[#allocation22_spill]] %s6326_s22  ;;  %s8707_s24 = sadd.s32 4294967294, %s6330_s23  }
  0x10   : > { %8751 = sst [smem:[#allocation23_spill]] %s6330_s23  ;;  %s6462_s25 = sadd.s32 1, %s6330_s23  }
  0x11   : > { %8752 = sst [smem:[#allocation24_spill]] %s6462_s25  ;;  %s322_s26 = sadd.s32 1, %s6326_s22 }
  0x12   : > { %s319_s27 = ssub.s32 %s6330_s23, %s6462_s25  ;;  %p332_p0 = scmp.ne.s32.totalorder %s6326_s22, %s6322_s21 }
  0x13   : > { %p320_p1 = scmp.eq.s32.totalorder %s319_s27, 0  ;;  %p333_p2 = scmp.eq.s32.totalorder %s6458_s5, 1 }
  0x14   : > { %p338_p3 = scmp.ne.s32.totalorder %s6322_s21, %s6318_s20  ;;  %p339_p4 = scmp.eq.s32.totalorder %s8707_s24, 1 }
  0x15   : > { %s6475_s28 = scalar_select %p320_p1, %s6326_s22, %s322_s26  }
  0x16   : > { %p6477_p5 = por %p333_p2, %p332_p0  ;;  %p6481_p6 = por %p339_p4, %p338_p3 }
  0x17   : > { %8753 = sst [smem:[#allocation25_spill]] %s6475_s28  ;;  %p4932_p7 = scmp.ge.s32.totalorder %s6330_s23, 1 }
  0x18   : > { %s8755_s30 = scalar_select %p6481_p6, 1, 0 }
  0x19   : > { %p398_p8 = scmp.lt.s32.totalorder %s6330_s23, 3  ;;  %p5878_p9 = scmp.eq.s32.totalorder %s6458_s5, 0 }
  0x1a   : > { %8756 = sst [smem:[#allocation26_spill]] %s8755_s30  ;;  %s6332_s26 = smov [#allocation6]  }
  0x1b   : > { %p6488_p10 = pnand %p4932_p7, %p398_p8  ;;  %s8758_s2 = sld [smem:[#allocation87_spill]] }
  0x1c   : > { %s425_s27 = sshll.u32 %s6332_s26, 4  ;;  %s8760_s10 = sld [smem:[#allocation88_spill]]  ;;  %s426_s27 = int_to_ptr.vmem [resolvable:$true] %s425_s27 }
  0x1d   : > { %p5852_p11 = pneg %p6488_p10  ;;  %s6333_s17 = smov 768  }
  0x1e   : > { %s6334_s18 = smov 48   ;;  %s409_s23 = sshll.u32 %s8692_s1, 4  ;;  %s410_s23 = int_to_ptr.hbm [resolvable:$true] %s409_s23 }
  0x1f   : > { %p6499_p12 = pnand %p5878_p9, %p5852_p11  ;;  %s6336_s22 = smov [#allocation3]  }
  0x20   : > { %s411_s28 = sshll.u32 %s6336_s22, 4  ;;  %s455_s14 = sshll.u32 %s8700_s9, 4  ;;  %s412_s28 = int_to_ptr.vmem [resolvable:$true] %s411_s28  ;;  %s456_s14 = int_to_ptr.hbm [resolvable:$true] %s455_s14 }
  0x21   : > { %s423_s19 = sshll.u32 %s8758_s2, 4  ;;  %s6335_s2 = smov [#allocation9]   ;;  %s424_s19 = int_to_ptr.hbm [resolvable:$true] %s423_s19 }
  0x22   : > { %s470_s25 = sshll.u32 %s8760_s10, 4  ;;  %s472_s26 = sshll.u32 %s6335_s2, 4  ;;  %s471_s25 = int_to_ptr.hbm [resolvable:$true] %s470_s25  ;;  %s473_s26 = int_to_ptr.vmem [resolvable:$true] %s472_s26 }
  0x23   : > { %5858 = dma.hbm_to_vmem [thread:$0]  (!%p6499_p12), %s424_s19, 9216, %s426_s27, [#allocation7], %s6333_s17, %s6333_s17, %s6334_s18  }
  0x24   : > { %5864 = dma.hbm_to_vmem [thread:$0]  (!%p6499_p12), %s471_s25, 32, %s473_s26, [#allocation10]  }
  0x25   : > { %s6337_s19 = smov 128   ;;  %s6338_s27 = smov 8  }
  0x26   : > { %5855 = dma.hbm_to_vmem [thread:$0]  (!%p6499_p12), %s410_s23, 1536, %s412_s28, [#allocation4], %s6337_s19, %s6337_s19, %s6338_s27  }
  0x27   : > { %s6339_s2 = smov [#allocation8]   ;;  %s6340_s30 = smov 1024  }
  0x28   : > { %s457_s20 = sshll.u32 %s6339_s2, 4  ;;  %s6341_s17 = smov 64   ;;  %s458_s20 = int_to_ptr.vmem [resolvable:$true] %s457_s20 }
  0x29   : > { %5861 = dma.hbm_to_vmem [thread:$0]  (!%p6499_p12), %s456_s14, 12288, %s458_s20, [#allocation7], %s6340_s30, %s6340_s30, %s6341_s17  }
  0x2a   : > { %s485_s26 = sshll.u32 %s8703_s12, 4  ;;  %s6342_s10 = smov [#allocation11]   ;;  %s486_s26 = int_to_ptr.hbm [resolvable:$true] %s485_s26 }
  0x2b   : > { %s487_s15 = sshll.u32 %s6342_s10, 4  ;;  %508 = sbr.rel (%p6488_p10) target bundleno = 2434 (0x982), region = 72  ;;  %s488_s15 = int_to_ptr.vmem [resolvable:$true] %s487_s15 }
  0x2c   : > { %5867 = dma.hbm_to_vmem [thread:$0]  (!%p6499_p12), %s486_s26, 32, %s488_s15, [#allocation10]  }
  0x30   : > { %6297 = dma.done.wait (%p5878_p9), [#allocation4], 1536  }
  0x31   : > { %6299 = vsyncadd (%p5878_p9), [#allocation4], 4294965760 }
  0x32   : > { %6301 = dma.done.wait (%p5878_p9), [#allocation7], 21504  }
  0x33   : > { %6303 = vsyncadd (%p5878_p9), [#allocation7], 4294945792 }
  0x34   : > { %6305 = dma.done.wait (%p5878_p9), [#allocation10], 64  }
  0x35   : > { %6307 = vsyncadd (%p5878_p9), [#allocation10], 4294967232  ;;  %p586_p13 = scmp.lt.s32.totalorder %s6458_s5, 1  ;;  %v659_v1 = vld [vmem:[#allocation6 + $0x150] sm:$0xff]  ;;  %v660_v2 = vld [vmem:[#allocation6 + $0x158] sm:$0xff]  ;;  %s8761_s0 = sld [smem:[#allocation86_spill]] }
  0x36   : > { %v661_v3 = vld [vmem:[#allocation6 + $0x160] sm:$0xff]  ;;  %690 = vmatpush.msra.mxu0 %v659_v1  ;;  %719 = vmatpush.msra.mxu1 %v660_v2  ;;  %v662_v4 = vld [vmem:[#allocation6 + $0x168] sm:$0xff]  ;;  %v655_v7 = vld [vmem:[#allocation6 + $0x130] sm:$0xff]  ;;  %vm665_vm0 = vcmask 261120   ;;  %s6343_s16 = smov 64   ;;  %s8737_s10 = smov 16  }
  0x37   : > { %s587_s14 = scalar_select %p586_p13, %s6458_s5, 1  ;;  %v653_v5 = vld [vmem:[#allocation6 + $0x120] sm:$0xff]  ;;  %v654_v6 = vld [vmem:[#allocation6 + $0x128] sm:$0xff]  ;;  %748 = vmatpush.msra.mxu2 %v661_v3  ;;  %777 = vmatpush.msra.mxu3 %v662_v4  ;;  %v656_v8 = vld [vmem:[#allocation6 + $0x138] sm:$0xff] }
  0x38   : > { %v647_v9 = vld [vmem:[#allocation6 + $0xf0] sm:$0xff]  ;;  %691 = vmatpush.msra.mxu0 %v653_v5  ;;  %720 = vmatpush.msra.mxu1 %v654_v6  ;;  %v648_v10 = vld [vmem:[#allocation6 + $0xf8] sm:$0xff]  ;;  %v649_v11 = vld [vmem:[#allocation6 + $0x100] sm:$0xff]  ;;  %s6347_s15 = smov 32   ;;  %s6350_s24 = smov 80  }
  0x39   : > { %s5820_s23 = smul.u32 96, %s587_s14  ;;  %v650_v12 = vld [vmem:[#allocation6 + $0x108] sm:$0xff]  ;;  %749 = vmatpush.msra.mxu2 %v655_v7  ;;  %778 = vmatpush.msra.mxu3 %v656_v8  ;;  %v641_v13 = vld [vmem:[#allocation6 + $0xc0] sm:$0xff]  ;;  %v643_v15 = vld [vmem:[#allocation6 + $0xd0] sm:$0xff]  ;;  %s6348_s14 = smov 112  }
  0x3a   : > { %v642_v14 = vld [vmem:[#allocation6 + $0xc8] sm:$0xff]  ;;  %692 = vmatpush.msra.mxu0 %v647_v9  ;;  %721 = vmatpush.msra.mxu1 %v648_v10  ;;  %v644_v16 = vld [vmem:[#allocation6 + $0xd8] sm:$0xff]  ;;  %v663_v23 = vld [vmem:[#allocation6 + $0x170] sm:$0xff]  ;;  %s6351_s28 = smov 8   ;;  %s6352_s19 = smov 4  }
  0x3b   : > { %s6544_s22 = scalar_lea.vmem %s8761_s0, %s5820_s23  ;;  %750 = vmatpush.msra.mxu2 %v649_v11  ;;  %779 = vmatpush.msra.mxu3 %v650_v12  ;;  %v664_v24 = vld [vmem:[#allocation6 + $0x178] sm:$0xff]  ;;  %v634_v25 = vld [vmem:[#allocation6 + $0x90] sm:$0xff]  ;;  %v657_v27 = vld [vmem:[#allocation6 + $0x140] sm:$0xff]  ;;  %s8735_s23 = smov 48  }
  0x3c   : > { %v6547_v17 = vld [vmem:[%s6544_s22 + $0x20] sm:$0xff]  ;;  %v6550_v18 = vld [vmem:[%s6544_s22 + $0x28] sm:$0xff]  ;;  %v6557_v20 = vld [vmem:[%s6544_s22 + $0x30] sm:$0xff]  ;;  %693 = vmatpush.msra.mxu0 %v641_v13  ;;  %722 = vmatpush.msra.mxu1 %v642_v14  ;;  %s6353_s27 = smov 12   ;;  %s7582_s2 = sand.u32 1, %s6322_s21  }
  0x3d   : > { %v6554_v19 = vpack.c.bf16 %v6550_v18, %v6547_v17  ;;  %v6560_v21 = vld [vmem:[%s6544_s22 + $0x38] sm:$0xff]  ;;  %751 = vmatpush.msra.mxu2 %v643_v15  ;;  %780 = vmatpush.msra.mxu3 %v644_v16  ;;  %v658_v28 = vld [vmem:[#allocation6 + $0x148] sm:$0xff]  ;;  %v628_v29 = vld [vmem:[#allocation6 + $0x60] sm:$0xff]  ;;  %s8734_s20 = scalar_lea.vmem [#allocation12], %s7582_s2  ;;  %s8917_s25 = smov 96  }
  0x3e   : > { %v6564_v22 = vpack.c.bf16 %v6560_v21, %v6557_v20  ;;  %4948 = vmatmul.msk.f32.vlgmr.msra.gmra.mxu0 %vm665_vm0, %v6547_v17  ;;  %4952 = vmatmul.msk.f32.vlgmr.msra.gmra.mxu1 %vm665_vm0, %v6547_v17  ;;  %v635_v26 = vld [vmem:[#allocation6 + $0x98] sm:$0xff]  ;;  %v629_v30 = vld [vmem:[#allocation6 + $0x68] sm:$0xff]  ;;  %v651_v31 = vld [vmem:[#allocation6 + $0x110] sm:$0xff]  ;;  %s8918_s18 = smov 16   ;;  %s8919_s26 = smov 48  }
  0x3f   : > { %8762 = vst [vmem:[#allocation27_spill] sm:$0xff] %v6554_v19  ;;  %4956 = vmatmul.msk.f32.vlgmr.msra.gmra.mxu2 %vm665_vm0, %v6547_v17  ;;  %4960 = vmatmul.msk.f32.vlgmr.msra.gmra.mxu3 %vm665_vm0, %v6547_v17  ;;  %v652_v32 = vld [vmem:[#allocation6 + $0x118] sm:$0xff]  ;;  %v622_v33 = vld [vmem:[#allocation6 + $0x30] sm:$0xff]  ;;  %v645_v35 = vld [vmem:[#allocation6 + $0xe0] sm:$0xff]  ;;  %s6216_s17 = scalar_lea.hbm %s8704_s13, 2 }
  0x40   : > { %8763 = vst [vmem:[#allocation28_spill] sm:$0xff] %v6564_v22  ;;  %806 = vmatpush.msrb.mxu0 %v663_v23  ;;  %835 = vmatpush.msrb.mxu1 %v664_v24  ;;  %v623_v34 = vld [vmem:[#allocation6 + $0x38] sm:$0xff]  ;;  %v646_v36 = vld [vmem:[#allocation6 + $0xe8] sm:$0xff]  ;;  %v616_v37 = vld [vmem:[#allocation6] sm:$0xff] }
  0x41   : > { %876 = vmatpush.msrb.mxu2 %v634_v25  ;;  %905 = vmatpush.msrb.mxu3 %v635_v26  ;;  %v617_v38 = vld [vmem:[#allocation6 + $0x8] sm:$0xff]  ;;  %v6579_v39 = vld [vmem:[%s6544_s22] sm:$0xff]  ;;  %v6608_v43 = vld [vmem:[%s6544_s22 + $0x18] sm:$0xff] }
  0x42   : > { %807 = vmatpush.msrb.mxu0 %v657_v27  ;;  %836 = vmatpush.msrb.mxu1 %v658_v28  ;;  %v6582_v40 = vld [vmem:[%s6544_s22 + $0x8] sm:$0xff]  ;;  %v6605_v42 = vld [vmem:[%s6544_s22 + $0x10] sm:$0xff]  ;;  %v639_v48 = vld [vmem:[#allocation6 + $0xb8] sm:$0xff] }
  0x43   : > { %877 = vmatpush.msrb.mxu2 %v628_v29  ;;  %906 = vmatpush.msrb.mxu3 %v629_v30  ;;  %v6590_v41 = vpack.c.bf16 %v6582_v40, %v6579_v39  ;;  %v6616_v44 = vpack.c.bf16 %v6608_v43, %v6605_v42  ;;  %v636_v45 = vld [vmem:[#allocation6 + $0xa0] sm:$0xff]  ;;  %v637_v46 = vld [vmem:[#allocation6 + $0xa8] sm:$0xff]  ;;  %v638_v47 = vld [vmem:[#allocation6 + $0xb0] sm:$0xff] }
  0x44   : > { %808 = vmatpush.msrb.mxu0 %v651_v31  ;;  %837 = vmatpush.msrb.mxu1 %v652_v32  ;;  %v630_v49 = vld [vmem:[#allocation6 + $0x70] sm:$0xff]  ;;  %v631_v50 = vld [vmem:[#allocation6 + $0x78] sm:$0xff]  ;;  %v632_v51 = vld [vmem:[#allocation6 + $0x80] sm:$0xff] }
  0x45   : > { %878 = vmatpush.msrb.mxu2 %v622_v33  ;;  %907 = vmatpush.msrb.mxu3 %v623_v34  ;;  %8764 = vst [vmem:[#allocation29_spill] sm:$0xff] %v6590_v41  ;;  %v633_v52 = vld [vmem:[#allocation6 + $0x88] sm:$0xff]  ;;  %v624_v53 = vld [vmem:[#allocation6 + $0x40] sm:$0xff]  ;;  %v626_v55 = vld [vmem:[#allocation6 + $0x50] sm:$0xff] }
  0x46   : > { %4949 = vmatmul.msk.f32.gmra.mxu0 %vm665_vm0, %v6550_v18  ;;  %4953 = vmatmul.msk.f32.gmra.mxu1 %vm665_vm0, %v6550_v18  ;;  %8765 = vst [vmem:[#allocation30_spill] sm:$0xff] %v6616_v44  ;;  %v625_v54 = vld [vmem:[#allocation6 + $0x48] sm:$0xff]  ;;  %v627_v56 = vld [vmem:[#allocation6 + $0x58] sm:$0xff]  ;;  %v618_v57 = vld [vmem:[#allocation6 + $0x10] sm:$0xff] }
  0x47   : > { %4957 = vmatmul.msk.f32.gmra.mxu2 %vm665_vm0, %v6550_v18  ;;  %4961 = vmatmul.msk.f32.gmra.mxu3 %vm665_vm0, %v6550_v18  ;;  %v619_v58 = vld [vmem:[#allocation6 + $0x18] sm:$0xff]  ;;  %v620_v59 = vld [vmem:[#allocation6 + $0x20] sm:$0xff]  ;;  %v621_v60 = vld [vmem:[#allocation6 + $0x28] sm:$0xff] }
  0x48   : > { %809 = vmatpush.msrb.mxu0 %v645_v35  ;;  %838 = vmatpush.msrb.mxu1 %v646_v36  ;;  %v1057_v61 = vld [vmem:[#allocation6 + $0x210] sm:$0xff]  ;;  %v1058_v62 = vld [vmem:[#allocation6 + $0x218] sm:$0xff]  ;;  %v1059_v63 = vld [vmem:[#allocation6 + $0x220] sm:$0xff] }
  0x49   : > { %879 = vmatpush.msrb.mxu2 %v616_v37  ;;  %908 = vmatpush.msrb.mxu3 %v617_v38  ;;  %v1060_v0 = vld [vmem:[#allocation6 + $0x228] sm:$0xff]  ;;  %v1051_v1 = vld [vmem:[#allocation6 + $0x1e0] sm:$0xff]  ;;  %v1053_v3 = vld [vmem:[#allocation6 + $0x1f0] sm:$0xff] }
  0x4a   : > { %934 = vmatpush.msra.mxu0 %v636_v45  ;;  %963 = vmatpush.msra.mxu1 %v637_v46  ;;  %v1052_v2 = vld [vmem:[#allocation6 + $0x1e8] sm:$0xff]  ;;  %v1054_v4 = vld [vmem:[#allocation6 + $0x1f8] sm:$0xff]  ;;  %v1045_v5 = vld [vmem:[#allocation6 + $0x1b0] sm:$0xff] }
  0x4b   : > { %992 = vmatpush.msra.mxu2 %v638_v47  ;;  %1021 = vmatpush.msra.mxu3 %v639_v48  ;;  %v1046_v6 = vld [vmem:[#allocation6 + $0x1b8] sm:$0xff]  ;;  %v1047_v7 = vld [vmem:[#allocation6 + $0x1c0] sm:$0xff]  ;;  %v1048_v8 = vld [vmem:[#allocation6 + $0x1c8] sm:$0xff] }
  0x4c   : > { %935 = vmatpush.msra.mxu0 %v630_v49  ;;  %964 = vmatpush.msra.mxu1 %v631_v50  ;;  %v1039_v9 = vld [vmem:[#allocation6 + $0x180] sm:$0xff]  ;;  %v1040_v10 = vld [vmem:[#allocation6 + $0x188] sm:$0xff]  ;;  %v1041_v11 = vld [vmem:[#allocation6 + $0x190] sm:$0xff] }
  0x4d   : > { %993 = vmatpush.msra.mxu2 %v632_v51  ;;  %1022 = vmatpush.msra.mxu3 %v633_v52  ;;  %v1042_v12 = vld [vmem:[#allocation6 + $0x198] sm:$0xff]  ;;  %v601_v14 = vld [vmem:[%s6544_s22 + $0x48] sm:$0xff]  ;;  %v602_v16 = vld [vmem:[%s6544_s22 + $0x50] sm:$0xff] }
  0x4e   : > { %4950 = vmatmul.msk.f32.gmra.mxu0 %vm665_vm0, %v6557_v20  ;;  %4954 = vmatmul.msk.f32.gmra.mxu1 %vm665_vm0, %v6557_v20  ;;  %v600_v13 = vld [vmem:[%s6544_s22 + $0x40] sm:$0xff]  ;;  %v1056_v24 = vld [vmem:[#allocation6 + $0x208] sm:$0xff]  ;;  %v1049_v25 = vld [vmem:[#allocation6 + $0x1d0] sm:$0xff] }
  0x4f   : > { %4958 = vmatmul.msk.f32.gmra.mxu2 %vm665_vm0, %v6557_v20  ;;  %4962 = vmatmul.msk.f32.gmra.mxu3 %vm665_vm0, %v6557_v20  ;;  %v6664_v15 = vpack.c.bf16 %v601_v14, %v600_v13  ;;  %v1055_v23 = vld [vmem:[#allocation6 + $0x200] sm:$0xff]  ;;  %v1050_v26 = vld [vmem:[#allocation6 + $0x1d8] sm:$0xff]  ;;  %v1044_v28 = vld [vmem:[#allocation6 + $0x1a8] sm:$0xff] }
  0x50   : > { %936 = vmatpush.msra.mxu0 %v624_v53  ;;  %965 = vmatpush.msra.mxu1 %v625_v54  ;;  %v1043_v27 = vld [vmem:[#allocation6 + $0x1a0] sm:$0xff] }
  0x51   : > { %994 = vmatpush.msra.mxu2 %v626_v55  ;;  %1023 = vmatpush.msra.mxu3 %v627_v56  ;;  %8766 = vst [vmem:[#allocation31_spill] sm:$0xff] %v6664_v15 }
  0x52   : > { %937 = vmatpush.msra.mxu0 %v618_v57  ;;  %966 = vmatpush.msra.mxu1 %v619_v58 }
  0x53   : > { %995 = vmatpush.msra.mxu2 %v620_v59  ;;  %1024 = vmatpush.msra.mxu3 %v621_v60 }
  0x56   : > { %4951 = vmatmul.msk.f32.gmra.mxu0 %vm665_vm0, %v6560_v21  ;;  %4955 = vmatmul.msk.f32.gmra.mxu1 %vm665_vm0, %v6560_v21 }
  0x57   : > { %4959 = vmatmul.msk.f32.gmra.mxu2 %vm665_vm0, %v6560_v21  ;;  %4963 = vmatmul.msk.f32.gmra.mxu3 %vm665_vm0, %v6560_v21 }
  0x5e   : > { %4964 = vmatmul.msk.f32.vlgmr.msrb.gmra.mxu0 %vm665_vm0, %v6547_v17  ;;  %4968 = vmatmul.msk.f32.vlgmr.msrb.gmra.mxu1 %vm665_vm0, %v6547_v17  ;;  %v603_v17 = vld [vmem:[%s6544_s22 + $0x58] sm:$0xff]  ;;  %s8739_s22 = smov 96  }
  0x5f   : > { %4972 = vmatmul.msk.f32.vlgmr.msrb.gmra.mxu2 %vm665_vm0, %v6579_v39  ;;  %4976 = vmatmul.msk.f32.vlgmr.msrb.gmra.mxu3 %vm665_vm0, %v6579_v39 }
  0x60   : > { %1087 = vmatpush.msrb.mxu0 %v1057_v61  ;;  %1116 = vmatpush.msrb.mxu1 %v1058_v62 }
  0x61   : > { %1145 = vmatpush.msrb.mxu2 %v1059_v63  ;;  %1174 = vmatpush.msrb.mxu3 %v1060_v0 }
  0x62   : > { %1088 = vmatpush.msrb.mxu0 %v1051_v1  ;;  %1117 = vmatpush.msrb.mxu1 %v1052_v2 }
  0x63   : > { %1146 = vmatpush.msrb.mxu2 %v1053_v3  ;;  %1175 = vmatpush.msrb.mxu3 %v1054_v4 }
  0x64   : > { %1089 = vmatpush.msrb.mxu0 %v1045_v5  ;;  %1118 = vmatpush.msrb.mxu1 %v1046_v6 }
  0x65   : > { %1147 = vmatpush.msrb.mxu2 %v1047_v7  ;;  %1176 = vmatpush.msrb.mxu3 %v1048_v8 }
  0x66   : > { %4965 = vmatmul.msk.f32.gmra.mxu0 %vm665_vm0, %v6550_v18  ;;  %4969 = vmatmul.msk.f32.gmra.mxu1 %vm665_vm0, %v6550_v18  ;;  %v6684_v18 = vpack.c.bf16 %v603_v17, %v602_v16 }
  0x67   : > { %4973 = vmatmul.msk.f32.gmra.mxu2 %vm665_vm0, %v6582_v40  ;;  %4977 = vmatmul.msk.f32.gmra.mxu3 %vm665_vm0, %v6582_v40 }
  0x68   : > { %1090 = vmatpush.msrb.mxu0 %v1039_v9  ;;  %1119 = vmatpush.msrb.mxu1 %v1040_v10  ;;  %8767 = vst [vmem:[#allocation32_spill] sm:$0xff] %v6684_v18 }
  0x69   : > { %1148 = vmatpush.msrb.mxu2 %v1041_v11  ;;  %1177 = vmatpush.msrb.mxu3 %v1042_v12 }
  0x6e   : > { %4966 = vmatmul.msk.f32.gmra.mxu0 %vm665_vm0, %v6557_v20  ;;  %4970 = vmatmul.msk.f32.gmra.mxu1 %vm665_vm0, %v6557_v20  ;;  %v1061_v20 = vld [vmem:[#allocation6 + $0x230] sm:$0xff] }
  0x6f   : > { %4974 = vmatmul.msk.f32.gmra.mxu2 %vm665_vm0, %v6605_v42  ;;  %4978 = vmatmul.msk.f32.gmra.mxu3 %vm665_vm0, %v6605_v42 }
  0x76   : > { %4967 = vmatmul.msk.f32.gmra.mxu0 %vm665_vm0, %v6560_v21  ;;  %4971 = vmatmul.msk.f32.gmra.mxu1 %vm665_vm0, %v6560_v21  ;;  %v1062_v21 = vld [vmem:[#allocation6 + $0x238] sm:$0xff] }
  0x77   : > { %4975 = vmatmul.msk.f32.gmra.mxu2 %vm665_vm0, %v6608_v43  ;;  %4979 = vmatmul.msk.f32.gmra.mxu3 %vm665_vm0, %v6608_v43 }
  0x7e   : > { %4980 = vmatmul.msk.f32.vlgmr.msra.gmra.mxu0 %vm665_vm0, %v6579_v39  ;;  %4984 = vmatmul.msk.f32.vlgmr.msra.gmra.mxu1 %vm665_vm0, %v6579_v39 }
  0x7f   : > { %4988 = vmatmul.msk.f32.vlgmr.msra.gmra.mxu2 %vm665_vm0, %v6579_v39  ;;  %4992 = vmatmul.msk.f32.vlgmr.msra.gmra.mxu3 %vm665_vm0, %v6579_v39 }
  0x80   : > { %1203 = vmatpush.msra.mxu0 %v1061_v20  ;;  %1232 = vmatpush.msra.mxu1 %v1062_v21 }
  0x82   : > { %1204 = vmatpush.msra.mxu0 %v1055_v23  ;;  %1233 = vmatpush.msra.mxu1 %v1056_v24 }
  0x84   : > { %1205 = vmatpush.msra.mxu0 %v1049_v25  ;;  %1234 = vmatpush.msra.mxu1 %v1050_v26 }
  0x86   : > { %4981 = vmatmul.msk.f32.gmra.mxu0 %vm665_vm0, %v6582_v40  ;;  %4985 = vmatmul.msk.f32.gmra.mxu1 %vm665_vm0, %v6582_v40 }
  0x87   : > { %4989 = vmatmul.msk.f32.gmra.mxu2 %vm665_vm0, %v6582_v40  ;;  %4993 = vmatmul.msk.f32.gmra.mxu3 %vm665_vm0, %v6582_v40 }
  0x88   : > { %1206 = vmatpush.msra.mxu0 %v1043_v27  ;;  %1235 = vmatpush.msra.mxu1 %v1044_v28 }
  0x8e   : > { %4982 = vmatmul.msk.f32.gmra.mxu0 %vm665_vm0, %v6605_v42  ;;  %4986 = vmatmul.msk.f32.gmra.mxu1 %vm665_vm0, %v6605_v42 }
  0x8f   : > { %4990 = vmatmul.msk.f32.gmra.mxu2 %vm665_vm0, %v6605_v42  ;;  %4994 = vmatmul.msk.f32.gmra.mxu3 %vm665_vm0, %v6605_v42 }
  0x96   : > { %4983 = vmatmul.msk.f32.gmra.mxu0 %vm665_vm0, %v6608_v43  ;;  %4987 = vmatmul.msk.f32.gmra.mxu1 %vm665_vm0, %v6608_v43 }
  0x97   : > { %4991 = vmatmul.msk.f32.gmra.mxu2 %vm665_vm0, %v6608_v43  ;;  %4995 = vmatmul.msk.f32.gmra.mxu3 %vm665_vm0, %v6608_v43 }
  0x9e   : > { %4996 = vmatmul.msk.f32.vlgmr.msrb.gmra.mxu0 %vm665_vm0, %v600_v13  ;;  %5000 = vmatmul.msk.f32.vlgmr.msrb.gmra.mxu1 %vm665_vm0, %v600_v13 }
  0x9f   : > { %5004 = vmatmul.msk.f32.vlgmr.msrb.gmra.mxu2 %vm665_vm0, %v600_v13  ;;  %5008 = vmatmul.msk.f32.vlgmr.msrb.gmra.mxu3 %vm665_vm0, %v600_v13 }
  0xa6   : > { %4997 = vmatmul.msk.f32.gmra.mxu0 %vm665_vm0, %v601_v14  ;;  %5001 = vmatmul.msk.f32.gmra.mxu1 %vm665_vm0, %v601_v14 }
  0xa7   : > { %5005 = vmatmul.msk.f32.gmra.mxu2 %vm665_vm0, %v601_v14  ;;  %5009 = vmatmul.msk.f32.gmra.mxu3 %vm665_vm0, %v601_v14 }
  0xae   : > { %4998 = vmatmul.msk.f32.gmra.mxu0 %vm665_vm0, %v602_v16  ;;  %5002 = vmatmul.msk.f32.gmra.mxu1 %vm665_vm0, %v602_v16 }
  0xaf   : > { %5006 = vmatmul.msk.f32.gmra.mxu2 %vm665_vm0, %v602_v16  ;;  %5010 = vmatmul.msk.f32.gmra.mxu3 %vm665_vm0, %v602_v16 }
  0xb6   : > { %4999 = vmatmul.msk.f32.gmra.mxu0 %vm665_vm0, %v603_v17  ;;  %5003 = vmatmul.msk.f32.gmra.mxu1 %vm665_vm0, %v603_v17 }
  0xb7   : > { %5007 = vmatmul.msk.f32.gmra.mxu2 %vm665_vm0, %v603_v17  ;;  %5011 = vmatmul.msk.f32.gmra.mxu3 %vm665_vm0, %v603_v17 }
  0xbb   : > { %v6706_v29 = vpop.f32.mrf.mxu0  ;;  %v6708_v30 = vpop.f32.mrf.mxu1 }
  0xbe   : > { %5012 = vmatmul.msk.f32.vlgmr.msra.gmra.mxu0 %vm665_vm0, %v600_v13  ;;  %5016 = vmatmul.msk.f32.vlgmr.msra.gmra.mxu1 %vm665_vm0, %v600_v13 }
  0xc2   : > { %v6712_v31 = vpop.f32.mrf.mxu2  ;;  %v6714_v32 = vpop.f32.mrf.mxu3 }
  0xc3   : > { %v6716_v33 = vpop.f32.mrf.mxu0  ;;  %v6718_v34 = vpop.f32.mrf.mxu1 }
  0xc6   : > { %5013 = vmatmul.msk.f32.gmra.mxu0 %vm665_vm0, %v601_v14  ;;  %5017 = vmatmul.msk.f32.gmra.mxu1 %vm665_vm0, %v601_v14 }
  0xca   : > { %v6722_v35 = vpop.f32.mrf.mxu2  ;;  %v6724_v36 = vpop.f32.mrf.mxu3 }
  0xcb   : > { %v701_v37 = vpop.f32.mrf.mxu0  ;;  %v730_v38 = vpop.f32.mrf.mxu1 }
  0xce   : > { %5014 = vmatmul.msk.f32.gmra.mxu0 %vm665_vm0, %v602_v16  ;;  %5018 = vmatmul.msk.f32.gmra.mxu1 %vm665_vm0, %v602_v16 }
  0xd2   : > { %v6728_v39 = vpop.f32.mrf.mxu2  ;;  %v6730_v40 = vpop.f32.mrf.mxu3 }
  0xd3   : > { %v704_v42 = vpop.f32.mrf.mxu0  ;;  %v733_v43 = vpop.f32.mrf.mxu1 }
  0xd6   : > { %5015 = vmatmul.msk.f32.gmra.mxu0 %vm665_vm0, %v603_v17  ;;  %5019 = vmatmul.msk.f32.gmra.mxu1 %vm665_vm0, %v603_v17 }
  0xda   : > { %v6734_v45 = vpop.f32.mrf.mxu2  ;;  %v6736_v46 = vpop.f32.mrf.mxu3 }
  0xdb   : > { %v6738_v47 = vpop.f32.mrf.mxu0  ;;  %v6740_v48 = vpop.f32.mrf.mxu1 }
  0xdc   : > { %8768 = vst [vmem:[#allocation33_spill] sm:$0xff] %v6738_v47 }
  0xdd   : > { %8769 = vst [vmem:[#allocation34_spill] sm:$0xff] %v6740_v48 }
  0xe2   : > { %v881_v49 = vpop.f32.mrf.mxu2  ;;  %v910_v50 = vpop.f32.mrf.mxu3 }
  0xe3   : > { %v6742_v51 = vpop.f32.mrf.mxu0  ;;  %v6744_v52 = vpop.f32.mrf.mxu1 }
  0xe4   : > { %8770 = vst [vmem:[#allocation35_spill] sm:$0xff] %v6742_v51 }
  0xe5   : > { %8771 = vst [vmem:[#allocation36_spill] sm:$0xff] %v6744_v52 }
  0xea   : > { %v884_v53 = vpop.f32.mrf.mxu2  ;;  %v913_v54 = vpop.f32.mrf.mxu3 }
  0xeb   : > { %v6746_v55 = vpop.f32.mrf.mxu0  ;;  %v6748_v56 = vpop.f32.mrf.mxu1  ;;  %v914_v52 = vadd.f32 %v913_v54, %v6718_v34  ;;  %v6800_v54 = vld [vmem:[#allocation3 + $0x8] sm:$0xff] }
  0xf2   : > { %v887_v57 = vpop.f32.mrf.mxu2  ;;  %v916_v58 = vpop.f32.mrf.mxu3 }
  0xf3   : > { %v6750_v59 = vpop.f32.mrf.mxu0  ;;  %v6752_v60 = vpop.f32.mrf.mxu1  ;;  %v917_v48 = vadd.f32 %v916_v58, %v730_v38 }
  0xfa   : > { %v890_v61 = vpop.f32.mrf.mxu2  ;;  %v919_v62 = vpop.f32.mrf.mxu3 }
  0xfb   : > { %v6754_v63 = vpop.f32.mrf.mxu0  ;;  %v6756_v0 = vpop.f32.mrf.mxu1  ;;  %v891_v18 = vadd.f32 %v890_v61, %v704_v42  ;;  %v920_v15 = vadd.f32 %v919_v62, %v733_v43  ;;  %v911_v42 = vadd.f32 %v910_v50, %v6708_v30  ;;  %v6812_v62 = vld [vmem:[#allocation3 + $0x10] sm:$0xff] }
 0x102   : > { %v6758_v1 = vpop.f32.mrf.mxu2  ;;  %v6760_v2 = vpop.f32.mrf.mxu3 }
 0x103   : > { %8772 = vst [vmem:[#allocation37_spill] sm:$0xff] %v6758_v1  ;;  %v942_v3 = vpop.f32.mrf.mxu0  ;;  %v971_v4 = vpop.f32.mrf.mxu1 }
 0x104   : > { %8773 = vst [vmem:[#allocation38_spill] sm:$0xff] %v6760_v2  ;;  %v888_v2 = vadd.f32 %v887_v57, %v701_v37 }
 0x10a   : > { %v6762_v5 = vpop.f32.mrf.mxu2  ;;  %v6764_v6 = vpop.f32.mrf.mxu3 }
 0x10b   : > { %8774 = vst [vmem:[#allocation39_spill] sm:$0xff] %v6762_v5  ;;  %v945_v7 = vpop.f32.mrf.mxu0  ;;  %v974_v8 = vpop.f32.mrf.mxu1 }
 0x10c   : > { %8775 = vst [vmem:[#allocation40_spill] sm:$0xff] %v6764_v6  ;;  %v885_v6 = vadd.f32 %v884_v53, %v6716_v33  ;;  %v946_v34 = vadd.f32 %v945_v7, %v6728_v39  ;;  %v940_v39 = vadd.f32 %v6754_v63, %v6712_v31  ;;  %v6822_v63 = vld [vmem:[#allocation3 + $0x30] sm:$0xff] }
 0x112   : > { %v6766_v9 = vpop.f32.mrf.mxu2  ;;  %v6768_v10 = vpop.f32.mrf.mxu3 }
 0x113   : > { %8776 = vst [vmem:[#allocation41_spill] sm:$0xff] %v6768_v10  ;;  %v948_v11 = vpop.f32.mrf.mxu0  ;;  %v977_v12 = vpop.f32.mrf.mxu1  ;;  %v882_v10 = vadd.f32 %v881_v49, %v6706_v29  ;;  %v975_v29 = vadd.f32 %v974_v8, %v6730_v40  ;;  %v6786_v49 = vld [vmem:[#allocation3] sm:$0xff] }
 0x114   : > { %v949_v37 = vadd.f32 %v948_v11, %v6734_v45  ;;  %v943_v45 = vadd.f32 %v942_v3, %v6722_v35  ;;  %v969_v35 = vadd.f32 %v6756_v0, %v6714_v32  ;;  %v6810_v32 = vld [vmem:[#allocation3 + $0x28] sm:$0xff] }
 0x11a   : > { %v6770_v13 = vpop.f32.mrf.mxu2  ;;  %v6772_v14 = vpop.f32.mrf.mxu3 }
 0x11b   : > { %v1092_v16 = vpop.f32.mrf.mxu0  ;;  %v1121_v17 = vpop.f32.mrf.mxu1  ;;  %v1007_v0 = vadd.f32 %v6770_v13, %v6750_v59  ;;  %v6836_v59 = vld [vmem:[#allocation3 + $0x18] sm:$0xff] }
 0x122   : > { %v1150_v20 = vpop.f32.mrf.mxu2  ;;  %v1179_v21 = vpop.f32.mrf.mxu3 }
 0x123   : > { %v1095_v23 = vpop.f32.mrf.mxu0  ;;  %v1124_v24 = vpop.f32.mrf.mxu1 }
 0x124   : > { %v1255_v43 = vadd.f32 %v1095_v23, %v885_v6  ;;  %v1256_v61 = vadd.f32 %v1124_v24, %v914_v52  ;;  %v8784_v23 = vld [vmem:[#allocation34_spill] sm:$0xff] }
 0x125   : > { %v8785_v24 = vld [vmem:[#allocation38_spill] sm:$0xff] }
 0x12a   : > { %v1153_v25 = vpop.f32.mrf.mxu2  ;;  %v1182_v26 = vpop.f32.mrf.mxu3 }
 0x12b   : > { %v1098_v27 = vpop.f32.mrf.mxu0  ;;  %v1127_v28 = vpop.f32.mrf.mxu1  ;;  %v1257_v40 = vadd.f32 %v1153_v25, %v943_v45  ;;  %v1027_v25 = vadd.f32 %v8785_v24, %v8784_v23  ;;  %v1539_v45 = vld [vmem:[%s8695_s4 + $0xd0] sm:$0xff] }
 0x12c   : > { %v1261_v5 = vadd.f32 %v1098_v27, %v888_v2  ;;  %v1262_v51 = vadd.f32 %v1127_v28, %v917_v48  ;;  %v1004_v2 = vadd.f32 %v6766_v9, %v6746_v55  ;;  %v8781_v55 = vld [vmem:[#allocation40_spill] sm:$0xff] }
 0x132   : > { %v1156_v44 = vpop.f32.mrf.mxu2  ;;  %v1185_v41 = vpop.f32.mrf.mxu3 }
 0x133   : > { %v1101_v22 = vpop.f32.mrf.mxu0  ;;  %v1130_v19 = vpop.f32.mrf.mxu1  ;;  %v1263_v50 = vadd.f32 %v1156_v44, %v946_v34  ;;  %v1251_v44 = vadd.f32 %v1150_v20, %v940_v39  ;;  %v8783_v20 = vld [vmem:[#allocation37_spill] sm:$0xff] }
 0x134   : > { %v1267_v1 = vadd.f32 %v1101_v22, %v891_v18  ;;  %v1268_v47 = vadd.f32 %v1130_v19, %v920_v15  ;;  %v978_v19 = vadd.f32 %v977_v12, %v6736_v46  ;;  %v1249_v22 = vadd.f32 %v1092_v16, %v882_v10  ;;  %v8778_v10 = vld [vmem:[#allocation35_spill] sm:$0xff]  ;;  %v8780_v12 = vld [vmem:[#allocation36_spill] sm:$0xff]  ;;  %v1542_v34 = vld [vmem:[%s8695_s4 + $0xe8] sm:$0xff] }
 0x135   : > { %v1250_v15 = vadd.f32 %v1121_v17, %v911_v42  ;;  %v972_v46 = vadd.f32 %v971_v4, %v6724_v36  ;;  %v6798_v36 = vld [vmem:[#allocation3 + $0x20] sm:$0xff]  ;;  %v1030_v9 = vadd.f32 %v8781_v55, %v8780_v12 }
 0x136   : > { %1367 = vmatpush.msrb.mxu0 %v1267_v1  ;;  %1396 = vmatpush.msrb.mxu1 %v1268_v47  ;;  %v1036_v1 = vadd.f32 %v6772_v14, %v6752_v60  ;;  %v8779_v60 = vld [vmem:[#allocation39_spill] sm:$0xff]  ;;  %v8782_v17 = vld [vmem:[#allocation33_spill] sm:$0xff] }
 0x137   : > { %v1258_v52 = vadd.f32 %v1182_v26, %v972_v46  ;;  %v1001_v11 = vadd.f32 %v8779_v60, %v8778_v10  ;;  %v6850_v26 = vld [vmem:[#allocation3 + $0x38] sm:$0xff]  ;;  %v6858_v42 = vld [vmem:[#allocation3 + $0x40] sm:$0xff] }
 0x138   : > { %1368 = vmatpush.msrb.mxu0 %v1261_v5  ;;  %1397 = vmatpush.msrb.mxu1 %v1262_v51  ;;  %v1264_v51 = vadd.f32 %v1185_v41, %v975_v29  ;;  %v1252_v41 = vadd.f32 %v1179_v21, %v969_v35  ;;  %v8777_v5 = vld [vmem:[#allocation41_spill] sm:$0xff]  ;;  %v998_v21 = vadd.f32 %v8783_v20, %v8782_v17  ;;  %v1520_v35 = vld [vmem:[%s8695_s4 + $0x38] sm:$0xff] }
 0x139   : > { %v1033_v6 = vadd.f32 %v8777_v5, %v6748_v56  ;;  %v1525_v29 = vld [vmem:[%s8695_s4 + $0x60] sm:$0xff]  ;;  %v1522_v46 = vld [vmem:[%s8695_s4 + $0x48] sm:$0xff] }
 0x13a   : > { %v1159_v18 = vpop.f32.mrf.mxu2  ;;  %v1188_v33 = vpop.f32.mrf.mxu3  ;;  %1369 = vmatpush.msrb.mxu0 %v1255_v43  ;;  %1398 = vmatpush.msrb.mxu1 %v1256_v61  ;;  %v6864_v43 = vld [vmem:[#allocation3 + $0x48] sm:$0xff]  ;;  %v6870_v61 = vld [vmem:[#allocation3 + $0x50] sm:$0xff]  ;;  %v1537_v39 = vld [vmem:[%s8695_s4 + $0xc0] sm:$0xff] }
 0x13b   : > { %v1269_v38 = vadd.f32 %v1159_v18, %v949_v37  ;;  %v1270_v30 = vadd.f32 %v1188_v33, %v978_v19  ;;  %v6782_v47 = vpop.f32.mrf.mxu0  ;;  %v6784_v48 = vpop.f32.mrf.mxu1  ;;  %v6876_v37 = vld [vmem:[#allocation3 + $0x58] sm:$0xff]  ;;  %v1543_v18 = vld [vmem:[%s8695_s4 + $0xf0] sm:$0xff]  ;;  %v1526_v33 = vld [vmem:[%s8695_s4 + $0x68] sm:$0xff] }
 0x13c   : > { %1370 = vmatpush.msrb.mxu0 %v1249_v22  ;;  %1399 = vmatpush.msrb.mxu1 %v1250_v15  ;;  %v1253_v27 = vadd.f32 %v6782_v47, %v998_v21  ;;  %v1254_v28 = vadd.f32 %v6784_v48, %v1027_v25  ;;  %v1528_v19 = vld [vmem:[%s8695_s4 + $0x78] sm:$0xff]  ;;  %v1527_v15 = vld [vmem:[%s8695_s4 + $0x70] sm:$0xff]  ;;  %v1514_v5 = vld [vmem:[%s8695_s4 + $0x8] sm:$0xff] }
 0x13d   : > { %1297 = vmatpush.msra.mxu2 %v1269_v38  ;;  %1326 = vmatpush.msra.mxu3 %v1270_v30  ;;  %v1544_v22 = vld [vmem:[%s8695_s4 + $0xf8] sm:$0xff]  ;;  %v1541_v38 = vld [vmem:[%s8695_s4 + $0xe0] sm:$0xff]  ;;  %v1523_v48 = vld [vmem:[%s8695_s4 + $0x50] sm:$0xff] }
 0x13e   : > { %5028 = vmatmul.msk.f32.vlgmr.msrb.gmra.mxu0 %vm665_vm0, %v6786_v49  ;;  %5032 = vmatmul.msk.f32.vlgmr.msrb.gmra.mxu1 %vm665_vm0, %v6786_v49  ;;  %v1524_v30 = vld [vmem:[%s8695_s4 + $0x58] sm:$0xff] }
 0x13f   : > { %1298 = vmatpush.msra.mxu2 %v1263_v50  ;;  %1327 = vmatpush.msra.mxu3 %v1264_v51  ;;  %v1540_v47 = vld [vmem:[%s8695_s4 + $0xd8] sm:$0xff]  ;;  %v1538_v50 = vld [vmem:[%s8695_s4 + $0xc8] sm:$0xff]  ;;  %v1521_v51 = vld [vmem:[%s8695_s4 + $0x40] sm:$0xff] }
 0x140   : > { %1545 = vmatpush.msra.mxu0 %v1528_v19  ;;  %1574 = vmatpush.msra.mxu1 %v1544_v22 }
 0x141   : > { %1299 = vmatpush.msra.mxu2 %v1257_v40  ;;  %1328 = vmatpush.msra.mxu3 %v1258_v52  ;;  %v1536_v40 = vld [vmem:[%s8695_s4 + $0xb8] sm:$0xff]  ;;  %v1519_v52 = vld [vmem:[%s8695_s4 + $0x30] sm:$0xff] }
 0x142   : > { %1546 = vmatpush.msra.mxu0 %v1527_v15  ;;  %1575 = vmatpush.msra.mxu1 %v1543_v18 }
 0x143   : > { %1300 = vmatpush.msra.mxu2 %v1251_v44  ;;  %1329 = vmatpush.msra.mxu3 %v1252_v41  ;;  %v1211_v31 = vpop.f32.mrf.mxu0  ;;  %v1240_v53 = vpop.f32.mrf.mxu1  ;;  %v1535_v44 = vld [vmem:[%s8695_s4 + $0xb0] sm:$0xff]  ;;  %v1518_v41 = vld [vmem:[%s8695_s4 + $0x28] sm:$0xff] }
 0x144   : > { %5020 = vmatmul.msk.f32.vlgmr.msra.gmra.mxu2 %vm665_vm0, %v6798_v36  ;;  %5024 = vmatmul.msk.f32.vlgmr.msra.gmra.mxu3 %vm665_vm0, %v6798_v36  ;;  %v1259_v56 = vadd.f32 %v1211_v31, %v1001_v11  ;;  %v1260_v16 = vadd.f32 %v1240_v53, %v1030_v9  ;;  %v1534_v31 = vld [vmem:[%s8695_s4 + $0xa8] sm:$0xff]  ;;  %v1517_v53 = vld [vmem:[%s8695_s4 + $0x20] sm:$0xff] }
 0x145   : > { %1547 = vmatpush.msra.mxu0 %v1526_v33  ;;  %1576 = vmatpush.msra.mxu1 %v1542_v34 }
 0x146   : > { %5029 = vmatmul.msk.f32.gmra.mxu0 %vm665_vm0, %v6800_v54  ;;  %5033 = vmatmul.msk.f32.gmra.mxu1 %vm665_vm0, %v6800_v54 }
 0x147   : > { %1548 = vmatpush.msra.mxu0 %v1525_v29  ;;  %1577 = vmatpush.msra.mxu1 %v1541_v38 }
 0x149   : > { %1549 = vmatpush.msra.mxu0 %v1524_v30  ;;  %1578 = vmatpush.msra.mxu1 %v1540_v47 }
 0x14b   : > { %v1214_v57 = vpop.f32.mrf.mxu0  ;;  %v1243_v58 = vpop.f32.mrf.mxu1  ;;  %1550 = vmatpush.msra.mxu0 %v1523_v48  ;;  %1579 = vmatpush.msra.mxu1 %v1539_v45 }
 0x14c   : > { %5021 = vmatmul.msk.f32.gmra.mxu2 %vm665_vm0, %v6810_v32  ;;  %5025 = vmatmul.msk.f32.gmra.mxu3 %vm665_vm0, %v6810_v32  ;;  %v1265_v13 = vadd.f32 %v1214_v57, %v1004_v2  ;;  %v1266_v14 = vadd.f32 %v1243_v58, %v1033_v6  ;;  %v1533_v57 = vld [vmem:[%s8695_s4 + $0xa0] sm:$0xff]  ;;  %v1516_v58 = vld [vmem:[%s8695_s4 + $0x18] sm:$0xff]  ;;  %v1530_v6 = vld [vmem:[%s8695_s4 + $0x88] sm:$0xff] }
 0x14d   : > { %1551 = vmatpush.msra.mxu0 %v1522_v46  ;;  %1580 = vmatpush.msra.mxu1 %v1538_v50 }
 0x14e   : > { %5030 = vmatmul.msk.f32.gmra.mxu0 %vm665_vm0, %v6812_v62  ;;  %5034 = vmatmul.msk.f32.gmra.mxu1 %vm665_vm0, %v6812_v62 }
 0x14f   : > { %1552 = vmatpush.msra.mxu0 %v1521_v51  ;;  %1581 = vmatpush.msra.mxu1 %v1537_v39 }
 0x151   : > { %1553 = vmatpush.msra.mxu0 %v1520_v35  ;;  %1582 = vmatpush.msra.mxu1 %v1536_v40 }
 0x153   : > { %v1217_v3 = vpop.f32.mrf.mxu0  ;;  %v1246_v4 = vpop.f32.mrf.mxu1  ;;  %1554 = vmatpush.msra.mxu0 %v1519_v52  ;;  %1583 = vmatpush.msra.mxu1 %v1535_v44 }
 0x154   : > { %v1271_v7 = vadd.f32 %v1217_v3, %v1007_v0  ;;  %v1272_v8 = vadd.f32 %v1246_v4, %v1036_v1  ;;  %5022 = vmatmul.msk.f32.gmra.mxu2 %vm665_vm0, %v6822_v63  ;;  %5026 = vmatmul.msk.f32.gmra.mxu3 %vm665_vm0, %v6822_v63  ;;  %v1532_v0 = vld [vmem:[%s8695_s4 + $0x98] sm:$0xff]  ;;  %v1515_v3 = vld [vmem:[%s8695_s4 + $0x10] sm:$0xff] }
 0x155   : > { %1555 = vmatpush.msra.mxu0 %v1518_v41  ;;  %1584 = vmatpush.msra.mxu1 %v1534_v31  ;;  %v1531_v4 = vld [vmem:[%s8695_s4 + $0x90] sm:$0xff] }
 0x156   : > { %1437 = vmatpush.msrb.mxu2 %v1271_v7  ;;  %1466 = vmatpush.msrb.mxu3 %v1272_v8  ;;  %v1513_v7 = vld [vmem:[%s8695_s4] sm:$0xff] }
 0x157   : > { %5031 = vmatmul.msk.f32.gmra.mxu0 %vm665_vm0, %v6836_v59  ;;  %5035 = vmatmul.msk.f32.gmra.mxu1 %vm665_vm0, %v6836_v59  ;;  %v1529_v8 = vld [vmem:[%s8695_s4 + $0x80] sm:$0xff] }
 0x158   : > { %1438 = vmatpush.msrb.mxu2 %v1265_v13  ;;  %1467 = vmatpush.msrb.mxu3 %v1266_v14 }
 0x159   : > { %1556 = vmatpush.msra.mxu0 %v1517_v53  ;;  %1585 = vmatpush.msra.mxu1 %v1533_v57 }
 0x15a   : > { %1439 = vmatpush.msrb.mxu2 %v1259_v56  ;;  %1468 = vmatpush.msrb.mxu3 %v1260_v16  ;;  %v1491_v56 = vld [vmem:[%s8694_s3] sm:$0x3] }
 0x15b   : > { %1557 = vmatpush.msra.mxu0 %v1516_v58  ;;  %1586 = vmatpush.msra.mxu1 %v1532_v0  ;;  %v1493_v23 = vperm.slane %v1491_v56, 0  ;;  %v1494_v24 = vperm.slane %v1491_v56, 1 }
 0x15c   : > { %5023 = vmatmul.msk.f32.gmra.mxu2 %vm665_vm0, %v6850_v26  ;;  %5027 = vmatmul.msk.f32.gmra.mxu3 %vm665_vm0, %v6850_v26 }
 0x15d   : > { %1440 = vmatpush.msrb.mxu2 %v1253_v27  ;;  %1469 = vmatpush.msrb.mxu3 %v1254_v28 }
 0x15e   : > { %1558 = vmatpush.msra.mxu0 %v1515_v3  ;;  %1587 = vmatpush.msra.mxu1 %v1531_v4 }
 0x160   : > { %1559 = vmatpush.msra.mxu0 %v1514_v5  ;;  %1588 = vmatpush.msra.mxu1 %v1530_v6 }
 0x162   : > { %1560 = vmatpush.msra.mxu0 %v1513_v7  ;;  %1589 = vmatpush.msra.mxu1 %v1529_v8 }
 0x164   : > { %5036 = vmatmul.msk.f32.vlgmr.msrb.gmra.mxu2 %vm665_vm0, %v6858_v42  ;;  %5040 = vmatmul.msk.f32.vlgmr.msrb.gmra.mxu3 %vm665_vm0, %v6858_v42 }
 0x16c   : > { %5037 = vmatmul.msk.f32.gmra.mxu2 %vm665_vm0, %v6864_v43  ;;  %5041 = vmatmul.msk.f32.gmra.mxu3 %vm665_vm0, %v6864_v43 }
 0x174   : > { %5038 = vmatmul.msk.f32.gmra.mxu2 %vm665_vm0, %v6870_v61  ;;  %5042 = vmatmul.msk.f32.gmra.mxu3 %vm665_vm0, %v6870_v61 }
 0x17c   : > { %5039 = vmatmul.msk.f32.gmra.mxu2 %vm665_vm0, %v6876_v37  ;;  %5043 = vmatmul.msk.f32.gmra.mxu3 %vm665_vm0, %v6876_v37 }
 0x1bb   : > { %v1372_v55 = vpop.f32.mrf.mxu0  ;;  %v1401_v9 = vpop.f32.mrf.mxu1 }
 0x1c3   : > { %v1375_v20 = vpop.f32.mrf.mxu0  ;;  %v1404_v21 = vpop.f32.mrf.mxu1 }
 0x1c7   : > { %v1302_v1 = vpop.f32.mrf.mxu2  ;;  %v1331_v2 = vpop.f32.mrf.mxu3 }
 0x1c8   : > { %v1373_v16 = vadd.f32 %v1372_v55, %v1302_v1  ;;  %v1402_v17 = vadd.f32 %v1401_v9, %v1331_v2 }
 0x1cb   : > { %v1378_v45 = vpop.f32.mrf.mxu0  ;;  %v1407_v46 = vpop.f32.mrf.mxu1 }
 0x1cf   : > { %v1305_v10 = vpop.f32.mrf.mxu2  ;;  %v1334_v60 = vpop.f32.mrf.mxu3 }
 0x1d0   : > { %v1376_v34 = vadd.f32 %v1375_v20, %v1305_v10  ;;  %v1405_v29 = vadd.f32 %v1404_v21, %v1334_v60 }
 0x1d4   : > { %v1381_v0 = vpop.f32.mrf.mxu0  ;;  %v1410_v1 = vpop.f32.mrf.mxu1 }
 0x1d7   : > { %v1308_v11 = vpop.f32.mrf.mxu2  ;;  %v1337_v12 = vpop.f32.mrf.mxu3 }
 0x1d8   : > { %v1379_v40 = vadd.f32 %v1378_v45, %v1308_v11  ;;  %v1408_v52 = vadd.f32 %v1407_v46, %v1337_v12  ;;  %v5732_v45 = vld [vmem:[#allocation8 + $0x13c] sm:$0xf0]  ;;  %v5741_v46 = vld [vmem:[#allocation8 + $0x18c] sm:$0xf] }
 0x1df   : > { %v1311_v13 = vpop.f32.mrf.mxu2  ;;  %v1340_v14 = vpop.f32.mrf.mxu3 }
 0x1e0   : > { %v1382_v4 = vadd.f32 %v1381_v0, %v1311_v13  ;;  %v1411_v5 = vadd.f32 %v1410_v1, %v1340_v14 }
 0x1e7   : > { %v1442_v25 = vpop.f32.mrf.mxu2  ;;  %v1471_v27 = vpop.f32.mrf.mxu3 }
 0x1e8   : > { %v1483_v28 = vadd.f32 %v1442_v25, %v1373_v16  ;;  %v1484_v19 = vadd.f32 %v1471_v27, %v1402_v17 }
 0x1ea   : > { %v1497_v22 = vadd.f32 %v1493_v23, %v1483_v28  ;;  %v1498_v15 = vadd.f32 %v1494_v24, %v1484_v19 }
 0x1ec   : > { %v1505_v18 = vmax.f32 %v1497_v22, 0.0  ;;  %v1506_v33 = vmax.f32 %v1498_v15, 0.0 }
 0x1ee   : > { %1561 = vmatmul.f32.vlgmr.msra.gmra.mxu0 %v1505_v18  ;;  %1590 = vmatmul.f32.vlgmr.msra.gmra.mxu1 %v1506_v33 }
 0x1ef   : > { %v1445_v38 = vpop.f32.mrf.mxu2  ;;  %v1474_v30 = vpop.f32.mrf.mxu3 }
 0x1f0   : > { %v1485_v47 = vadd.f32 %v1445_v38, %v1376_v34  ;;  %v1486_v48 = vadd.f32 %v1474_v30, %v1405_v29  ;;  %v5128_v38 = vld [vmem:[#allocation8 + $0x180] sm:$0xf]  ;;  %v6345_v30 = vmov 0  }
 0x1f1   : > { %5963 = vset.pattern.permute.xlu2 %v6345_v30  ;;  %5964 = vset.pattern.permute.xlu0 %v6345_v30 }
 0x1f2   : > { %v1499_v50 = vadd.f32 %v1493_v23, %v1485_v47  ;;  %v1500_v51 = vadd.f32 %v1494_v24, %v1486_v48  ;;  %v5064_v47 = vld [vmem:[#allocation8 + $0x100] sm:$0xf] }
 0x1f4   : > { %v1507_v39 = vmax.f32 %v1499_v50, 0.0  ;;  %v1508_v35 = vmax.f32 %v1500_v51, 0.0  ;;  %v5138_v50 = vld [vmem:[#allocation8 + $0x1c8] sm:$0xf0] }
 0x1f6   : > { %1564 = vmatmul.f32.gmra.mxu0 %v1507_v39  ;;  %1593 = vmatmul.f32.gmra.mxu1 %v1508_v35 }
 0x1f7   : > { %v1448_v44 = vpop.f32.mrf.mxu2  ;;  %v1477_v41 = vpop.f32.mrf.mxu3 }
 0x1f8   : > { %v1487_v31 = vadd.f32 %v1448_v44, %v1379_v40  ;;  %v1488_v53 = vadd.f32 %v1477_v41, %v1408_v52  ;;  %v5065_v52 = vor.u32 %v5732_v45, %v5064_v47  ;;  %v5141_v44 = vor.u32 %v5741_v46, %v5138_v50  ;;  %v5725_v41 = vld [vmem:[#allocation8 + $0x10c] sm:$0xf] }
 0x1fa   : > { %v1501_v57 = vadd.f32 %v1493_v23, %v1487_v31  ;;  %v1502_v58 = vadd.f32 %v1494_v24, %v1488_v53  ;;  %v5074_v31 = vld [vmem:[#allocation8 + $0x148] sm:$0xf0]  ;;  %v5144_v53 = vld [vmem:[#allocation8 + $0x190] sm:$0xf] }
 0x1fb   : > { %v5077_v0 = vor.u32 %v5725_v41, %v5074_v31  ;;  %v5224_v31 = vld [vmem:[#allocation8] sm:$0xf] }
 0x1fc   : > { %v1510_v2 = vmax.f32 %v1502_v58, 0.0  ;;  %v1509_v3 = vmax.f32 %v1501_v57, 0.0  ;;  %v5750_v57 = vld [vmem:[#allocation8 + $0x1cc] sm:$0xf0] }
 0x1fd   : > { %v5080_v58 = vld [vmem:[#allocation8 + $0x110] sm:$0xf]  ;;  %v5145_v1 = vor.u32 %v5750_v57, %v5144_v53  ;;  %v5700_v53 = vld [vmem:[#allocation8 + $0x3c] sm:$0xf0] }
 0x1fe   : > { %1567 = vmatmul.f32.gmra.mxu0 %v1509_v3  ;;  %1596 = vmatmul.f32.gmra.mxu1 %v1510_v2  ;;  %v5734_v2 = vld [vmem:[#allocation8 + $0x14c] sm:$0xf0] }
 0x1ff   : > { %v1451_v6 = vpop.f32.mrf.mxu2  ;;  %v1480_v7 = vpop.f32.mrf.mxu3  ;;  %v5081_v3 = vor.u32 %v5734_v2, %v5080_v58  ;;  %v5225_v58 = vor.u32 %v5700_v53, %v5224_v31 }
 0x200   : > { %v1489_v8 = vadd.f32 %v1451_v6, %v1382_v4  ;;  %v1490_v10 = vadd.f32 %v1480_v7, %v1411_v5  ;;  %v8786_v4 = vld [vmem:[#allocation27_spill] sm:$0xff] }
 0x201   : > { %v5727_v5 = vld [vmem:[#allocation8 + $0x11c] sm:$0xf] }
 0x202   : > { %v1503_v60 = vadd.f32 %v1493_v23, %v1489_v8  ;;  %v1504_v11 = vadd.f32 %v1494_v24, %v1490_v10  ;;  %v5090_v7 = vld [vmem:[#allocation8 + $0x158] sm:$0xf0] }
 0x203   : > { %v5093_v8 = vor.u32 %v5727_v5, %v5090_v7  ;;  %v8787_v10 = vld [vmem:[#allocation28_spill] sm:$0xff]  ;;  %v8788_v7 = vld [vmem:[#allocation29_spill] sm:$0xff] }
 0x204   : > { %v1511_v12 = vmax.f32 %v1503_v60, 0.0  ;;  %v1512_v55 = vmax.f32 %v1504_v11, 0.0  ;;  %v5745_v60 = vld [vmem:[#allocation8 + $0x1ac] sm:$0xf] }
 0x205   : > { %v5170_v11 = vld [vmem:[#allocation8 + $0x1e8] sm:$0xf0] }
 0x206   : > { %1570 = vmatmul.f32.gmra.mxu0 %v1511_v12  ;;  %1599 = vmatmul.f32.gmra.mxu1 %v1512_v55  ;;  %v5173_v12 = vor.u32 %v5745_v60, %v5170_v11  ;;  %v5729_v55 = vld [vmem:[#allocation8 + $0x12c] sm:$0xf] }
 0x26b   : > { %v1562_v9 = vpop.f32.mrf.mxu0  ;;  %v1591_v56 = vpop.f32.mrf.mxu1 }
 0x26c   : > { %v1592_v24 = vadd.f32 %v1591_v56, %v1562_v9  ;;  %v5106_v9 = vld [vmem:[#allocation8 + $0x168] sm:$0xf0] }
 0x26d   : > { %v5109_v56 = vor.u32 %v5729_v55, %v5106_v9  ;;  %v5234_v55 = vld [vmem:[#allocation8 + $0x48] sm:$0xf0] }
 0x273   : > { %v1565_v16 = vpop.f32.mrf.mxu0  ;;  %v1594_v17 = vpop.f32.mrf.mxu1 }
 0x274   : > { %v1595_v23 = vadd.f32 %v1594_v17, %v1565_v16  ;;  %v5176_v16 = vld [vmem:[#allocation8 + $0x1b0] sm:$0xf] }
 0x275   : > { %v5754_v17 = vld [vmem:[#allocation8 + $0x1ec] sm:$0xf0] }
 0x276   : > { %v5958_v19 = vpack.i.bf16 %v1592_v24, %v1595_v23 }
 0x27b   : > { %v1568_v20 = vpop.f32.mrf.mxu0  ;;  %v1597_v21 = vpop.f32.mrf.mxu1 }
 0x27c   : > { %v1598_v25 = vadd.f32 %v1597_v21, %v1568_v20  ;;  %v5177_v20 = vor.u32 %v5754_v17, %v5176_v16  ;;  %v5112_v21 = vld [vmem:[#allocation8 + $0x130] sm:$0xf] }
 0x283   : > { %v1571_v13 = vpop.f32.mrf.mxu0  ;;  %v1600_v14 = vpop.f32.mrf.mxu1 }
 0x284   : > { %v1601_v27 = vadd.f32 %v1600_v14, %v1571_v13  ;;  %v5738_v13 = vld [vmem:[#allocation8 + $0x16c] sm:$0xf0] }
 0x285   : > { %v5113_v14 = vor.u32 %v5738_v13, %v5112_v21 }
 0x286   : > { %1660 = vmatpush.msra.mxu3 %v1601_v27  ;;  %v5953_v28 = vpack.i.bf16 %v1598_v25, %v1601_v27 }
 0x288   : > { %5954 = vrot.lane.b32.xlu1 %v5953_v28, %s6343_s16  ;;  %5944 = vrot.lane.b32.xlu0 %v5953_v28, %s8739_s22  ;;  %v5747_v28 = vld [vmem:[#allocation8 + $0x1bc] sm:$0xf] }
 0x289   : > { %1661 = vmatpush.msra.mxu3 %v1598_v25 }
 0x28b   : > { %1662 = vmatpush.msra.mxu3 %v1595_v23  ;;  %v5186_v23 = vld [vmem:[#allocation8 + $0x1f8] sm:$0xf0] }
 0x28d   : > { %1663 = vmatpush.msra.mxu3 %v1592_v24 }
 0x28e   : > { %5048 = vmatmul.msk.f32.vlgmr.msra.gmra.mxu3 %vm665_vm0, %v6786_v49  ;;  %v5965_v49 = vld [vmem:[#allocation2] ss:$0 sm:$0xff] }
 0x28f   : > { %1726 = vperm.xlu2 %5963, %v5965_v49  }
 0x290   : > { %5959 = vrot.lane.b32.xlu1 %v5958_v19, %s6343_s16  ;;  %5949 = vrot.lane.b32.xlu0 %v5958_v19, %s8739_s22  ;;  %v5189_v19 = vor.u32 %v5747_v28, %v5186_v23  ;;  %v8789_v23 = vld [vmem:[#allocation30_spill] sm:$0xff] }
 0x296   : > { %5049 = vmatmul.msk.f32.gmra.mxu3 %vm665_vm0, %v6800_v54  ;;  %v5748_v54 = vld [vmem:[#allocation8 + $0x1bc] sm:$0xf0] }
 0x29e   : > { %5050 = vmatmul.msk.f32.gmra.mxu3 %vm665_vm0, %v6812_v62 }
 0x2a6   : > { %5051 = vmatmul.msk.f32.gmra.mxu3 %vm665_vm0, %v6836_v59  ;;  %v5129_v59 = vor.u32 %v5748_v54, %v5128_v38 }
 0x2a8   : > { %2122 = vmatpush.bf16.msrb.mxu3 %v5129_v59 }
 0x2ac   : > { %2123 = vmatpush.bf16.msrb.mxu3 %v5065_v52 }
 0x2af   : > { %5190 = vmatmul.msk.bf16.vlgmr.msrb.gmra.mxu3 %vm665_vm0, %v8786_v4 }
 0x2b0   : > { %2198 = vmatpush.bf16.msra.mxu3 %v5145_v1 }
 0x2b4   : > { %2199 = vmatpush.bf16.msra.mxu3 %v5081_v3 }
 0x2bf   : > { %5191 = vmatmul.msk.bf16.gmra.mxu3 %vm665_vm0, %v8787_v10 }
 0x2cf   : > { %5198 = vmatmul.msk.bf16.vlgmr.msra.gmra.mxu3 %vm665_vm0, %v8786_v4 }
 0x2df   : > { %5199 = vmatmul.msk.bf16.gmra.mxu3 %vm665_vm0, %v8787_v10 }
 0x2e9   : > { %v1727_v54 = vpop.permute.xlu2 %1726 }
 0x2fa   : > { %v5955_v22 = vpop.permute.xlu1 %5954  ;;  %v5945_v15 = vpop.permute.xlu0 %5944 }
 0x2fb   : > { %v5956_v18 = vunpack.i.l.bf16 %v5955_v22  ;;  %v5946_v33 = vunpack.i.l.bf16 %v5945_v15  ;;  %v5957_v34 = vunpack.i.h.bf16 %v5955_v22  ;;  %v5947_v29 = vunpack.i.h.bf16 %v5945_v15  ;;  %v5731_v15 = vld [vmem:[#allocation8 + $0x13c] sm:$0xf] }
 0x2fd   : > { %1631 = vmatpush.msra.mxu2 %v5946_v33  ;;  %1701 = vmatpush.msrb.mxu0 %v5956_v18  ;;  %v5122_v18 = vld [vmem:[#allocation8 + $0x178] sm:$0xf0] }
 0x2ff   : > { %1632 = vmatpush.msra.mxu2 %v5947_v29  ;;  %1702 = vmatpush.msrb.mxu0 %v5957_v34  ;;  %v5125_v34 = vor.u32 %v5731_v15, %v5122_v18 }
 0x302   : > { %v5960_v62 = vpop.permute.xlu1 %5959  ;;  %v5950_v48 = vpop.permute.xlu0 %5949 }
 0x303   : > { %v5961_v51 = vunpack.i.l.bf16 %v5960_v62  ;;  %v5951_v39 = vunpack.i.l.bf16 %v5950_v48  ;;  %v5962_v35 = vunpack.i.h.bf16 %v5960_v62  ;;  %v5952_v40 = vunpack.i.h.bf16 %v5950_v48 }
 0x305   : > { %1633 = vmatpush.msra.mxu2 %v5951_v39  ;;  %1703 = vmatpush.msrb.mxu0 %v5961_v51 }
 0x307   : > { %1634 = vmatpush.msra.mxu2 %v5952_v40  ;;  %1704 = vmatpush.msrb.mxu0 %v5962_v35  ;;  %v5288_v35 = vld [vmem:[#allocation8 + $0x80] sm:$0xf] }
 0x308   : > { %5044 = vmatmul.msk.f32.vlgmr.msra.gmra.mxu2 %vm665_vm0, %v6798_v36  ;;  %5052 = vmatmul.msk.f32.vlgmr.msrb.gmra.mxu0 %vm665_vm0, %v6858_v42  ;;  %v5743_v36 = vld [vmem:[#allocation8 + $0x19c] sm:$0xf]  ;;  %v5716_v40 = vld [vmem:[#allocation8 + $0xbc] sm:$0xf0] }
 0x309   : > { %2179 = vmatpush.bf16.msra.mxu0 %v5141_v44  ;;  %v5154_v42 = vld [vmem:[#allocation8 + $0x1d8] sm:$0xf0]  ;;  %v5289_v44 = vor.u32 %v5716_v40, %v5288_v35 }
 0x30a   : > { %v5157_v6 = vor.u32 %v5743_v36, %v5154_v42 }
 0x30d   : > { %2180 = vmatpush.bf16.msra.mxu0 %v5077_v0 }
 0x310   : > { %5045 = vmatmul.msk.f32.gmra.mxu2 %vm665_vm0, %v6810_v32  ;;  %5053 = vmatmul.msk.f32.gmra.mxu0 %vm665_vm0, %v6864_v43  ;;  %v5160_v32 = vld [vmem:[#allocation8 + $0x1a0] sm:$0xf] }
 0x311   : > { %2255 = vmatpush.bf16.msrb.mxu0 %v5157_v6  ;;  %v5096_v43 = vld [vmem:[#allocation8 + $0x120] sm:$0xf]  ;;  %v1665_v25 = vpop.f32.mrf.mxu3 }
 0x315   : > { %2256 = vmatpush.bf16.msrb.mxu0 %v5093_v8 }
 0x318   : > { %5046 = vmatmul.msk.f32.gmra.mxu2 %vm665_vm0, %v6822_v63  ;;  %5054 = vmatmul.msk.f32.gmra.mxu0 %vm665_vm0, %v6870_v61  ;;  %v5752_v63 = vld [vmem:[#allocation8 + $0x1dc] sm:$0xf0] }
 0x319   : > { %v5736_v61 = vld [vmem:[#allocation8 + $0x15c] sm:$0xf0]  ;;  %v1668_v22 = vpop.f32.mrf.mxu3 }
 0x320   : > { %5047 = vmatmul.msk.f32.gmra.mxu2 %vm665_vm0, %v6850_v26  ;;  %5055 = vmatmul.msk.f32.gmra.mxu0 %vm665_vm0, %v6876_v37  ;;  %v5161_v26 = vor.u32 %v5752_v63, %v5160_v32  ;;  %v5097_v37 = vor.u32 %v5736_v61, %v5096_v43  ;;  %v5709_v61 = vld [vmem:[#allocation8 + $0x8c] sm:$0xf] }
 0x321   : > { %v1671_v62 = vpop.f32.mrf.mxu3 }
 0x322   : > { %2274 = vmatpush.bf16.msrb.mxu3 %v5161_v26 }
 0x326   : > { %2275 = vmatpush.bf16.msrb.mxu3 %v5097_v37  ;;  %v5298_v37 = vld [vmem:[#allocation8 + $0xc8] sm:$0xf0] }
 0x327   : > { %v5301_v11 = vor.u32 %v5709_v61, %v5298_v37 }
 0x328   : > { %5196 = vmatmul.msk.bf16.vlgmr.msra.gmra.mxu0 %vm665_vm0, %v8786_v4 }
 0x329   : > { %5206 = vmatmul.msk.bf16.vlgmr.msrb.gmra.mxu3 %vm665_vm0, %v8786_v4  ;;  %2331 = vmatpush.bf16.msra.mxu0 %v5173_v12  ;;  %v1674_v57 = vpop.f32.mrf.mxu3  ;;  %v5693_v12 = vld [vmem:[#allocation8 + $0xc] sm:$0xf] }
 0x32a   : > { %2350 = vmatpush.bf16.msra.mxu3 %v5177_v20  ;;  %v5237_v9 = vor.u32 %v5693_v12, %v5234_v55 }
 0x32d   : > { %2332 = vmatpush.bf16.msra.mxu0 %v5109_v56 }
 0x32e   : > { %2351 = vmatpush.bf16.msra.mxu3 %v5113_v14 }
 0x332   : > { %2592 = vmatpush.bf16.msrb.mxu3 %v5289_v44  ;;  %v7047_v63 = vpop.f32.mrf.mxu3 }
 0x336   : > { %2593 = vmatpush.bf16.msrb.mxu3 %v5225_v58 }
 0x338   : > { %5197 = vmatmul.msk.bf16.gmra.mxu0 %vm665_vm0, %v8787_v10 }
 0x339   : > { %5207 = vmatmul.msk.bf16.gmra.mxu3 %vm665_vm0, %v8787_v10 }
 0x33a   : > { %v7056_v16 = vpop.f32.mrf.mxu3 }
 0x348   : > { %5204 = vmatmul.msk.bf16.vlgmr.msrb.gmra.mxu0 %vm665_vm0, %v8786_v4 }
 0x349   : > { %5214 = vmatmul.msk.bf16.vlgmr.msra.gmra.mxu3 %vm665_vm0, %v8786_v4  ;;  %2407 = vmatpush.bf16.msrb.mxu0 %v5189_v19  ;;  %v7074_v19 = vpop.f32.mrf.mxu3 }
 0x34d   : > { %2408 = vmatpush.bf16.msrb.mxu0 %v5125_v34 }
 0x351   : > { %v7087_v35 = vpop.f32.mrf.mxu3 }
 0x358   : > { %5205 = vmatmul.msk.bf16.gmra.mxu0 %vm665_vm0, %v8787_v10 }
 0x359   : > { %5215 = vmatmul.msk.bf16.gmra.mxu3 %vm665_vm0, %v8787_v10 }
 0x368   : > { %5212 = vmatmul.msk.bf16.vlgmr.msra.gmra.mxu0 %vm665_vm0, %v8786_v4 }
 0x369   : > { %5350 = vmatmul.msk.bf16.vlgmr.msrb.gmra.mxu3 %vm665_vm0, %v8788_v7  ;;  %2649 = vmatpush.bf16.msra.mxu0 %v5301_v11  ;;  %v5130_v11 = vld [vmem:[#allocation8 + $0x1c0] sm:$0xf0] }
 0x36d   : > { %2650 = vmatpush.bf16.msra.mxu0 %v5237_v9 }
 0x378   : > { %5213 = vmatmul.msk.bf16.gmra.mxu0 %vm665_vm0, %v8787_v10 }
 0x379   : > { %5351 = vmatmul.msk.bf16.gmra.mxu3 %vm665_vm0, %v8789_v23 }
 0x385   : > { %v1706_v27 = vpop.f32.mrf.mxu0 }
 0x388   : > { %5220 = vmatmul.msk.bf16.vlgmr.msrb.gmra.mxu0 %vm665_vm0, %v8786_v4 }
 0x38b   : > { %v1636_v24 = vpop.f32.mrf.mxu2 }
 0x38c   : > { %v1666_v29 = vadd.f32 %v1665_v25, %v1636_v24 }
 0x38d   : > { %v1709_v33 = vpop.f32.mrf.mxu0 }
 0x38e   : > { %v1718_v38 = vadd.f32 %v1706_v27, %v1666_v29 }
 0x390   : > { %v1729_v48 = vadd.f32 %v1727_v54, %v1718_v38  ;;  %v5718_v38 = vld [vmem:[#allocation8 + $0xcc] sm:$0xf0] }
 0x392   : > { %v5056_v51 = vmul.f32 -1.442695, %v1729_v48 }
 0x393   : > { %v1639_v49 = vpop.f32.mrf.mxu2 }
 0x394   : > { %v1669_v30 = vadd.f32 %v1668_v22, %v1639_v49  ;;  %v5304_v49 = vld [vmem:[#allocation8 + $0x90] sm:$0xf] }
 0x395   : > { %v1712_v45 = vpop.f32.mrf.mxu0 }
 0x396   : > { %v1719_v47 = vadd.f32 %v1709_v33, %v1669_v30  ;;  %v5305_v30 = vor.u32 %v5718_v38, %v5304_v49 }
 0x398   : > { %v1730_v59 = vadd.f32 %v1727_v54, %v1719_v47  ;;  %5221 = vmatmul.msk.bf16.gmra.mxu0 %vm665_vm0, %v8787_v10  ;;  %2668 = vmatpush.bf16.msra.mxu3 %v5305_v30  ;;  %v5726_v30 = vld [vmem:[#allocation8 + $0x114] sm:$0xf] }
 0x39a   : > { %v5057_v46 = vmul.f32 -1.442695, %v1730_v59 }
 0x39b   : > { %v1642_v50 = vpop.f32.mrf.mxu2 }
 0x39c   : > { %v1672_v39 = vadd.f32 %v1671_v62, %v1642_v50  ;;  %5966 = vpow2.f32 %v5057_v46  ;;  %v5240_v50 = vld [vmem:[#allocation8 + $0x10] sm:$0xf] }
 0x39d   : > { %5968 = vpow2.f32 %v5056_v51  ;;  %v1715_v2 = vpop.f32.mrf.mxu0  ;;  %v5702_v51 = vld [vmem:[#allocation8 + $0x4c] sm:$0xf0] }
 0x39e   : > { %v1720_v52 = vadd.f32 %v1712_v45, %v1672_v39 }
 0x3a0   : > { %v1731_v41 = vadd.f32 %v1727_v54, %v1720_v52  ;;  %v5241_v52 = vor.u32 %v5702_v51, %v5240_v50  ;;  %v5720_v50 = vld [vmem:[#allocation8 + $0xdc] sm:$0xf0] }
 0x3a2   : > { %v5058_v0 = vmul.f32 -1.442695, %v1731_v41  ;;  %v5967_v3 = vpop.eup %5966  ;;  %2669 = vmatpush.bf16.msra.mxu3 %v5241_v52  ;;  %v5704_v52 = vld [vmem:[#allocation8 + $0x5c] sm:$0xf0] }
 0x3a3   : > { %v1645_v1 = vpop.f32.mrf.mxu2  ;;  %v5969_v42 = vpop.eup %5968  ;;  %v7041_v6 = vadd.f32 1.0, %v5967_v3 }
 0x3a4   : > { %5970 = vpow2.f32 %v5058_v0  ;;  %v1675_v36 = vadd.f32 %v1674_v57, %v1645_v1  ;;  %v7045_v32 = vadd.f32 1.0, %v5969_v42 }
 0x3a5   : > { %5972 = vrcp.f32 %v7041_v6  ;;  %v7058_v17 = vpop.f32.mrf.mxu0  ;;  %vm1769_vm9 = vweird.f32 %v7041_v6  ;;  %v1773_v58 = vand.u32 2147483647, %v7041_v6  ;;  %v1775_v0 = vand.u32 2147483648, %v7041_v6  ;;  %5358 = vmatmul.msk.bf16.vlgmr.msra.gmra.mxu3 %vm665_vm0, %v8788_v7 }
 0x3a6   : > { %v1721_v5 = vadd.f32 %v1715_v2, %v1675_v36  ;;  %vm1754_vm13 = vweird.f32 %v7045_v32 }
 0x3a7   : > { %v1776_v61 = vor.u32 1.1754944e-38, %v1775_v0  ;;  %vm1774_vm15 = vcmp.eq.f32.partialorder %v1773_v58, 8.507059e+37  ;;  %v5728_v58 = vld [vmem:[#allocation8 + $0x124] sm:$0xf] }
 0x3a8   : > { %v1732_v8 = vadd.f32 %v1727_v54, %v1721_v5  ;;  %5356 = vmatmul.msk.bf16.vlgmr.msra.gmra.mxu0 %vm665_vm0, %v8788_v7  ;;  %v5330_v5 = vld [vmem:[#allocation8 + $0xe8] sm:$0xf0] }
 0x3aa   : > { %v5971_v26 = vpop.eup %5970  ;;  %v5059_v43 = vmul.f32 -1.442695, %v1732_v8  ;;  %v1758_v8 = vand.u32 2147483647, %v7045_v32 }
 0x3ab   : > { %v7050_v60 = vadd.f32 1.0, %v5971_v26  ;;  %v7054_v56 = vpop.eup %5972 }
 0x3ac   : > { %5974 = vpow2.f32 %v5059_v43  ;;  %v1765_v27 = vmul.f32 %v7054_v56, %v7041_v6  ;;  %vm1770_vm5 = vweird.f32 %v7054_v56  ;;  %v1760_v6 = vand.u32 2147483648, %v7045_v32 }
 0x3ad   : > { %5976 = vrcp.f32 %v7050_v60  ;;  %v7076_v22 = vpop.f32.mrf.mxu0  ;;  %vm1784_vm4 = vweird.f32 %v7050_v60  ;;  %v1790_v39 = vand.u32 2147483648, %v7050_v60  ;;  %v1788_v31 = vand.u32 2147483647, %v7050_v60  ;;  %vm7109_vm11 = vmor %vm1769_vm9, %vm1770_vm5 }
 0x3ae   : > { %5978 = vrcp.f32 %v7045_v32  ;;  %v1766_v15 = vsub.f32 1.0, %v1765_v27  ;;  %v1761_v55 = vor.u32 1.1754944e-38, %v1760_v6  ;;  %v5697_v6 = vld [vmem:[#allocation8 + $0x2c] sm:$0xf]  ;;  %vm1879_vm5 = vcmask 122880  }
 0x3af   : > { %v1791_v42 = vor.u32 1.1754944e-38, %v1790_v39  ;;  %vm1789_vm12 = vcmp.eq.f32.partialorder %v1788_v31, 8.507059e+37  ;;  %v5256_v39 = vld [vmem:[#allocation8 + $0x20] sm:$0xf]  ;;  %vm4371_vm9 = vcmask 1044352  }
 0x3b0   : > { %v1767_v47 = vmul.f32 %v7054_v56, %v1766_v15  ;;  %v5257_v31 = vor.u32 %v5704_v52, %v5256_v39  ;;  %v1836_v39 = vld [vmem:[%s8698_s7 + $0x18] sm:$0xff] }
 0x3b1   : > { %1852 = vmatpush.msrb.mxu2 %v1836_v39  ;;  %v5226_v39 = vld [vmem:[#allocation8 + $0x40] sm:$0xf0] }
 0x3b2   : > { %v5975_v20 = vpop.eup %5974  ;;  %v1768_v53 = vadd.f32 %v7054_v56, %v1767_v47 }
 0x3b3   : > { %v7060_v21 = vpop.eup %5976  ;;  %v1748_v13 = vadd.f32 1.0, %v5975_v20  ;;  %v1809_v20 = vld [vmem:[%s8697_s6] sm:$0xf] }
 0x3b4   : > { %v7062_v14 = vpop.eup %5978  ;;  %v1780_v25 = vmul.f32 %v7060_v21, %v7050_v60  ;;  %vm1785_vm1 = vweird.f32 %v7060_v21  ;;  %v1772_v26 = vsel %vm7109_vm11, %v7054_v56, %v1768_v53  ;;  %v5740_v60 = vld [vmem:[#allocation8 + $0x184] sm:$0xf]  ;;  %v7134_v56 = vpop.f32.mrf.mxu3  ;;  %vm4249_vm11 = vcmask 650752  }
 0x3b5   : > { %5980 = vrcp.f32 %v1748_v13  ;;  %v1750_v28 = vmul.f32 %v7062_v14, %v7045_v32  ;;  %v1805_v62 = vand.u32 2147483648, %v1748_v13  ;;  %vm1755_vm2 = vweird.f32 %v7062_v14  ;;  %v7089_v40 = vpop.f32.mrf.mxu0  ;;  %vm7093_vm7 = vmor %vm1784_vm4, %vm1785_vm1  ;;  %5359 = vmatmul.msk.bf16.gmra.mxu3 %vm665_vm0, %v8789_v23  ;;  %v5744_v53 = vld [vmem:[#allocation8 + $0x1a4] sm:$0xf] }
 0x3b6   : > { %v1781_v24 = vsub.f32 1.0, %v1780_v25  ;;  %v1803_v45 = vand.u32 2147483647, %v1748_v13  ;;  %vm1799_vm6 = vweird.f32 %v1748_v13  ;;  %vm7123_vm14 = vmor %vm1754_vm13, %vm1755_vm2  ;;  %v1777_v32 = vsel %vm1774_vm15, %v1776_v61, %v1772_v26  ;;  %v5314_v25 = vld [vmem:[#allocation8 + $0xd8] sm:$0xf0] }
 0x3b7   : > { %v1751_v33 = vsub.f32 1.0, %v1750_v28  ;;  %v1806_v57 = vor.u32 1.1754944e-38, %v1805_v62  ;;  %vm1759_vm1 = vcmp.eq.f32.partialorder %v1758_v8, 8.507059e+37  ;;  %v5724_v28 = vld [vmem:[#allocation8 + $0x104] sm:$0xf]  ;;  %vm1873_vm2 = vcmask 31744  }
 0x3b8   : > { %v1782_v29 = vmul.f32 %v7060_v21, %v1781_v24  ;;  %vm1804_vm10 = vcmp.eq.f32.partialorder %v1803_v45, 8.507059e+37  ;;  %5357 = vmatmul.msk.bf16.gmra.mxu0 %vm665_vm0, %v8789_v23  ;;  %v5066_v24 = vld [vmem:[#allocation8 + $0x140] sm:$0xf0]  ;;  %v5266_v26 = vld [vmem:[#allocation8 + $0x68] sm:$0xf0]  ;;  %vm1877_vm4 = vcmask 97280  }
 0x3b9   : > { %v1752_v48 = vmul.f32 %v7062_v14, %v1751_v33  ;;  %v5069_v33 = vor.u32 %v5724_v28, %v5066_v24  ;;  %v5746_v28 = vld [vmem:[#allocation8 + $0x1b4] sm:$0xf] }
 0x3ba   : > { %v1783_v46 = vadd.f32 %v7060_v21, %v1782_v29  ;;  %v5250_v29 = vld [vmem:[#allocation8 + $0x58] sm:$0xf0]  ;;  %v5178_v24 = vld [vmem:[#allocation8 + $0x1f0] sm:$0xf0] }
 0x3bb   : > { %v5981_v18 = vpop.eup %5980  ;;  %v1753_v3 = vadd.f32 %v7062_v14, %v1752_v48 }
 0x3bc   : > { %v1795_v34 = vmul.f32 %v5981_v18, %v1748_v13  ;;  %vm1800_vm3 = vweird.f32 %v5981_v18  ;;  %v1787_v2 = vsel %vm7093_vm7, %v7060_v21, %v1783_v46  ;;  %v5133_v21 = vor.u32 %v5740_v60, %v5130_v11  ;;  %v5711_v13 = vld [vmem:[#allocation8 + $0x9c] sm:$0xf]  ;;  %v7140_v47 = vpop.f32.mrf.mxu3  ;;  %v5320_v46 = vld [vmem:[#allocation8 + $0xa0] sm:$0xf] }
 0x3bd   : > { %vm1801_vm8 = vmor %vm1799_vm6, %vm1800_vm3  ;;  %v1792_v43 = vsel %vm1789_vm12, %v1791_v42, %v1787_v2  ;;  %v1757_v12 = vsel %vm7123_vm14, %v7062_v14, %v1753_v3  ;;  %v7132_v9 = vpop.f32.mrf.mxu0  ;;  %v5317_v15 = vor.u32 %v5711_v13, %v5314_v25  ;;  %v5742_v14 = vld [vmem:[#allocation8 + $0x194] sm:$0xf]  ;;  %v5321_v51 = vor.u32 %v5720_v50, %v5320_v46  ;;  %v5713_v42 = vld [vmem:[#allocation8 + $0xac] sm:$0xf] }
 0x3be   : > { %v1796_v54 = vsub.f32 1.0, %v1795_v34  ;;  %v1762_v27 = vsel %vm1759_vm1, %v1761_v55, %v1757_v12  ;;  %v5695_v34 = vld [vmem:[#allocation8 + $0x1c] sm:$0xf]  ;;  %v5333_v8 = vor.u32 %v5713_v42, %v5330_v5  ;;  %v5336_v12 = vld [vmem:[#allocation8 + $0xb0] sm:$0xf]  ;;  %vm1875_vm3 = vcmask 64512  }
 0x3bf   : > { %2725 = vmatpush.bf16.msrb.mxu0 %v5317_v15  ;;  %v5253_v38 = vor.u32 %v5695_v34, %v5250_v29  ;;  %2744 = vmatpush.bf16.msrb.mxu3 %v5321_v51  ;;  %v5730_v15 = vld [vmem:[#allocation8 + $0x134] sm:$0xf]  ;;  %vm4289_vm6 = vcmask 781952   ;;  %vm4206_vm7 = vcmask 519552   ;;  %vm4330_vm12 = vcmask 913152  }
 0x3c0   : > { %v1797_v59 = vmul.f32 %v5981_v18, %v1796_v54  ;;  %v5082_v54 = vld [vmem:[#allocation8 + $0x150] sm:$0xf0] }
 0x3c1   : > { %v5085_v48 = vor.u32 %v5726_v30, %v5082_v54  ;;  %v5699_v54 = vld [vmem:[#allocation8 + $0x3c] sm:$0xf] }
 0x3c2   : > { %v1798_v44 = vadd.f32 %v5981_v18, %v1797_v59 }
 0x3c3   : > { %2726 = vmatpush.bf16.msrb.mxu0 %v5253_v38  ;;  %2745 = vmatpush.bf16.msrb.mxu3 %v5257_v31  ;;  %v5346_v38 = vld [vmem:[#allocation8 + $0xf8] sm:$0xf0] }
 0x3c4   : > { %v1802_v1 = vsel %vm1801_vm8, %v5981_v18, %v1798_v44  ;;  %v5146_v18 = vld [vmem:[#allocation8 + $0x1d0] sm:$0xf0]  ;;  %v7150_v59 = vpop.f32.mrf.mxu3  ;;  %vm4123_vm8 = vcmask 257152  }
 0x3c5   : > { %v1807_v36 = vsel %vm1804_vm10, %v1806_v57, %v1802_v1  ;;  %v5149_v49 = vor.u32 %v5742_v14, %v5146_v18  ;;  %v7142_v62 = vpop.f32.mrf.mxu0  ;;  %v5162_v57 = vld [vmem:[#allocation8 + $0x1e0] sm:$0xf0]  ;;  %v5181_v14 = vor.u32 %v5746_v28, %v5178_v24  ;;  %v5114_v18 = vld [vmem:[#allocation8 + $0x170] sm:$0xf0]  ;;  %v5072_v24 = vld [vmem:[#allocation8 + $0x108] sm:$0xf] }
 0x3c6   : > { %1825 = vmatpush.msrb.mxu1 %v1807_v36  ;;  %v5165_v0 = vor.u32 %v5744_v53, %v5162_v57  ;;  %v5098_v1 = vld [vmem:[#allocation8 + $0x160] sm:$0xf0]  ;;  %5366 = vmatmul.msk.bf16.vlgmr.msrb.gmra.mxu3 %vm665_vm0, %v8788_v7  ;;  %v5448_v53 = vld [vmem:[#allocation8 + $0x280] sm:$0xf]  ;;  %vm4165_vm10 = vcmask 388352  }
 0x3c7   : > { %v5101_v2 = vor.u32 %v5728_v58, %v5098_v1  ;;  %2801 = vmatpush.bf16.msra.mxu0 %v5333_v8  ;;  %v5780_v57 = vld [vmem:[#allocation8 + $0x2bc] sm:$0xf0]  ;;  %v1835_v8 = vld [vmem:[%s8698_s7 + $0x10] sm:$0xff]  ;;  %v5290_v28 = vld [vmem:[#allocation8 + $0xc0] sm:$0xf0] }
 0x3c8   : > { %1826 = vmatpush.msrb.mxu1 %v1792_v43  ;;  %5364 = vmatmul.msk.bf16.vlgmr.msrb.gmra.mxu0 %vm665_vm0, %v8788_v7  ;;  %v5269_v43 = vor.u32 %v5697_v6, %v5266_v26  ;;  %v5449_v58 = vor.u32 %v5780_v57, %v5448_v53  ;;  %v5764_v1 = vld [vmem:[#allocation8 + $0x23c] sm:$0xf0]  ;;  %v1834_v6 = vld [vmem:[%s8698_s7 + $0x8] sm:$0xff]  ;;  %v8808_v26 = vld [vmem:[#allocation31_spill] sm:$0xff] }
 0x3c9   : > { %1853 = vmatpush.msrb.mxu2 %v1835_v8  ;;  %v5464_v8 = vld [vmem:[#allocation8 + $0x290] sm:$0xf] }
 0x3ca   : > { %1827 = vmatpush.msrb.mxu1 %v1777_v32  ;;  %v5722_v32 = vld [vmem:[#allocation8 + $0xec] sm:$0xf0] }
 0x3cb   : > { %2802 = vmatpush.bf16.msra.mxu0 %v5269_v43  ;;  %v5337_v55 = vor.u32 %v5722_v32, %v5336_v12  ;;  %1854 = vmatpush.msrb.mxu2 %v1834_v6  ;;  %v1833_v12 = vld [vmem:[%s8698_s7] sm:$0xff]  ;;  %v5136_v32 = vld [vmem:[#allocation8 + $0x188] sm:$0xf]  ;;  %v5782_v6 = vld [vmem:[#allocation8 + $0x2cc] sm:$0xf0] }
 0x3cc   : > { %1828 = vmatpush.msrb.mxu1 %v1762_v27  ;;  %v7154_v44 = vpop.f32.mrf.mxu3 }
 0x3cd   : > { %5060 = vmatmul.msk.f32.vlgmr.msrb.gmra.mxu1 %vm665_vm0, %v1809_v20  ;;  %v7152_v45 = vpop.f32.mrf.mxu0  ;;  %2820 = vmatpush.bf16.msra.mxu3 %v5337_v55  ;;  %v5272_v20 = vld [vmem:[#allocation8 + $0x30] sm:$0xf]  ;;  %v5749_v55 = vld [vmem:[#allocation8 + $0x1c4] sm:$0xf0] }
 0x3ce   : > { %2141 = vmatpush.bf16.msra.mxu1 %v5133_v21  ;;  %v5706_v21 = vld [vmem:[#allocation8 + $0x6c] sm:$0xf0]  ;;  %1855 = vmatpush.msrb.mxu2 %v1833_v12  ;;  %v5465_v12 = vor.u32 %v5782_v6, %v5464_v8 }
 0x3cf   : > { %v5273_v27 = vor.u32 %v5706_v21, %v5272_v20  ;;  %v5137_v21 = vor.u32 %v5749_v55, %v5136_v32  ;;  %v5400_v32 = vld [vmem:[#allocation8 + $0x210] sm:$0xf] }
 0x3d0   : > { %v5766_v55 = vld [vmem:[#allocation8 + $0x24c] sm:$0xf0] }
 0x3d1   : > { %2821 = vmatpush.bf16.msra.mxu3 %v5273_v27  ;;  %v5708_v27 = vld [vmem:[#allocation8 + $0x84] sm:$0xf]  ;;  %2160 = vmatpush.bf16.msra.mxu2 %v5137_v21  ;;  %v5401_v21 = vor.u32 %v5766_v55, %v5400_v32  ;;  %v5410_v32 = vld [vmem:[#allocation8 + $0x258] sm:$0xf0]  ;;  %v5694_v55 = vld [vmem:[#allocation8 + $0x14] sm:$0xf] }
 0x3d2   : > { %2142 = vmatpush.bf16.msra.mxu1 %v5069_v33  ;;  %v5117_v33 = vor.u32 %v5730_v15, %v5114_v18  ;;  %v5293_v15 = vor.u32 %v5708_v27, %v5290_v28  ;;  %v5773_v18 = vld [vmem:[#allocation8 + $0x28c] sm:$0xf] }
 0x3d4   : > { %v7166_v36 = vpop.f32.mrf.mxu3 }
 0x3d5   : > { %5192 = vmatmul.msk.bf16.vlgmr.msra.gmra.mxu1 %vm665_vm0, %v8786_v4  ;;  %v7156_v41 = vpop.f32.mrf.mxu0  ;;  %8796 = vst [vmem:[#allocation41_spill] sm:$0xff] %v7166_v36  ;;  %3097 = vmatpush.bf16.msrb.mxu3 %v5449_v58  ;;  %v5490_v36 = vld [vmem:[#allocation8 + $0x2e8] sm:$0xf0] }
 0x3d6   : > { %2217 = vmatpush.bf16.msrb.mxu1 %v5149_v49  ;;  %5367 = vmatmul.msk.bf16.gmra.mxu3 %vm665_vm0, %v8789_v23  ;;  %v5715_v49 = vld [vmem:[#allocation8 + $0xbc] sm:$0xf] }
 0x3d7   : > { %v5349_v30 = vor.u32 %v5715_v49, %v5346_v38 }
 0x3d8   : > { %5365 = vmatmul.msk.bf16.gmra.mxu0 %vm665_vm0, %v8789_v23 }
 0x3d9   : > { %2877 = vmatpush.bf16.msrb.mxu0 %v5349_v30  ;;  %v5757_v30 = vld [vmem:[#allocation8 + $0x20c] sm:$0xf] }
 0x3da   : > { %2218 = vmatpush.bf16.msrb.mxu1 %v5085_v48  ;;  %v5282_v48 = vld [vmem:[#allocation8 + $0x78] sm:$0xf0] }
 0x3db   : > { %v5285_v46 = vor.u32 %v5699_v54, %v5282_v48  ;;  %v5394_v54 = vld [vmem:[#allocation8 + $0x248] sm:$0xf0] }
 0x3dc   : > { %v7168_v61 = vpop.f32.mrf.mxu3  ;;  %v5397_v48 = vor.u32 %v5757_v30, %v5394_v54  ;;  %v5088_v30 = vld [vmem:[#allocation8 + $0x118] sm:$0xf] }
 0x3dd   : > { %v7164_v3 = vpop.f32.mrf.mxu0  ;;  %8797 = vst [vmem:[#allocation35_spill] sm:$0xff] %v7168_v61  ;;  %2878 = vmatpush.bf16.msrb.mxu0 %v5285_v46  ;;  %v5692_v46 = vld [vmem:[#allocation8 + $0x4] sm:$0xf]  ;;  %v5735_v54 = vld [vmem:[#allocation8 + $0x154] sm:$0xf0] }
 0x3de   : > { %2293 = vmatpush.bf16.msra.mxu1 %v5165_v0  ;;  %v5384_v0 = vld [vmem:[#allocation8 + $0x200] sm:$0xf]  ;;  %v5229_v53 = vor.u32 %v5692_v46, %v5226_v39  ;;  %v5775_v39 = vld [vmem:[#allocation8 + $0x29c] sm:$0xf]  ;;  %v5089_v8 = vor.u32 %v5735_v54, %v5088_v30 }
 0x3df   : > { %v5385_v5 = vor.u32 %v5764_v1, %v5384_v0  ;;  %v8810_v0 = vld [vmem:[#allocation32_spill] sm:$0xff] }
 0x3e0   : > { %v5480_v54 = vld [vmem:[#allocation8 + $0x2a0] sm:$0xf] }
 0x3e1   : > { %3098 = vmatpush.bf16.msrb.mxu3 %v5385_v5 }
 0x3e2   : > { %2294 = vmatpush.bf16.msra.mxu1 %v5101_v2 }
 0x3e4   : > { %v7178_v60 = vpop.f32.mrf.mxu3 }
 0x3e5   : > { %5193 = vmatmul.msk.bf16.gmra.mxu1 %vm665_vm0, %v8787_v10  ;;  %v7170_v37 = vpop.f32.mrf.mxu0  ;;  %8799 = vst [vmem:[#allocation36_spill] sm:$0xff] %v7178_v60 }
 0x3e6   : > { %8798 = vst [vmem:[#allocation39_spill] sm:$0xff] %v7170_v37  ;;  %5374 = vmatmul.msk.bf16.vlgmr.msra.gmra.mxu3 %vm665_vm0, %v8788_v7  ;;  %v5442_v37 = vld [vmem:[#allocation8 + $0x278] sm:$0xf0] }
 0x3e7   : > { %3173 = vmatpush.bf16.msra.mxu3 %v5465_v12  ;;  %v5759_v12 = vld [vmem:[#allocation8 + $0x21c] sm:$0xf] }
 0x3e8   : > { %5372 = vmatmul.msk.bf16.vlgmr.msra.gmra.mxu0 %vm665_vm0, %v8788_v7 }
 0x3eb   : > { %3174 = vmatpush.bf16.msra.mxu3 %v5401_v21  ;;  %v5242_v21 = vld [vmem:[#allocation8 + $0x50] sm:$0xf0] }
 0x3ec   : > { %v7182_v13 = vpop.f32.mrf.mxu3 }
 0x3ed   : > { %v7180_v11 = vpop.f32.mrf.mxu0  ;;  %8800 = vst [vmem:[#allocation40_spill] sm:$0xff] %v7182_v13  ;;  %v5761_v13 = vld [vmem:[#allocation8 + $0x22c] sm:$0xf] }
 0x3f4   : > { %v7194_v29 = vpop.f32.mrf.mxu3 }
 0x3f5   : > { %5200 = vmatmul.msk.bf16.vlgmr.msrb.gmra.mxu1 %vm665_vm0, %v8786_v4  ;;  %v7184_v25 = vpop.f32.mrf.mxu0  ;;  %8801 = vst [vmem:[#allocation33_spill] sm:$0xff] %v7194_v29  ;;  %v5413_v29 = vor.u32 %v5759_v12, %v5410_v32 }
 0x3f6   : > { %2369 = vmatpush.bf16.msrb.mxu1 %v5181_v14  ;;  %5375 = vmatmul.msk.bf16.gmra.mxu3 %vm665_vm0, %v8789_v23  ;;  %v5733_v14 = vld [vmem:[#allocation8 + $0x144] sm:$0xf0] }
 0x3f7   : > { %v5073_v49 = vor.u32 %v5733_v14, %v5072_v24  ;;  %v5751_v14 = vld [vmem:[#allocation8 + $0x1d4] sm:$0xf0] }
 0x3f8   : > { %5373 = vmatmul.msk.bf16.gmra.mxu0 %vm665_vm0, %v8789_v23 }
 0x3f9   : > { %2161 = vmatpush.bf16.msra.mxu2 %v5073_v49 }
 0x3fa   : > { %2370 = vmatpush.bf16.msrb.mxu1 %v5117_v33  ;;  %v5458_v33 = vld [vmem:[#allocation8 + $0x2c8] sm:$0xf0] }
 0x3fb   : > { %v5461_v38 = vor.u32 %v5773_v18, %v5458_v33  ;;  %v5710_v18 = vld [vmem:[#allocation8 + $0x94] sm:$0xf] }
 0x3fc   : > { %v7196_v50 = vpop.f32.mrf.mxu3 }
 0x3fd   : > { %v7192_v34 = vpop.f32.mrf.mxu0  ;;  %8802 = vst [vmem:[#allocation37_spill] sm:$0xff] %v7196_v50  ;;  %3154 = vmatpush.bf16.msra.mxu0 %v5461_v38  ;;  %v5306_v38 = vld [vmem:[#allocation8 + $0xd0] sm:$0xf0] }
 0x3fe   : > { %v5309_v46 = vor.u32 %v5710_v18, %v5306_v38 }
 0x401   : > { %3155 = vmatpush.bf16.msra.mxu0 %v5397_v48 }
 0x404   : > { %v7209_v52 = vpop.f32.mrf.mxu3 }
 0x405   : > { %5201 = vmatmul.msk.bf16.gmra.mxu1 %vm665_vm0, %v8787_v10  ;;  %v7198_v51 = vpop.f32.mrf.mxu0  ;;  %8804 = vst [vmem:[#allocation38_spill] sm:$0xff] %v7209_v52 }
 0x406   : > { %8803 = vst [vmem:[#allocation34_spill] sm:$0xff] %v7198_v51  ;;  %5510 = vmatmul.msk.bf16.vlgmr.msrb.gmra.mxu3 %vm665_vm0, %v8808_v26  ;;  %v5696_v51 = vld [vmem:[#allocation8 + $0x24] sm:$0xf] }
 0x408   : > { %5380 = vmatmul.msk.bf16.vlgmr.msrb.gmra.mxu0 %vm665_vm0, %v8788_v7 }
 0x40c   : > { %v7213_v2 = vpop.f32.mrf.mxu3 }
 0x40d   : > { %v7211_v31 = vpop.f32.mrf.mxu0  ;;  %8806 = vst [vmem:[#allocation28_spill] sm:$0xff] %v7213_v2  ;;  %v5777_v2 = vld [vmem:[#allocation8 + $0x2ac] sm:$0xf] }
 0x40e   : > { %8805 = vst [vmem:[#allocation27_spill] sm:$0xff] %v7211_v31  ;;  %v5493_v60 = vor.u32 %v5777_v2, %v5490_v36  ;;  %v5258_v31 = vld [vmem:[#allocation8 + $0x60] sm:$0xf0]  ;;  %v5770_v2 = vld [vmem:[#allocation8 + $0x26c] sm:$0xf0] }
 0x414   : > { %v7234_v20 = vpop.f32.mrf.mxu3 }
 0x415   : > { %5208 = vmatmul.msk.bf16.vlgmr.msra.gmra.mxu1 %vm665_vm0, %v8786_v4  ;;  %v7215_v42 = vpop.f32.mrf.mxu0 }
 0x416   : > { %8807 = vst [vmem:[#allocation29_spill] sm:$0xff] %v7215_v42  ;;  %2611 = vmatpush.bf16.msra.mxu1 %v5293_v15  ;;  %5511 = vmatmul.msk.bf16.gmra.mxu3 %vm665_vm0, %v8810_v0  ;;  %v5152_v15 = vld [vmem:[#allocation8 + $0x198] sm:$0xf] }
 0x417   : > { %v5153_v49 = vor.u32 %v5751_v14, %v5152_v15 }
 0x418   : > { %5381 = vmatmul.msk.bf16.gmra.mxu0 %vm665_vm0, %v8789_v23 }
 0x41a   : > { %2612 = vmatpush.bf16.msra.mxu1 %v5229_v53  ;;  %v5474_v53 = vld [vmem:[#allocation8 + $0x2d8] sm:$0xf0] }
 0x41b   : > { %v5477_v6 = vor.u32 %v5775_v39, %v5474_v53  ;;  %v5768_v53 = vld [vmem:[#allocation8 + $0x25c] sm:$0xf0] }
 0x41c   : > { %v7236_v57 = vpop.f32.mrf.mxu3 }
 0x41d   : > { %v7229_v43 = vpop.f32.mrf.mxu0  ;;  %3230 = vmatpush.bf16.msrb.mxu0 %v5477_v6 }
 0x41e   : > { %8809 = vst [vmem:[#allocation30_spill] sm:$0xff] %v7229_v43 }
 0x421   : > { %3231 = vmatpush.bf16.msrb.mxu0 %v5413_v29  ;;  %v5416_v29 = vld [vmem:[#allocation8 + $0x220] sm:$0xf] }
 0x424   : > { %v7246_v1 = vpop.f32.mrf.mxu3 }
 0x425   : > { %5209 = vmatmul.msk.bf16.gmra.mxu1 %vm665_vm0, %v8787_v10  ;;  %v7238_v58 = vpop.f32.mrf.mxu0 }
 0x426   : > { %5518 = vmatmul.msk.bf16.vlgmr.msra.gmra.mxu3 %vm665_vm0, %v8808_v26 }
 0x428   : > { %5516 = vmatmul.msk.bf16.vlgmr.msra.gmra.mxu0 %vm665_vm0, %v8808_v26 }
 0x429   : > { %3306 = vmatpush.bf16.msra.mxu0 %v5493_v60 }
 0x42c   : > { %v7250_v27 = vpop.f32.mrf.mxu3 }
 0x42d   : > { %v7248_v5 = vpop.f32.mrf.mxu0 }
 0x434   : > { %v7263_v48 = vpop.f32.mrf.mxu3 }
 0x435   : > { %5216 = vmatmul.msk.bf16.vlgmr.msrb.gmra.mxu1 %vm665_vm0, %v8786_v4  ;;  %v7252_v28 = vpop.f32.mrf.mxu0 }
 0x436   : > { %2687 = vmatpush.bf16.msrb.mxu1 %v5309_v46  ;;  %5519 = vmatmul.msk.bf16.gmra.mxu3 %vm665_vm0, %v8810_v0  ;;  %v5784_v46 = vld [vmem:[#allocation8 + $0x2dc] sm:$0xf0] }
 0x437   : > { %v5481_v39 = vor.u32 %v5784_v46, %v5480_v54  ;;  %v5712_v54 = vld [vmem:[#allocation8 + $0xa4] sm:$0xf] }
 0x438   : > { %5517 = vmatmul.msk.bf16.gmra.mxu0 %vm665_vm0, %v8810_v0 }
 0x439   : > { %3249 = vmatpush.bf16.msrb.mxu3 %v5481_v39 }
 0x43c   : > { %v7271_v18 = vpop.f32.mrf.mxu3 }
 0x43d   : > { %v7260_v33 = vpop.f32.mrf.mxu0 }
 0x444   : > { %v7283_v30 = vpop.f32.mrf.mxu3 }
 0x445   : > { %5217 = vmatmul.msk.bf16.gmra.mxu1 %vm665_vm0, %v8787_v10  ;;  %v7267_v14 = vpop.f32.mrf.mxu0 }
 0x448   : > { %5524 = vmatmul.msk.bf16.vlgmr.msrb.gmra.mxu0 %vm665_vm0, %v8808_v26 }
 0x44a   : > { %v1830_v24 = vpop.f32.mrf.mxu1 }
 0x44b   : > { %5061 = vmatmul.msk.f32.vlgmr.msrb.gmra.mxu2 %vm665_vm0, %v1830_v24  ;;  %v5245_v24 = vor.u32 %v5694_v55, %v5242_v21  ;;  %v5168_v21 = vld [vmem:[#allocation8 + $0x1a8] sm:$0xf] }
 0x44c   : > { %2236 = vmatpush.bf16.msrb.mxu2 %v5153_v49  ;;  %v7291_v32 = vpop.f32.mrf.mxu3 }
 0x44d   : > { %2688 = vmatpush.bf16.msrb.mxu1 %v5245_v24  ;;  %v7281_v38 = vpop.f32.mrf.mxu0  ;;  %v5753_v24 = vld [vmem:[#allocation8 + $0x1e4] sm:$0xf0] }
 0x44e   : > { %v5169_v39 = vor.u32 %v5753_v24, %v5168_v21  ;;  %v5261_v21 = vor.u32 %v5696_v51, %v5258_v31  ;;  %v5786_v51 = vld [vmem:[#allocation8 + $0x2ec] sm:$0xf0] }
 0x44f   : > { %v5432_v31 = vld [vmem:[#allocation8 + $0x230] sm:$0xf] }
 0x450   : > { %2237 = vmatpush.bf16.msrb.mxu2 %v5089_v8  ;;  %v5417_v8 = vor.u32 %v5768_v53, %v5416_v29  ;;  %v5322_v29 = vld [vmem:[#allocation8 + $0xe0] sm:$0xf0]  ;;  %v5104_v53 = vld [vmem:[#allocation8 + $0x128] sm:$0xf] }
 0x451   : > { %v5325_v52 = vor.u32 %v5712_v54, %v5322_v29 }
 0x452   : > { %v7265_v15 = vpop.f32.mrf.mxu1  ;;  %3250 = vmatpush.bf16.msrb.mxu3 %v5417_v8  ;;  %v5737_v8 = vld [vmem:[#allocation8 + $0x164] sm:$0xf0] }
 0x453   : > { %5194 = vmatmul.msk.bf16.vlgmr.msra.gmra.mxu2 %vm665_vm0, %v8786_v4  ;;  %v5105_v61 = vor.u32 %v5737_v8, %v5104_v53  ;;  %v5184_v8 = vld [vmem:[#allocation8 + $0x1b8] sm:$0xf] }
 0x454   : > { %v7303_v50 = vpop.f32.mrf.mxu3  ;;  %2312 = vmatpush.bf16.msra.mxu2 %v5169_v39 }
 0x455   : > { %5352 = vmatmul.msk.bf16.vlgmr.msra.gmra.mxu1 %vm665_vm0, %v8788_v7  ;;  %v7287_v12 = vpop.f32.mrf.mxu0  ;;  %5526 = vmatmul.msk.bf16.vlgmr.msrb.gmra.mxu3 %vm665_vm0, %v8808_v26  ;;  %8813 = vst [vmem:[#allocation42_spill] sm:$0xff] %v7303_v50  ;;  %v5739_v50 = vld [vmem:[#allocation8 + $0x174] sm:$0xf0] }
 0x456   : > { %2763 = vmatpush.bf16.msra.mxu1 %v5325_v52 }
 0x458   : > { %5525 = vmatmul.msk.bf16.gmra.mxu0 %vm665_vm0, %v8810_v0  ;;  %2313 = vmatpush.bf16.msra.mxu2 %v5105_v61 }
 0x45a   : > { %v7279_v49 = vpop.f32.mrf.mxu1  ;;  %2764 = vmatpush.bf16.msra.mxu1 %v5261_v21  ;;  %v5755_v21 = vld [vmem:[#allocation8 + $0x1f4] sm:$0xf0] }
 0x45c   : > { %v7311_v54 = vpop.f32.mrf.mxu3 }
 0x45d   : > { %v7301_v46 = vpop.f32.mrf.mxu0  ;;  %8816 = vst [vmem:[#allocation45_spill] sm:$0xff] %v7311_v54 }
 0x462   : > { %v7285_v6 = vpop.f32.mrf.mxu1 }
 0x463   : > { %8811 = vst [vmem:[#allocation31_spill] sm:$0xff] %v7285_v6  ;;  %5195 = vmatmul.msk.bf16.gmra.mxu2 %vm665_vm0, %v8787_v10 }
 0x464   : > { %v7323_v60 = vpop.f32.mrf.mxu3 }
 0x465   : > { %5353 = vmatmul.msk.bf16.gmra.mxu1 %vm665_vm0, %v8789_v23  ;;  %v7307_v6 = vpop.f32.mrf.mxu0  ;;  %5527 = vmatmul.msk.bf16.gmra.mxu3 %vm665_vm0, %v8810_v0  ;;  %8818 = vst [vmem:[#allocation47_spill] sm:$0xff] %v7323_v60 }
 0x466   : > { %8815 = vst [vmem:[#allocation44_spill] sm:$0xff] %v7307_v6  ;;  %v5763_v6 = vld [vmem:[#allocation8 + $0x23c] sm:$0xf] }
 0x46a   : > { %v7299_v55 = vpop.f32.mrf.mxu1 }
 0x46b   : > { %8812 = vst [vmem:[#allocation32_spill] sm:$0xff] %v7299_v55  ;;  %v5426_v55 = vld [vmem:[#allocation8 + $0x268] sm:$0xf0] }
 0x46c   : > { %v5429_v42 = vor.u32 %v5761_v13, %v5426_v55  ;;  %v5496_v13 = vld [vmem:[#allocation8 + $0x2b0] sm:$0xf]  ;;  %v7331_v29 = vpop.f32.mrf.mxu3 }
 0x46d   : > { %v7321_v61 = vpop.f32.mrf.mxu0  ;;  %v5497_v52 = vor.u32 %v5786_v51, %v5496_v13  ;;  %8820 = vst [vmem:[#allocation49_spill] sm:$0xff] %v7331_v29  ;;  %v5714_v13 = vld [vmem:[#allocation8 + $0xb4] sm:$0xf]  ;;  %v4087_v51 = vlaneseq }
 0x46e   : > { %3307 = vmatpush.bf16.msra.mxu0 %v5429_v42  ;;  %v5433_v42 = vor.u32 %v5770_v2, %v5432_v31  ;;  %v5185_v31 = vor.u32 %v5755_v21, %v5184_v8  ;;  %v5338_v2 = vld [vmem:[#allocation8 + $0xf0] sm:$0xf0] }
 0x46f   : > { %3325 = vmatpush.bf16.msra.mxu3 %v5497_v52  ;;  %v5341_v60 = vor.u32 %v5714_v13, %v5338_v2  ;;  %v7345_v29 = vand.u32 127, %v4087_v51  ;;  %v5698_v8 = vld [vmem:[#allocation8 + $0x34] sm:$0xf]  ;;  %v5445_v13 = vor.u32 %v5763_v6, %v5442_v37 }
 0x470   : > { %v5274_v21 = vld [vmem:[#allocation8 + $0x70] sm:$0xf0] }
 0x471   : > { %5532 = vmatmul.msk.bf16.vlgmr.msra.gmra.mxu0 %vm665_vm0, %v8808_v26  ;;  %8823 = vst [vmem:[#allocation52_spill] sm:$0xff] %v7345_v29  ;;  %v7348_v43 = vcvt.s32.f32 %v7345_v29  ;;  %v5772_v29 = vld [vmem:[#allocation8 + $0x284] sm:$0xf] }
 0x472   : > { %v7305_v24 = vpop.f32.mrf.mxu1 }
 0x473   : > { %8814 = vst [vmem:[#allocation43_spill] sm:$0xff] %v7305_v24  ;;  %5202 = vmatmul.msk.bf16.vlgmr.msrb.gmra.mxu2 %vm665_vm0, %v8786_v4  ;;  %3326 = vmatpush.bf16.msra.mxu3 %v5433_v42  ;;  %v5120_v42 = vld [vmem:[#allocation8 + $0x138] sm:$0xf]  ;;  %v5779_v24 = vld [vmem:[#allocation8 + $0x2bc] sm:$0xf] }
 0x474   : > { %v7343_v54 = vpop.f32.mrf.mxu3  ;;  %2388 = vmatpush.bf16.msrb.mxu2 %v5185_v31  ;;  %8824 = vst [vmem:[#allocation53_spill] sm:$0xff] %v7348_v43  ;;  %4154 = vrot.lane.b32.xlu1 %v7348_v43, %s8737_s10  ;;  %s4713_s10 = scalar_lea.sflag [#allocation5], %s7582_s2 }
 0x475   : > { %5360 = vmatmul.msk.bf16.vlgmr.msrb.gmra.mxu1 %vm665_vm0, %v8788_v7  ;;  %v7327_v39 = vpop.f32.mrf.mxu0  ;;  %8822 = vst [vmem:[#allocation51_spill] sm:$0xff] %v7343_v54  ;;  %4360 = vrot.lane.b32.xlu2 %v7348_v43, %s8739_s22  ;;  %v5232_v54 = vld [vmem:[#allocation8 + $0x8] sm:$0xf] }
 0x476   : > { %5534 = vmatmul.msk.bf16.vlgmr.msra.gmra.mxu3 %vm665_vm0, %v8808_v26  ;;  %2839 = vmatpush.bf16.msrb.mxu1 %v5341_v60 }
 0x477   : > { %4279 = vrot.lane.b32.xlu0 %v7348_v43, %s6343_s16 }
 0x47a   : > { %v7319_v36 = vpop.f32.mrf.mxu1 }
 0x47b   : > { %8817 = vst [vmem:[#allocation46_spill] sm:$0xff] %v7319_v36  ;;  %v5506_v36 = vld [vmem:[#allocation8 + $0x2f8] sm:$0xf0] }
 0x47c   : > { %v7362_v60 = vpop.f32.mrf.mxu3  ;;  %4195 = vrot.lane.b32.xlu1 %v7348_v43, %s6347_s15 }
 0x47d   : > { %v7341_v52 = vpop.f32.mrf.mxu0  ;;  %8827 = vst [vmem:[#allocation56_spill] sm:$0xff] %v7362_v60  ;;  %4401 = vrot.lane.b32.xlu2 %v7348_v43, %s6348_s14  ;;  %v5701_v60 = vld [vmem:[#allocation8 + $0x44] sm:$0xf0] }
 0x481   : > { %5533 = vmatmul.msk.bf16.gmra.mxu0 %vm665_vm0, %v8810_v0 }
 0x482   : > { %v7325_v55 = vpop.f32.mrf.mxu1 }
 0x483   : > { %8819 = vst [vmem:[#allocation48_spill] sm:$0xff] %v7325_v55  ;;  %5203 = vmatmul.msk.bf16.gmra.mxu2 %vm665_vm0, %v8787_v10  ;;  %v5121_v55 = vor.u32 %v5739_v50, %v5120_v42  ;;  %v5277_v50 = vor.u32 %v5698_v8, %v5274_v21  ;;  %v5296_v42 = vld [vmem:[#allocation8 + $0x88] sm:$0xf] }
 0x484   : > { %4236 = vrot.lane.b32.xlu1 %v7348_v43, %s8735_s23  ;;  %v5717_v8 = vld [vmem:[#allocation8 + $0xc4] sm:$0xf0] }
 0x485   : > { %5361 = vmatmul.msk.bf16.gmra.mxu1 %vm665_vm0, %v8789_v23  ;;  %2389 = vmatpush.bf16.msrb.mxu2 %v5121_v55  ;;  %v7378_v55 = vpop.f32.mrf.mxu3 }
 0x486   : > { %2840 = vmatpush.bf16.msrb.mxu1 %v5277_v50  ;;  %5535 = vmatmul.msk.bf16.gmra.mxu3 %vm665_vm0, %v8810_v0  ;;  %8829 = vst [vmem:[#allocation58_spill] sm:$0xff] %v7378_v55  ;;  %v5233_v55 = vor.u32 %v5701_v60, %v5232_v54 }
 0x48a   : > { %v7339_v53 = vpop.f32.mrf.mxu1 }
 0x48b   : > { %8821 = vst [vmem:[#allocation50_spill] sm:$0xff] %v7339_v53  ;;  %v5509_v53 = vor.u32 %v5779_v24, %v5506_v36  ;;  %v7358_v36 = vpop.f32.mrf.mxu0 }
 0x48c   : > { %8826 = vst [vmem:[#allocation55_spill] sm:$0xff] %v7358_v36  ;;  %4319 = vrot.lane.b32.xlu1 %v7348_v43, %s6350_s24  ;;  %v2598_v43 = vadd.f32 %v7236_v57, %v7056_v16 }
 0x48d   : > { %3382 = vmatpush.bf16.msrb.mxu0 %v5509_v53  ;;  %v7388_v31 = vpop.f32.mrf.mxu3 }
 0x48e   : > { %8831 = vst [vmem:[#allocation60_spill] sm:$0xff] %v7388_v31  ;;  %v5386_v31 = vld [vmem:[#allocation8 + $0x240] sm:$0xf0] }
 0x491   : > { %3383 = vmatpush.bf16.msrb.mxu0 %v5445_v13  ;;  %v5297_v13 = vor.u32 %v5717_v8, %v5296_v42 }
 0x492   : > { %v7356_v24 = vpop.f32.mrf.mxu1 }
 0x493   : > { %8825 = vst [vmem:[#allocation54_spill] sm:$0xff] %v7356_v24  ;;  %5210 = vmatmul.msk.bf16.vlgmr.msra.gmra.mxu2 %vm665_vm0, %v8786_v4  ;;  %v7376_v6 = vpop.f32.mrf.mxu0  ;;  %v5450_v24 = vld [vmem:[#allocation8 + $0x2c0] sm:$0xf0] }
 0x494   : > { %5540 = vmatmul.msk.bf16.vlgmr.msrb.gmra.mxu0 %vm665_vm0, %v8808_v26  ;;  %2630 = vmatpush.bf16.msra.mxu2 %v5297_v13 }
 0x495   : > { %5368 = vmatmul.msk.bf16.vlgmr.msra.gmra.mxu1 %vm665_vm0, %v8788_v7  ;;  %v3100_v50 = vpop.f32.mrf.mxu3 }
 0x498   : > { %2631 = vmatpush.bf16.msra.mxu2 %v5233_v55 }
 0x49a   : > { %v7374_v37 = vpop.f32.mrf.mxu1 }
 0x49b   : > { %8828 = vst [vmem:[#allocation57_spill] sm:$0xff] %v7374_v37  ;;  %v7384_v51 = vpop.f32.mrf.mxu0  ;;  %v5453_v37 = vor.u32 %v5772_v29, %v5450_v24  ;;  %v2601_v24 = vadd.f32 %v7246_v1, %v7074_v19  ;;  %v5312_v19 = vld [vmem:[#allocation8 + $0x98] sm:$0xf] }
 0x49c   : > { %v5719_v1 = vld [vmem:[#allocation8 + $0xd4] sm:$0xf0] }
 0x49d   : > { %3116 = vmatpush.bf16.msra.mxu1 %v5453_v37 }
 0x4a2   : > { %v7382_v53 = vpop.f32.mrf.mxu1 }
 0x4a3   : > { %8830 = vst [vmem:[#allocation59_spill] sm:$0xff] %v7382_v53  ;;  %5211 = vmatmul.msk.bf16.gmra.mxu2 %vm665_vm0, %v8787_v10  ;;  %v7398_v21 = vpop.f32.mrf.mxu0  ;;  %v2596_v53 = vadd.f32 %v7234_v20, %v7047_v63  ;;  %v3102_v63 = vpop.f32.mrf.mxu3 }
 0x4a4   : > { %5541 = vmatmul.msk.bf16.gmra.mxu0 %vm665_vm0, %v8810_v0  ;;  %v7412_v29 = vadd.f32 %v3102_v63, %v2598_v43  ;;  %v5703_v63 = vld [vmem:[#allocation8 + $0x54] sm:$0xf0] }
 0x4a5   : > { %5369 = vmatmul.msk.bf16.gmra.mxu1 %vm665_vm0, %v8789_v23  ;;  %v7406_v8 = vadd.f32 %v3100_v50, %v2596_v53  ;;  %v5248_v50 = vld [vmem:[#allocation8 + $0x18] sm:$0xf] }
 0x4a6   : > { %8835 = vst [vmem:[#allocation64_spill] sm:$0xff] %v7412_v29 }
 0x4a7   : > { %8834 = vst [vmem:[#allocation63_spill] sm:$0xff] %v7406_v8  ;;  %v5778_v8 = vld [vmem:[#allocation8 + $0x2b4] sm:$0xf] }
 0x4aa   : > { %v7396_v2 = vpop.f32.mrf.mxu1 }
 0x4ab   : > { %8832 = vst [vmem:[#allocation61_spill] sm:$0xff] %v7396_v2  ;;  %v5756_v2 = vld [vmem:[#allocation8 + $0x204] sm:$0xf]  ;;  %v7410_v20 = vpop.f32.mrf.mxu0  ;;  %v3105_v57 = vpop.f32.mrf.mxu3 }
 0x4ac   : > { %v5389_v36 = vor.u32 %v5756_v2, %v5386_v31  ;;  %v7426_v60 = vadd.f32 %v3105_v57, %v2601_v24  ;;  %v5774_v31 = vld [vmem:[#allocation8 + $0x294] sm:$0xf] }
 0x4ad   : > { %v5466_v2 = vld [vmem:[#allocation8 + $0x2d0] sm:$0xf0] }
 0x4ae   : > { %3117 = vmatpush.bf16.msra.mxu1 %v5389_v36  ;;  %v5469_v13 = vor.u32 %v5774_v31, %v5466_v2  ;;  %v2729_v2 = vadd.f32 %v7267_v14, %v7142_v62  ;;  %v5482_v14 = vld [vmem:[#allocation8 + $0x2e0] sm:$0xf0] }
 0x4b2   : > { %v7404_v42 = vpop.f32.mrf.mxu1 }
 0x4b3   : > { %8833 = vst [vmem:[#allocation62_spill] sm:$0xff] %v7404_v42  ;;  %5218 = vmatmul.msk.bf16.vlgmr.msrb.gmra.mxu2 %vm665_vm0, %v8786_v4  ;;  %v7418_v54 = vpop.f32.mrf.mxu0  ;;  %v2603_v4 = vadd.f32 %v7250_v27, %v7087_v35  ;;  %v3107_v43 = vpop.f32.mrf.mxu3  ;;  %v5313_v35 = vor.u32 %v5719_v1, %v5312_v19  ;;  %v5758_v42 = vld [vmem:[#allocation8 + $0x214] sm:$0xf] }
 0x4b4   : > { %v5402_v19 = vld [vmem:[#allocation8 + $0x250] sm:$0xf0] }
 0x4b5   : > { %5376 = vmatmul.msk.bf16.vlgmr.msrb.gmra.mxu1 %vm665_vm0, %v8788_v7  ;;  %v7432_v55 = vadd.f32 %v3107_v43, %v2603_v4  ;;  %2706 = vmatpush.bf16.msrb.mxu2 %v5313_v35  ;;  %v5249_v43 = vor.u32 %v5703_v63, %v5248_v50  ;;  %v5405_v1 = vor.u32 %v5758_v42, %v5402_v19 }
 0x4b6   : > { %3192 = vmatpush.bf16.msrb.mxu1 %v5469_v13  ;;  %v2731_v42 = vadd.f32 %v7281_v38, %v7152_v45  ;;  %v5776_v45 = vld [vmem:[#allocation8 + $0x2a4] sm:$0xf] }
 0x4b7   : > { %v5485_v19 = vor.u32 %v5776_v45, %v5482_v14  ;;  %v5762_v14 = vld [vmem:[#allocation8 + $0x234] sm:$0xf] }
 0x4b9   : > { %2707 = vmatpush.bf16.msrb.mxu2 %v5249_v43 }
 0x4ba   : > { %v7416_v16 = vpop.f32.mrf.mxu1  ;;  %3193 = vmatpush.bf16.msrb.mxu1 %v5405_v1  ;;  %v5328_v1 = vld [vmem:[#allocation8 + $0xa8] sm:$0xf] }
 0x4bb   : > { %8836 = vst [vmem:[#allocation65_spill] sm:$0xff] %v7416_v16  ;;  %v7430_v37 = vpop.f32.mrf.mxu0 }
 0x4c2   : > { %v7424_v36 = vpop.f32.mrf.mxu1 }
 0x4c3   : > { %8837 = vst [vmem:[#allocation66_spill] sm:$0xff] %v7424_v36  ;;  %5219 = vmatmul.msk.bf16.gmra.mxu2 %vm665_vm0, %v8787_v10  ;;  %v7438_v27 = vpop.f32.mrf.mxu0 }
 0x4c5   : > { %5377 = vmatmul.msk.bf16.gmra.mxu1 %vm665_vm0, %v8789_v23 }
 0x4ca   : > { %v7436_v53 = vpop.f32.mrf.mxu1 }
 0x4cb   : > { %8838 = vst [vmem:[#allocation67_spill] sm:$0xff] %v7436_v53  ;;  %v3233_v31 = vpop.f32.mrf.mxu0  ;;  %v5264_v53 = vld [vmem:[#allocation8 + $0x28] sm:$0xf] }
 0x4cc   : > { %v7459_v63 = vadd.f32 %v3233_v31, %v2729_v2  ;;  %v5721_v31 = vld [vmem:[#allocation8 + $0xe4] sm:$0xf0] }
 0x4cd   : > { %v5329_v2 = vor.u32 %v5721_v31, %v5328_v1 }
 0x4ce   : > { %v7440_v10 = vpop.f32.mrf.mxu2 }
 0x4cf   : > { %v1865_v57 = vrot.slane %v7440_v10, 2  ;;  %v1861_v24 = vrot.slane %v7440_v10, 1  ;;  %v1869_v4 = vrot.slane %v7440_v10, 3 }
 0x4d1   : > { %1866 = vrot.lane.b32.xlu0 %v1865_v57, %s6351_s28  ;;  %1862 = vrot.lane.b32.xlu2 %v1861_v24, %s6352_s19 }
 0x4d2   : > { %v7445_v35 = vpop.f32.mrf.mxu1  ;;  %1870 = vrot.lane.b32.xlu1 %v1869_v4, %s6353_s27 }
 0x4d3   : > { %5354 = vmatmul.msk.bf16.vlgmr.msra.gmra.mxu2 %vm665_vm0, %v8788_v7  ;;  %v3235_v57 = vpop.f32.mrf.mxu0 }
 0x4d4   : > { %v7461_v24 = vadd.f32 %v3235_v57, %v2731_v42  ;;  %2782 = vmatpush.bf16.msra.mxu2 %v5329_v2  ;;  %v5760_v42 = vld [vmem:[#allocation8 + $0x224] sm:$0xf]  ;;  %v5344_v2 = vld [vmem:[#allocation8 + $0xb8] sm:$0xf] }
 0x4d5   : > { %5512 = vmatmul.msk.bf16.vlgmr.msra.gmra.mxu1 %vm665_vm0, %v8808_v26  ;;  %v5418_v57 = vld [vmem:[#allocation8 + $0x260] sm:$0xf0] }
 0x4d6   : > { %v7453_v13 = vpop.f32.mrf.mxu2  ;;  %3268 = vmatpush.bf16.msra.mxu1 %v5485_v19  ;;  %v5421_v36 = vor.u32 %v5760_v42, %v5418_v57  ;;  %v5434_v19 = vld [vmem:[#allocation8 + $0x270] sm:$0xf0]  ;;  %v5723_v42 = vld [vmem:[#allocation8 + $0xf4] sm:$0xf0] }
 0x4d7   : > { %8839 = vst [vmem:[#allocation68_spill] sm:$0xff] %v7453_v13  ;;  %v5705_v13 = vld [vmem:[#allocation8 + $0x64] sm:$0xf0]  ;;  %v5437_v31 = vor.u32 %v5762_v14, %v5434_v19  ;;  %v5345_v57 = vor.u32 %v5723_v42, %v5344_v2  ;;  %v5280_v14 = vld [vmem:[#allocation8 + $0x38] sm:$0xf]  ;;  %v2655_v2 = vadd.f32 %v7248_v5, %v7076_v22 }
 0x4d8   : > { %v5707_v19 = vld [vmem:[#allocation8 + $0x74] sm:$0xf0] }
 0x4da   : > { %v7457_v50 = vpop.f32.mrf.mxu1  ;;  %3269 = vmatpush.bf16.msra.mxu1 %v5421_v36 }
 0x4de   : > { %v7463_v4 = vpop.f32.mrf.mxu2 }
 0x4df   : > { %8840 = vst [vmem:[#allocation69_spill] sm:$0xff] %v7463_v4  ;;  %v5265_v4 = vor.u32 %v5705_v13, %v5264_v53 }
 0x4e1   : > { %2783 = vmatpush.bf16.msra.mxu2 %v5265_v4  ;;  %v7497_v4 = vpop.f32.mrf.mxu0 }
 0x4e2   : > { %v7465_v43 = vpop.f32.mrf.mxu1 }
 0x4e3   : > { %5355 = vmatmul.msk.bf16.gmra.mxu2 %vm665_vm0, %v8789_v23 }
 0x4e5   : > { %5513 = vmatmul.msk.bf16.gmra.mxu1 %vm665_vm0, %v8810_v0 }
 0x4e6   : > { %v7471_v62 = vpop.f32.mrf.mxu2 }
 0x4e7   : > { %8841 = vst [vmem:[#allocation70_spill] sm:$0xff] %v7471_v62  ;;  %v5498_v62 = vld [vmem:[#allocation8 + $0x2f0] sm:$0xf0] }
 0x4e8   : > { %v5501_v45 = vor.u32 %v5778_v8, %v5498_v62 }
 0x4ea   : > { %v7473_v38 = vpop.f32.mrf.mxu1 }
 0x4ee   : > { %v7475_v16 = vpop.f32.mrf.mxu2 }
 0x4ef   : > { %8842 = vst [vmem:[#allocation71_spill] sm:$0xff] %v7475_v16 }
 0x4f2   : > { %v7477_v29 = vpop.f32.mrf.mxu1 }
 0x4f3   : > { %8843 = vst [vmem:[#allocation72_spill] sm:$0xff] %v7477_v29  ;;  %5362 = vmatmul.msk.bf16.vlgmr.msrb.gmra.mxu2 %vm665_vm0, %v8788_v7  ;;  %v3176_v29 = vpop.f32.mrf.mxu3 }
 0x4f4   : > { %2858 = vmatpush.bf16.msrb.mxu2 %v5345_v57 }
 0x4f5   : > { %5520 = vmatmul.msk.bf16.vlgmr.msrb.gmra.mxu1 %vm665_vm0, %v8808_v26 }
 0x4f6   : > { %v7483_v1 = vpop.f32.mrf.mxu2  ;;  %3344 = vmatpush.bf16.msrb.mxu1 %v5501_v45 }
 0x4f7   : > { %8844 = vst [vmem:[#allocation73_spill] sm:$0xff] %v7483_v1  ;;  %v2660_v1 = vadd.f32 %v7260_v33, %v7132_v9  ;;  %v2653_v9 = vadd.f32 %v7238_v58, %v7058_v17 }
 0x4f9   : > { %v3446_v42 = vadd.f32 %v7438_v27, %v2660_v1  ;;  %v3398_v57 = vadd.f32 %v7410_v20, %v2653_v9  ;;  %v7529_v27 = vpop.permute.xlu1 %4154 }
 0x4fa   : > { %v7485_v53 = vpop.f32.mrf.mxu1  ;;  %3345 = vmatpush.bf16.msrb.mxu1 %v5437_v31  ;;  %v5281_v31 = vor.u32 %v5707_v19, %v5280_v14  ;;  %8848 = vst [vmem:[#allocation77_spill] sm:$0xff] %v7529_v27  ;;  %v5456_v19 = vld [vmem:[#allocation8 + $0x288] sm:$0xf] }
 0x4fb   : > { %v3178_v1 = vpop.f32.mrf.mxu3 }
 0x4fc   : > { %2859 = vmatpush.bf16.msrb.mxu2 %v5281_v31  ;;  %v5781_v31 = vld [vmem:[#allocation8 + $0x2c4] sm:$0xf0] }
 0x4fe   : > { %v7487_v36 = vpop.f32.mrf.mxu2 }
 0x4ff   : > { %8845 = vst [vmem:[#allocation74_spill] sm:$0xff] %v7487_v36  ;;  %v7505_v36 = vpop.f32.mrf.mxu0 }
 0x502   : > { %v7489_v13 = vpop.f32.mrf.mxu1 }
 0x503   : > { %5363 = vmatmul.msk.bf16.gmra.mxu2 %vm665_vm0, %v8789_v23 }
 0x505   : > { %5521 = vmatmul.msk.bf16.gmra.mxu1 %vm665_vm0, %v8810_v0 }
 0x506   : > { %v7495_v8 = vpop.f32.mrf.mxu2 }
 0x507   : > { %8846 = vst [vmem:[#allocation75_spill] sm:$0xff] %v7495_v8  ;;  %v2658_v8 = vadd.f32 %v7252_v28, %v7089_v40  ;;  %v3414_v28 = vadd.f32 %v7418_v54, %v2655_v2  ;;  %v7527_v5 = vpop.f32.mrf.mxu0  ;;  %v5457_v2 = vor.u32 %v5781_v31, %v5456_v19  ;;  %v2677_v19 = vadd.f32 %v7283_v30, %v7150_v59 }
 0x509   : > { %v3430_v33 = vadd.f32 %v7430_v37, %v2658_v8  ;;  %v7543_v37 = vpop.permute.xlu1 %4195  ;;  %v3181_v8 = vpop.f32.mrf.mxu3 }
 0x50a   : > { %v7499_v62 = vpop.f32.mrf.mxu1  ;;  %8850 = vst [vmem:[#allocation79_spill] sm:$0xff] %v7543_v37 }
 0x50e   : > { %v7501_v45 = vpop.f32.mrf.mxu2 }
 0x50f   : > { %v7539_v20 = vpop.f32.mrf.mxu0 }
 0x511   : > { %v7555_v37 = vpop.permute.xlu1 %4236 }
 0x512   : > { %v7509_v16 = vpop.f32.mrf.mxu1  ;;  %8852 = vst [vmem:[#allocation81_spill] sm:$0xff] %v7555_v37  ;;  %v8884_v37 = vld [vmem:[#allocation38_spill] sm:$0xff] }
 0x513   : > { %5370 = vmatmul.msk.bf16.vlgmr.msra.gmra.mxu2 %vm665_vm0, %v8788_v7 }
 0x514   : > { %3135 = vmatpush.bf16.msra.mxu2 %v5457_v2  ;;  %v2674_v2 = vadd.f32 %v7271_v18, %v7140_v47 }
 0x515   : > { %5528 = vmatmul.msk.bf16.vlgmr.msra.gmra.mxu1 %vm665_vm0, %v8808_v26 }
 0x516   : > { %3502 = vmatpush.msra.mxu1 %v3446_v42  ;;  %v7521_v40 = vpop.f32.mrf.mxu2  ;;  %v7547_v42 = vpop.permute.xlu2 %4360  ;;  %v3415_v30 = vadd.f32 %v3178_v1, %v2674_v2 }
 0x517   : > { %8847 = vst [vmem:[#allocation76_spill] sm:$0xff] %v7521_v40  ;;  %v2679_v40 = vadd.f32 %v7291_v32, %v7154_v44  ;;  %v2672_v44 = vadd.f32 %v7263_v48, %v7134_v56  ;;  %v3431_v32 = vadd.f32 %v3181_v8, %v2677_v19 }
 0x518   : > { %3503 = vmatpush.msra.mxu1 %v3430_v33  ;;  %8851 = vst [vmem:[#allocation80_spill] sm:$0xff] %v7547_v42  ;;  %v5392_v33 = vld [vmem:[#allocation8 + $0x208] sm:$0xf] }
 0x519   : > { %v3399_v47 = vadd.f32 %v3176_v29, %v2672_v44 }
 0x51a   : > { %3504 = vmatpush.msra.mxu1 %v3414_v28  ;;  %v7525_v22 = vpop.f32.mrf.mxu1  ;;  %v5765_v28 = vld [vmem:[#allocation8 + $0x244] sm:$0xf0] }
 0x51b   : > { %v5393_v27 = vor.u32 %v5765_v28, %v5392_v33 }
 0x51c   : > { %3505 = vmatpush.msra.mxu1 %v3398_v57  ;;  %v7551_v57 = vpop.f32.mrf.mxu0 }
 0x51d   : > { %3136 = vmatpush.bf16.msra.mxu2 %v5393_v27 }
 0x51e   : > { %v7531_v17 = vpop.f32.mrf.mxu2  ;;  %v7569_v27 = vpop.permute.xlu2 %4401 }
 0x51f   : > { %8849 = vst [vmem:[#allocation78_spill] sm:$0xff] %v7531_v17  ;;  %v3183_v17 = vpop.f32.mrf.mxu3 }
 0x520   : > { %v3447_v42 = vadd.f32 %v3183_v17, %v2679_v40  ;;  %8853 = vst [vmem:[#allocation82_spill] sm:$0xff] %v7569_v27  ;;  %v7577_v40 = vpop.permute.xlu1 %4319 }
 0x521   : > { %8856 = vst [vmem:[#allocation85_spill] sm:$0xff] %v7577_v40 }
 0x522   : > { %v7533_v58 = vpop.f32.mrf.mxu1 }
 0x523   : > { %5371 = vmatmul.msk.bf16.gmra.mxu2 %vm665_vm0, %v8789_v23 }
 0x524   : > { %v3316_v33 = vpop.f32.mrf.mxu0 }
 0x525   : > { %5529 = vmatmul.msk.bf16.gmra.mxu1 %vm665_vm0, %v8810_v0 }
 0x526   : > { %v7541_v54 = vpop.f32.mrf.mxu2 }
 0x52a   : > { %v7545_v14 = vpop.f32.mrf.mxu1 }
 0x52b   : > { %v1863_v48 = vpop.permute.xlu2 %1862 }
 0x52c   : > { %v1874_v29 = vsel %vm1873_vm2, %v7440_v10, %v1863_v48  ;;  %v7589_v8 = vpop.f32.mrf.mxu0  ;;  %v5472_v10 = vld [vmem:[#allocation8 + $0x298] sm:$0xf] }
 0x52d   : > { %v5408_v48 = vld [vmem:[#allocation8 + $0x218] sm:$0xf] }
 0x52e   : > { %v7549_v9 = vpop.f32.mrf.mxu2 }
 0x532   : > { %v7559_v31 = vpop.f32.mrf.mxu1 }
 0x533   : > { %5378 = vmatmul.msk.bf16.vlgmr.msrb.gmra.mxu2 %vm665_vm0, %v8788_v7  ;;  %v7573_v7 = vpop.permute.xlu0 %4279 }
 0x534   : > { %8855 = vst [vmem:[#allocation84_spill] sm:$0xff] %v7573_v7 }
 0x535   : > { %5536 = vmatmul.msk.bf16.vlgmr.msrb.gmra.mxu1 %vm665_vm0, %v8808_v26 }
 0x536   : > { %3568 = vmatpush.msrb.mxu1 %v3447_v42  ;;  %v7571_v59 = vpop.f32.mrf.mxu2 }
 0x537   : > { %8854 = vst [vmem:[#allocation83_spill] sm:$0xff] %v7571_v59 }
 0x538   : > { %3569 = vmatpush.msrb.mxu1 %v3431_v32  ;;  %v5783_v32 = vld [vmem:[#allocation8 + $0x2d4] sm:$0xf0] }
 0x53a   : > { %3570 = vmatpush.msrb.mxu1 %v3415_v30  ;;  %v7575_v18 = vpop.f32.mrf.mxu1  ;;  %v3387_v30 = vpop.f32.mrf.mxu0 }
 0x53c   : > { %3571 = vmatpush.msrb.mxu1 %v3399_v47 }
 0x53e   : > { %v7579_v56 = vpop.f32.mrf.mxu2 }
 0x542   : > { %v7584_v1 = vpop.f32.mrf.mxu1 }
 0x543   : > { %5379 = vmatmul.msk.bf16.gmra.mxu2 %vm665_vm0, %v8789_v23  ;;  %v1867_v17 = vpop.permute.xlu0 %1866  ;;  %v5473_v23 = vor.u32 %v5783_v32, %v5472_v10  ;;  %v7611_v10 = vld [vmem:[%s8699_s8 + $0x4] sm:$0xf] }
 0x544   : > { %v1876_v42 = vsel %vm1875_vm3, %v1874_v29, %v1867_v17  ;;  %v1871_v28 = vpop.permute.xlu1 %1870  ;;  %v5767_v29 = vld [vmem:[#allocation8 + $0x254] sm:$0xf0] }
 0x545   : > { %v1878_v19 = vsel %vm1877_vm4, %v1876_v42, %v1871_v28  ;;  %5537 = vmatmul.msk.bf16.gmra.mxu1 %vm665_vm0, %v8810_v0  ;;  %3211 = vmatpush.bf16.msrb.mxu2 %v5473_v23  ;;  %v5409_v17 = vor.u32 %v5767_v29, %v5408_v48  ;;  %v2736_v42 = vadd.f32 %v7301_v46, %v7164_v3  ;;  %v8859_v48 = vld [vmem:[#allocation30_spill] sm:$0xff] }
 0x546   : > { %v7593_v2 = vpop.f32.mrf.mxu2  ;;  %1880 = vst.msk [vmem:[%s8734_s20] sm:$0x1] %vm1879_vm5, %v1878_v19  ;;  %v2615_v28 = vadd.f32 %v7445_v35, %v7265_v15  ;;  %v2734_v19 = vadd.f32 %v7287_v12, %v7156_v41  ;;  %v3390_v12 = vpop.f32.mrf.mxu0  ;;  %v2812_v46 = vadd.f32 %v7341_v52, %v7192_v34  ;;  %v2617_v35 = vadd.f32 %v7457_v50, %v7279_v49  ;;  %v8858_v49 = vld [vmem:[#allocation44_spill] sm:$0xff] }
 0x547   : > { %v3450_v3 = vadd.f32 %v7505_v36, %v2736_v42  ;;  %v2807_v34 = vadd.f32 %v7321_v61, %v7180_v11  ;;  %v2888_v29 = vadd.f32 %v7398_v21, %v8859_v48  ;;  %v8860_v11 = vld [vmem:[#allocation31_spill] sm:$0xff]  ;;  %v5424_v48 = vld [vmem:[#allocation8 + $0x228] sm:$0xf] }
 0x548   : > { %v3434_v15 = vadd.f32 %v7497_v4, %v2734_v19  ;;  %v7633_v4 = vld [vmem:[%s8699_s8 + $0x8] sm:$0xf]  ;;  %v3454_v52 = vadd.f32 %v3316_v33, %v2812_v46  ;;  %v2620_v61 = vadd.f32 %v7465_v43, %v8860_v11  ;;  %v7658_v19 = vld [vmem:[%s8699_s8 + $0xc] sm:$0xf]  ;;  %v5787_v11 = vld [vmem:[#allocation8 + $0x2f4] sm:$0xf0] }
 0x549   : > { %3212 = vmatpush.bf16.msrb.mxu2 %v5409_v17  ;;  %v3422_v17 = vadd.f32 %v7539_v20, %v2807_v34  ;;  %v8861_v33 = vld [vmem:[#allocation29_spill] sm:$0xff]  ;;  %v8862_v20 = vld [vmem:[#allocation27_spill] sm:$0xff] }
 0x54a   : > { %v7598_v44 = vpop.f32.mrf.mxu1  ;;  %v2886_v42 = vadd.f32 %v7384_v51, %v8861_v33  ;;  %v2883_v43 = vadd.f32 %v7376_v6, %v8862_v20  ;;  %v8863_v51 = vld [vmem:[#allocation34_spill] sm:$0xff]  ;;  %v5771_v33 = vld [vmem:[#allocation8 + $0x274] sm:$0xf0]  ;;  %v3252_v20 = vpop.f32.mrf.mxu3 }
 0x54c   : > { %v3442_v46 = vadd.f32 %v3390_v12, %v2886_v42  ;;  %v3426_v34 = vadd.f32 %v3387_v30, %v2883_v43  ;;  %v5769_v12 = vld [vmem:[#allocation8 + $0x264] sm:$0xf0] }
 0x54e   : > { %v7600_v47 = vpop.f32.mrf.mxu2 }
 0x552   : > { %v3119_v27 = vpop.f32.mrf.mxu1 }
 0x553   : > { %v7613_v32 = vadd.f32 %v3119_v27, %v2615_v28  ;;  %5514 = vmatmul.msk.bf16.vlgmr.msra.gmra.mxu2 %vm665_vm0, %v8808_v26  ;;  %v2810_v27 = vadd.f32 %v7327_v39, %v7184_v25  ;;  %v8857_v25 = vld [vmem:[#allocation39_spill] sm:$0xff] }
 0x554   : > { %v2805_v39 = vadd.f32 %v8858_v49, %v8857_v25  ;;  %v8865_v25 = vld [vmem:[#allocation32_spill] sm:$0xff] }
 0x555   : > { %5543 = vmatmul.msk.f32.vlgmr.msra.gmra.mxu1 %vm665_vm0, %v7611_v10  ;;  %v3438_v50 = vadd.f32 %v7551_v57, %v2810_v27  ;;  %v5488_v27 = vld [vmem:[#allocation8 + $0x2a8] sm:$0xf]  ;;  %v2622_v6 = vadd.f32 %v7473_v38, %v8865_v25 }
 0x556   : > { %3633 = vmatpush.msra.mxu1 %v3450_v3  ;;  %v7621_v41 = vpop.f32.mrf.mxu2  ;;  %v3406_v28 = vadd.f32 %v7527_v5, %v2805_v39  ;;  %v8864_v5 = vld [vmem:[#allocation55_spill] sm:$0xff] }
 0x558   : > { %3634 = vmatpush.msra.mxu1 %v3434_v15  ;;  %v2881_v15 = vadd.f32 %v8864_v5, %v8863_v51  ;;  %v8866_v51 = vld [vmem:[#allocation64_spill] sm:$0xff]  ;;  %v8867_v5 = vld [vmem:[#allocation63_spill] sm:$0xff] }
 0x55a   : > { %3635 = vmatpush.msra.mxu1 %v7461_v24  ;;  %v3121_v36 = vpop.f32.mrf.mxu1  ;;  %v3410_v49 = vadd.f32 %v7589_v8, %v2881_v15  ;;  %v3254_v15 = vpop.f32.mrf.mxu3 }
 0x55b   : > { %v7635_v23 = vadd.f32 %v3121_v36, %v2617_v35  ;;  %v5785_v36 = vld [vmem:[#allocation8 + $0x2e4] sm:$0xf0] }
 0x55c   : > { %3636 = vmatpush.msra.mxu1 %v7459_v63  ;;  %v3392_v63 = vpop.f32.mrf.mxu0 }
 0x55d   : > { %5546 = vmatmul.msk.f32.vlgmr.msrb.gmra.mxu1 %vm665_vm0, %v7633_v4  ;;  %v3458_v3 = vadd.f32 %v3392_v63, %v2888_v29  ;;  %v5425_v29 = vor.u32 %v5769_v12, %v5424_v48  ;;  %v5440_v63 = vld [vmem:[#allocation8 + $0x238] sm:$0xf] }
 0x55e   : > { %3723 = vmatpush.msrb.mxu1 %v3454_v52  ;;  %v7645_v24 = vpop.f32.mrf.mxu2  ;;  %v5489_v52 = vor.u32 %v5785_v36, %v5488_v27  ;;  %v5441_v38 = vor.u32 %v5771_v33, %v5440_v63  ;;  %v8872_v63 = vld [vmem:[#allocation72_spill] sm:$0xff] }
 0x560   : > { %3724 = vmatpush.msrb.mxu1 %v3438_v50  ;;  %3287 = vmatpush.bf16.msra.mxu2 %v5489_v52 }
 0x562   : > { %3725 = vmatpush.msrb.mxu1 %v3422_v17  ;;  %v3124_v57 = vpop.f32.mrf.mxu1  ;;  %v5504_v17 = vld [vmem:[#allocation8 + $0x2b8] sm:$0xf]  ;;  %v3257_v36 = vpop.f32.mrf.mxu3 }
 0x563   : > { %v7660_v21 = vadd.f32 %v3124_v57, %v2620_v61  ;;  %5515 = vmatmul.msk.bf16.gmra.mxu2 %vm665_vm0, %v8810_v0  ;;  %v5505_v30 = vor.u32 %v5787_v11, %v5504_v17 }
 0x564   : > { %3726 = vmatpush.msrb.mxu1 %v3406_v28  ;;  %3288 = vmatpush.bf16.msra.mxu2 %v5425_v29  ;;  %v8870_v29 = vld [vmem:[#allocation46_spill] sm:$0xff] }
 0x565   : > { %5549 = vmatmul.msk.f32.vlgmr.msra.gmra.mxu1 %vm665_vm0, %v7658_v19  ;;  %v2693_v17 = vadd.f32 %v7485_v53, %v8870_v29  ;;  %v8878_v29 = vld [vmem:[#allocation35_spill] sm:$0xff] }
 0x566   : > { %3813 = vmatpush.msra.mxu1 %v3458_v3  ;;  %v7670_v35 = vpop.f32.mrf.mxu2 }
 0x568   : > { %3814 = vmatpush.msra.mxu1 %v3442_v46 }
 0x56a   : > { %3815 = vmatpush.msra.mxu1 %v3426_v34  ;;  %v3126_v39 = vpop.f32.mrf.mxu1 }
 0x56b   : > { %v7675_v50 = vadd.f32 %v3126_v39, %v2622_v6  ;;  %v8868_v6 = vld [vmem:[#allocation50_spill] sm:$0xff]  ;;  %v8869_v39 = vld [vmem:[#allocation48_spill] sm:$0xff] }
 0x56c   : > { %3816 = vmatpush.msra.mxu1 %v3410_v49  ;;  %v2698_v49 = vadd.f32 %v7499_v62, %v8868_v6  ;;  %v2696_v48 = vadd.f32 %v7489_v13, %v8869_v39  ;;  %v8875_v6 = vld [vmem:[#allocation49_spill] sm:$0xff]  ;;  %v8876_v39 = vld [vmem:[#allocation36_spill] sm:$0xff] }
 0x56e   : > { %v7677_v61 = vpop.f32.mrf.mxu2 }
 0x572   : > { %v3195_v43 = vpop.f32.mrf.mxu1 }
 0x573   : > { %5522 = vmatmul.msk.bf16.vlgmr.msrb.gmra.mxu2 %vm665_vm0, %v8808_v26 }
 0x574   : > { %3363 = vmatpush.bf16.msrb.mxu2 %v5505_v30  ;;  %v8871_v30 = vld [vmem:[#allocation43_spill] sm:$0xff] }
 0x575   : > { %v2691_v33 = vadd.f32 %v8872_v63, %v8871_v30  ;;  %v8881_v63 = vld [vmem:[#allocation42_spill] sm:$0xff] }
 0x576   : > { %v7681_v8 = vpop.f32.mrf.mxu2 }
 0x577   : > { %v3400_v62 = vadd.f32 %v3195_v43, %v2691_v33 }
 0x578   : > { %3364 = vmatpush.bf16.msrb.mxu2 %v5441_v38 }
 0x57a   : > { %v3197_v46 = vpop.f32.mrf.mxu1 }
 0x57b   : > { %v3416_v38 = vadd.f32 %v3197_v46, %v2693_v17  ;;  %v8879_v17 = vld [vmem:[#allocation45_spill] sm:$0xff] }
 0x57e   : > { %v7683_v42 = vpop.f32.mrf.mxu2 }
 0x582   : > { %v3200_v34 = vpop.f32.mrf.mxu1 }
 0x583   : > { %5523 = vmatmul.msk.bf16.gmra.mxu2 %vm665_vm0, %v8810_v0  ;;  %v3432_v11 = vadd.f32 %v3200_v34, %v2696_v48  ;;  %v8874_v34 = vld [vmem:[#allocation40_spill] sm:$0xff]  ;;  %v8877_v48 = vld [vmem:[#allocation47_spill] sm:$0xff] }
 0x584   : > { %v2753_v43 = vadd.f32 %v8877_v48, %v8876_v39 }
 0x586   : > { %v7687_v28 = vpop.f32.mrf.mxu2 }
 0x58a   : > { %v3202_v25 = vpop.f32.mrf.mxu1 }
 0x58b   : > { %v3448_v12 = vadd.f32 %v3202_v25, %v2698_v49  ;;  %v2755_v49 = vadd.f32 %v8875_v6, %v8874_v34  ;;  %v8882_v34 = vld [vmem:[#allocation28_spill] sm:$0xff] }
 0x58c   : > { %v8883_v6 = vld [vmem:[#allocation60_spill] sm:$0xff] }
 0x58d   : > { %v2831_v39 = vadd.f32 %v8883_v6, %v8882_v34  ;;  %v8891_v6 = vld [vmem:[#allocation70_spill] sm:$0xff] }
 0x58e   : > { %v7689_v57 = vpop.f32.mrf.mxu2 }
 0x593   : > { %5530 = vmatmul.msk.bf16.vlgmr.msra.gmra.mxu2 %vm665_vm0, %v8808_v26 }
 0x594   : > { %3525 = vmatpush.msra.mxu2 %v7432_v55 }
 0x596   : > { %3526 = vmatpush.msra.mxu2 %v7426_v60  ;;  %v7695_v3 = vpop.f32.mrf.mxu2  ;;  %v3259_v60 = vpop.f32.mrf.mxu3 }
 0x597   : > { %v3451_v30 = vadd.f32 %v3259_v60, %v2755_v49  ;;  %v8886_v49 = vld [vmem:[#allocation37_spill] sm:$0xff] }
 0x598   : > { %3527 = vmatpush.msra.mxu2 %v8866_v51 }
 0x59a   : > { %3528 = vmatpush.msra.mxu2 %v8867_v5 }
 0x59e   : > { %v7699_v27 = vpop.f32.mrf.mxu2  ;;  %v3328_v5 = vpop.f32.mrf.mxu3 }
 0x5a3   : > { %5531 = vmatmul.msk.bf16.gmra.mxu2 %vm665_vm0, %v8810_v0 }
 0x5a6   : > { %v7703_v52 = vpop.f32.mrf.mxu2  ;;  %v3330_v25 = vpop.f32.mrf.mxu3 }
 0x5ae   : > { %v7705_v55 = vpop.f32.mrf.mxu2  ;;  %v3333_v53 = vpop.f32.mrf.mxu3 }
 0x5b3   : > { %5538 = vmatmul.msk.bf16.vlgmr.msrb.gmra.mxu2 %vm665_vm0, %v8808_v26 }
 0x5b4   : > { %3588 = vmatpush.msrb.mxu2 %v3448_v12  ;;  %v3459_v12 = vld [vmem:[%s8699_s8] sm:$0xf] }
 0x5b6   : > { %3589 = vmatpush.msrb.mxu2 %v3432_v11  ;;  %v7717_v51 = vpop.f32.mrf.mxu2  ;;  %v2750_v11 = vadd.f32 %v8879_v17, %v8878_v29  ;;  %v3335_v7 = vpop.f32.mrf.mxu3  ;;  %v8887_v17 = vld [vmem:[#allocation56_spill] sm:$0xff] }
 0x5b7   : > { %8873 = vst [vmem:[#allocation39_spill] sm:$0xff] %v7717_v51  ;;  %v8885_v51 = vld [vmem:[#allocation58_spill] sm:$0xff]  ;;  %v2826_v59 = vadd.f32 %v8887_v17, %v8886_v49 }
 0x5b8   : > { %3590 = vmatpush.msrb.mxu2 %v3416_v38  ;;  %v3435_v38 = vadd.f32 %v3257_v36, %v2753_v43  ;;  %v3419_v48 = vadd.f32 %v3254_v15, %v2750_v11  ;;  %v2829_v29 = vadd.f32 %v8885_v51, %v8884_v37  ;;  %v8888_v36 = vld [vmem:[#allocation33_spill] sm:$0xff]  ;;  %v8889_v43 = vld [vmem:[#allocation51_spill] sm:$0xff] }
 0x5b9   : > { %v3423_v11 = vadd.f32 %v3330_v25, %v2826_v59 }
 0x5ba   : > { %3591 = vmatpush.msrb.mxu2 %v3400_v62  ;;  %v7739_v62 = vpop.f32.mrf.mxu1  ;;  %v3439_v15 = vadd.f32 %v3333_v53, %v2829_v29  ;;  %v8893_v29 = vld [vmem:[#allocation68_spill] sm:$0xff] }
 0x5be   : > { %v7719_v13 = vpop.f32.mrf.mxu2 }
 0x5c3   : > { %5539 = vmatmul.msk.bf16.gmra.mxu2 %vm665_vm0, %v8810_v0  ;;  %v8880_v0 = vld [vmem:[#allocation41_spill] sm:$0xff] }
 0x5c4   : > { %v2748_v33 = vadd.f32 %v8881_v63, %v8880_v0  ;;  %v3455_v0 = vadd.f32 %v3335_v7, %v2831_v39  ;;  %v3273_v63 = vpop.f32.mrf.mxu1 }
 0x5c6   : > { %v7723_v26 = vpop.f32.mrf.mxu2  ;;  %v3403_v60 = vadd.f32 %v3252_v20, %v2748_v33  ;;  %v8890_v33 = vld [vmem:[#allocation71_spill] sm:$0xff] }
 0x5c7   : > { %v2641_v7 = vadd.f32 %v7677_v61, %v8890_v33  ;;  %v3463_v61 = vld [vmem:[%s8699_s8 + $0x10] sm:$0xf] }
 0x5cc   : > { %v3276_v51 = vpop.f32.mrf.mxu1 }
 0x5ce   : > { %v7727_v46 = vpop.f32.mrf.mxu2 }
 0x5d3   : > { %5544 = vmatmul.msk.f32.vlgmr.msra.gmra.mxu2 %vm665_vm0, %v3459_v12 }
 0x5d4   : > { %3658 = vmatpush.msra.mxu2 %v3451_v30  ;;  %v2824_v30 = vadd.f32 %v8889_v43, %v8888_v36  ;;  %v3278_v25 = vpop.f32.mrf.mxu1 }
 0x5d6   : > { %3659 = vmatpush.msra.mxu2 %v3435_v38  ;;  %v3138_v40 = vpop.f32.mrf.mxu2  ;;  %v3407_v37 = vadd.f32 %v3328_v5, %v2824_v30  ;;  %v2634_v5 = vadd.f32 %v7621_v41, %v8893_v29  ;;  %v8896_v30 = vld [vmem:[#allocation73_spill] sm:$0xff] }
 0x5d8   : > { %3660 = vmatpush.msra.mxu2 %v3419_v48  ;;  %v8892_v48 = vld [vmem:[#allocation69_spill] sm:$0xff]  ;;  %v3397_v49 = vadd.f32 %v3138_v40, %v2634_v5 }
 0x5d9   : > { %v2636_v53 = vadd.f32 %v7645_v24, %v8892_v48 }
 0x5da   : > { %3661 = vmatpush.msra.mxu2 %v3403_v60 }
 0x5db   : > { %5547 = vmatmul.msk.f32.vlgmr.msrb.gmra.mxu2 %vm665_vm0, %v7633_v4  ;;  %v2639_v4 = vadd.f32 %v7670_v35, %v8891_v6  ;;  %v8900_v6 = vld [vmem:[#allocation54_spill] sm:$0xff] }
 0x5dc   : > { %3748 = vmatpush.msrb.mxu2 %v3455_v0  ;;  %v3347_v24 = vpop.f32.mrf.mxu1 }
 0x5de   : > { %3749 = vmatpush.msrb.mxu2 %v3439_v15  ;;  %v3140_v38 = vpop.f32.mrf.mxu2  ;;  %v2710_v15 = vadd.f32 %v7681_v8, %v8896_v30 }
 0x5df   : > { %v3413_v60 = vadd.f32 %v3140_v38, %v2636_v53  ;;  %v8897_v38 = vld [vmem:[#allocation61_spill] sm:$0xff] }
 0x5e0   : > { %3750 = vmatpush.msrb.mxu2 %v3423_v11 }
 0x5e2   : > { %3751 = vmatpush.msrb.mxu2 %v3407_v37  ;;  %v8898_v37 = vld [vmem:[#allocation59_spill] sm:$0xff] }
 0x5e3   : > { %5550 = vmatmul.msk.f32.vlgmr.msra.gmra.mxu2 %vm665_vm0, %v3463_v61  ;;  %v2772_v8 = vadd.f32 %v7533_v58, %v8898_v37  ;;  %v8901_v58 = vld [vmem:[#allocation67_spill] sm:$0xff]  ;;  %v5672_v37 = vld [vmem:[%s8702_s11 + $0xe0] sm:$0xf] }
 0x5e4   : > { %v3349_v41 = vpop.f32.mrf.mxu1  ;;  %v2850_v53 = vadd.f32 %v7598_v44, %v8901_v58  ;;  %v8904_v44 = vld [vmem:[#allocation62_spill] sm:$0xff] }
 0x5e5   : > { %v5664_v58 = vld [vmem:[%s8702_s11 + $0xd0] sm:$0xf] }
 0x5e6   : > { %v3143_v20 = vpop.f32.mrf.mxu2 }
 0x5e7   : > { %v3429_v59 = vadd.f32 %v3143_v20, %v2639_v4  ;;  %v2767_v4 = vadd.f32 %v7509_v16, %v8900_v6 }
 0x5ec   : > { %v3352_v36 = vpop.f32.mrf.mxu1 }
 0x5ee   : > { %v3145_v34 = vpop.f32.mrf.mxu2 }
 0x5ef   : > { %v3445_v39 = vadd.f32 %v3145_v34, %v2641_v7  ;;  %v3436_v34 = vadd.f32 %v3276_v51, %v2772_v8  ;;  %v8902_v51 = vld [vmem:[#allocation66_spill] sm:$0xff]  ;;  %v5817_v8 = vld [vmem:[%s8702_s11 + $0xe4] sm:$0xf0] }
 0x5f1   : > { %3482 = vmatpush.msrb.mxu3 %v3445_v39 }
 0x5f3   : > { %3483 = vmatpush.msrb.mxu3 %v3429_v59  ;;  %v3404_v59 = vadd.f32 %v7739_v62, %v2767_v4  ;;  %v2843_v62 = vadd.f32 %v7559_v31, %v8904_v44  ;;  %v5602_v44 = vld [vmem:[%s8702_s11 + $0x58] sm:$0xf0] }
 0x5f4   : > { %v3354_v48 = vpop.f32.mrf.mxu1 }
 0x5f5   : > { %3484 = vmatpush.msrb.mxu3 %v3413_v60 }
 0x5f6   : > { %v3214_v17 = vpop.f32.mrf.mxu2 }
 0x5f7   : > { %3485 = vmatpush.msrb.mxu3 %v3397_v49  ;;  %v3408_v49 = vadd.f32 %v3347_v24, %v2843_v62 }
 0x5f8   : > { %5542 = vmatmul.msk.f32.vlgmr.msrb.gmra.mxu3 %vm665_vm0, %v7611_v10 }
 0x5f9   : > { %3545 = vmatpush.msra.mxu3 %v7675_v50  ;;  %v2717_v50 = vadd.f32 %v7689_v57, %v7501_v45  ;;  %v2774_v45 = vadd.f32 %v7545_v14, %v8897_v38  ;;  %v3464_v57 = vld [vmem:[%s8699_s8 + $0x14] sm:$0xf]  ;;  %v8899_v14 = vld [vmem:[#allocation57_spill] sm:$0xff] }
 0x5fa   : > { %5553 = vmatmul.msk.f32.vlgmr.msrb.gmra.mxu1 %vm665_vm0, %v3464_v57  ;;  %v2769_v7 = vadd.f32 %v7525_v22, %v8899_v14  ;;  %v3466_v22 = vld [vmem:[%s8699_s8 + $0x1c] sm:$0xf]  ;;  %v5674_v14 = vld [vmem:[%s8702_s11 + $0xe8] sm:$0xf0] }
 0x5fb   : > { %3546 = vmatpush.msra.mxu3 %v7660_v21  ;;  %v8894_v21 = vld [vmem:[#allocation75_spill] sm:$0xff]  ;;  %v3452_v20 = vadd.f32 %v3278_v25, %v2774_v45  ;;  %v2848_v25 = vadd.f32 %v7584_v1, %v8902_v51 }
 0x5fc   : > { %v3420_v39 = vadd.f32 %v3273_v63, %v2769_v7  ;;  %v8903_v63 = vld [vmem:[#allocation65_spill] sm:$0xff]  ;;  %v5608_v7 = vld [vmem:[%s8702_s11 + $0x60] sm:$0xf]  ;;  %v5666_v51 = vld [vmem:[%s8702_s11 + $0xd8] sm:$0xf0] }
 0x5fd   : > { %3547 = vmatpush.msra.mxu3 %v7635_v23  ;;  %v2715_v23 = vadd.f32 %v7687_v28, %v8894_v21  ;;  %v3401_v28 = vadd.f32 %v3214_v17, %v2710_v15  ;;  %v2845_v29 = vadd.f32 %v7575_v18, %v8903_v63  ;;  %v3440_v5 = vadd.f32 %v3352_v36, %v2848_v25  ;;  %v5799_v63 = vld [vmem:[%s8702_s11 + $0x54] sm:$0xf0] }
 0x5fe   : > { %v3216_v35 = vpop.f32.mrf.mxu2  ;;  %v2793_v17 = vadd.f32 %v7705_v55, %v7549_v9  ;;  %v2791_v18 = vadd.f32 %v7703_v52, %v7541_v54  ;;  %v2869_v54 = vadd.f32 %v7727_v46, %v7600_v47  ;;  %v5818_v47 = vld [vmem:[%s8702_s11 + $0xf4] sm:$0xf]  ;;  %v5616_v46 = vld [vmem:[%s8702_s11 + $0x70] sm:$0xf] }
 0x5ff   : > { %3548 = vmatpush.msra.mxu3 %v7613_v32  ;;  %v8895_v32 = vld [vmem:[#allocation74_spill] sm:$0xff]  ;;  %v3424_v60 = vadd.f32 %v3349_v41, %v2845_v29 }
 0x600   : > { %5545 = vmatmul.msk.f32.vlgmr.msra.gmra.mxu3 %vm665_vm0, %v3459_v12  ;;  %v2712_v12 = vadd.f32 %v7683_v42, %v8895_v32  ;;  %v3465_v42 = vld [vmem:[%s8699_s8 + $0x18] sm:$0xf]  ;;  %v5798_v29 = vld [vmem:[%s8702_s11 + $0x54] sm:$0xf] }
 0x601   : > { %5554 = vmatmul.msk.f32.vlgmr.msrb.gmra.mxu2 %vm665_vm0, %v3465_v42  ;;  %v8907_v32 = vld [vmem:[#allocation83_spill] sm:$0xff]  ;;  %v5605_v62 = vor.u32 %v5798_v29, %v5602_v44 }
 0x602   : > { %v3417_v11 = vadd.f32 %v3216_v35, %v2712_v12  ;;  %5557 = vmatmul.msk.f32.vlgmr.msra.gmra.mxu1 %vm665_vm0, %v3466_v22  ;;  %v8908_v12 = vld [vmem:[#allocation39_spill] sm:$0xff] }
 0x606   : > { %v3219_v40 = vpop.f32.mrf.mxu2 }
 0x607   : > { %v3433_v43 = vadd.f32 %v3219_v40, %v2715_v23 }
 0x60e   : > { %v3221_v10 = vpop.f32.mrf.mxu2 }
 0x60f   : > { %v3449_v0 = vadd.f32 %v3221_v10, %v2717_v50  ;;  %v8905_v50 = vld [vmem:[#allocation78_spill] sm:$0xff] }
 0x610   : > { %v2788_v31 = vadd.f32 %v7699_v27, %v8905_v50  ;;  %v2867_v27 = vadd.f32 %v7723_v26, %v7593_v2  ;;  %v5680_v2 = vld [vmem:[%s8702_s11 + $0xf0] sm:$0xf]  ;;  %v5682_v26 = vld [vmem:[%s8702_s11 + $0xf8] sm:$0xf0] }
 0x611   : > { %3613 = vmatpush.msrb.mxu3 %v3449_v0  ;;  %v5685_v38 = vor.u32 %v5818_v47, %v5682_v26  ;;  %v5642_v26 = vld [vmem:[%s8702_s11 + $0xa8] sm:$0xf0] }
 0x613   : > { %3614 = vmatpush.msrb.mxu3 %v3433_v43  ;;  %v2862_v43 = vadd.f32 %v8908_v12, %v8907_v32  ;;  %4066 = vmatpush.bf16.msrb.mxu1 %v5685_v38  ;;  %v5640_v32 = vld [vmem:[%s8702_s11 + $0xa0] sm:$0xf]  ;;  %v5809_v12 = vld [vmem:[%s8702_s11 + $0xa4] sm:$0xf0] }
 0x614   : > { %v5576_v38 = vld [vmem:[%s8702_s11 + $0x20] sm:$0xf] }
 0x615   : > { %3615 = vmatpush.msrb.mxu3 %v3417_v11  ;;  %v5803_v11 = vld [vmem:[%s8702_s11 + $0x74] sm:$0xf0] }
 0x616   : > { %v3290_v33 = vpop.f32.mrf.mxu2  ;;  %v5617_v45 = vor.u32 %v5803_v11, %v5616_v46 }
 0x617   : > { %3616 = vmatpush.msrb.mxu3 %v3401_v28  ;;  %v5618_v28 = vld [vmem:[%s8702_s11 + $0x78] sm:$0xf0] }
 0x618   : > { %5548 = vmatmul.msk.f32.vlgmr.msrb.gmra.mxu3 %vm665_vm0, %v7658_v19  ;;  %v3456_v19 = vadd.f32 %v3354_v48, %v2850_v53  ;;  %4027 = vmatpush.bf16.msra.mxu2 %v5617_v45  ;;  %v5610_v48 = vld [vmem:[%s8702_s11 + $0x68] sm:$0xf0]  ;;  %v5793_v45 = vld [vmem:[%s8702_s11 + $0x24] sm:$0xf0] }
 0x619   : > { %3678 = vmatpush.msra.mxu3 %v3452_v20  ;;  %v5816_v20 = vld [vmem:[%s8702_s11 + $0xe4] sm:$0xf] }
 0x61a   : > { %v5677_v6 = vor.u32 %v5816_v20, %v5674_v14  ;;  %v5807_v14 = vld [vmem:[%s8702_s11 + $0x94] sm:$0xf0] }
 0x61b   : > { %3679 = vmatpush.msra.mxu3 %v3436_v34  ;;  %v5801_v34 = vld [vmem:[%s8702_s11 + $0x64] sm:$0xf0] }
 0x61c   : > { %v5609_v4 = vor.u32 %v5801_v34, %v5608_v7  ;;  %4067 = vmatpush.bf16.msrb.mxu1 %v5677_v6  ;;  %v5806_v7 = vld [vmem:[%s8702_s11 + $0x94] sm:$0xf]  ;;  %v5634_v34 = vld [vmem:[%s8702_s11 + $0x98] sm:$0xf0] }
 0x61d   : > { %3680 = vmatpush.msra.mxu3 %v3420_v39  ;;  %v5800_v39 = vld [vmem:[%s8702_s11 + $0x64] sm:$0xf] }
 0x61e   : > { %v3292_v16 = vpop.f32.mrf.mxu2  ;;  %v5613_v53 = vor.u32 %v5800_v39, %v5610_v48  ;;  %4028 = vmatpush.bf16.msra.mxu2 %v5609_v4  ;;  %v5637_v4 = vor.u32 %v5806_v7, %v5634_v34 }
 0x61f   : > { %3681 = vmatpush.msra.mxu3 %v3404_v59  ;;  %v3421_v10 = vadd.f32 %v3292_v16, %v2788_v31  ;;  %v5815_v59 = vld [vmem:[%s8702_s11 + $0xd4] sm:$0xf0]  ;;  %v5600_v16 = vld [vmem:[%s8702_s11 + $0x50] sm:$0xf]  ;;  %v5592_v31 = vld [vmem:[%s8702_s11 + $0x40] sm:$0xf] }
 0x620   : > { %5551 = vmatmul.msk.f32.vlgmr.msra.gmra.mxu3 %vm665_vm0, %v3463_v61  ;;  %v8906_v61 = vld [vmem:[#allocation76_spill] sm:$0xff]  ;;  %v5665_v25 = vor.u32 %v5815_v59, %v5664_v58 }
 0x621   : > { %3768 = vmatpush.msrb.mxu3 %v3456_v19  ;;  %v2786_v24 = vadd.f32 %v7695_v3, %v8906_v61  ;;  %v2864_v3 = vadd.f32 %v7719_v13, %v7579_v56  ;;  %v5819_v56 = vld [vmem:[%s8702_s11 + $0xf4] sm:$0xf0]  ;;  %v5796_v61 = vld [vmem:[%s8702_s11 + $0x44] sm:$0xf]  ;;  %v5624_v58 = vld [vmem:[%s8702_s11 + $0x80] sm:$0xf] }
 0x622   : > { %v5681_v13 = vor.u32 %v5819_v56, %v5680_v2  ;;  %v5794_v2 = vld [vmem:[%s8702_s11 + $0x34] sm:$0xf]  ;;  %v5641_v56 = vor.u32 %v5809_v12, %v5640_v32  ;;  %v5804_v59 = vld [vmem:[%s8702_s11 + $0x84] sm:$0xf] }
 0x623   : > { %3769 = vmatpush.msrb.mxu3 %v3440_v5  ;;  %v3405_v21 = vadd.f32 %v3290_v33, %v2786_v24  ;;  %v5673_v33 = vor.u32 %v5817_v8, %v5672_v37  ;;  %v5601_v5 = vor.u32 %v5799_v63, %v5600_v16  ;;  %v5578_v37 = vld [vmem:[%s8702_s11 + $0x28] sm:$0xf0]  ;;  %v5632_v8 = vld [vmem:[%s8702_s11 + $0x90] sm:$0xf] }
 0x624   : > { %v5633_v6 = vor.u32 %v5807_v14, %v5632_v8 }
 0x625   : > { %3770 = vmatpush.msrb.mxu3 %v3424_v60  ;;  %v3507_v60 = vpop.f32.mrf.mxu1  ;;  %4029 = vmatpush.bf16.msra.mxu2 %v5601_v5 }
 0x626   : > { %v3295_v1 = vpop.f32.mrf.mxu2 }
 0x627   : > { %3771 = vmatpush.msrb.mxu3 %v3408_v49  ;;  %v3437_v41 = vadd.f32 %v3295_v1, %v2791_v18  ;;  %v5656_v49 = vld [vmem:[%s8702_s11 + $0xc0] sm:$0xf]  ;;  %v5813_v1 = vld [vmem:[%s8702_s11 + $0xc4] sm:$0xf0]  ;;  %v5658_v18 = vld [vmem:[%s8702_s11 + $0xc8] sm:$0xf0] }
 0x628   : > { %5555 = vmatmul.msk.f32.vlgmr.msrb.gmra.mxu3 %vm665_vm0, %v3465_v42 }
 0x629   : > { %4040 = vmatpush.bf16.msra.mxu3 %v5681_v13  ;;  %v5586_v13 = vld [vmem:[%s8702_s11 + $0x38] sm:$0xf0] }
 0x62a   : > { %v5589_v46 = vor.u32 %v5794_v2, %v5586_v13 }
 0x62d   : > { %4041 = vmatpush.bf16.msra.mxu3 %v5673_v33 }
 0x62e   : > { %v3297_v35 = vpop.f32.mrf.mxu2 }
 0x62f   : > { %v3453_v40 = vadd.f32 %v3297_v35, %v2793_v17  ;;  %v5812_v17 = vld [vmem:[%s8702_s11 + $0xc4] sm:$0xf]  ;;  %v5657_v35 = vor.u32 %v5813_v1, %v5656_v49 }
 0x630   : > { %v5661_v50 = vor.u32 %v5812_v17, %v5658_v18 }
 0x631   : > { %3703 = vmatpush.msra.mxu0 %v3453_v40  ;;  %4042 = vmatpush.bf16.msra.mxu3 %v5665_v25  ;;  %v5626_v25 = vld [vmem:[%s8702_s11 + $0x88] sm:$0xf0] }
 0x633   : > { %3704 = vmatpush.msra.mxu0 %v3437_v41  ;;  %v5797_v41 = vld [vmem:[%s8702_s11 + $0x44] sm:$0xf0] }
 0x634   : > { %v5593_v24 = vor.u32 %v5797_v41, %v5592_v31  ;;  %v5568_v31 = vld [vmem:[%s8702_s11 + $0x10] sm:$0xf]  ;;  %v5791_v41 = vld [vmem:[%s8702_s11 + $0x14] sm:$0xf0] }
 0x635   : > { %3705 = vmatpush.msra.mxu0 %v3421_v10  ;;  %4043 = vmatpush.bf16.msra.mxu3 %v5657_v35  ;;  %v5594_v10 = vld [vmem:[%s8702_s11 + $0x48] sm:$0xf0] }
 0x636   : > { %v3366_v23 = vpop.f32.mrf.mxu2  ;;  %4030 = vmatpush.bf16.msra.mxu2 %v5593_v24 }
 0x637   : > { %3706 = vmatpush.msra.mxu0 %v3405_v21  ;;  %v3409_v15 = vadd.f32 %v3366_v23, %v2862_v43  ;;  %v5648_v21 = vld [vmem:[%s8702_s11 + $0xb0] sm:$0xf]  ;;  %v5811_v23 = vld [vmem:[%s8702_s11 + $0xb4] sm:$0xf0]  ;;  %v5808_v43 = vld [vmem:[%s8702_s11 + $0xa4] sm:$0xf] }
 0x638   : > { %5552 = vmatmul.msk.f32.vlgmr.msra.gmra.mxu0 %vm665_vm0, %v3464_v57  ;;  %v5802_v57 = vld [vmem:[%s8702_s11 + $0x74] sm:$0xf]  ;;  %v5645_v11 = vor.u32 %v5808_v43, %v5642_v26 }
 0x639   : > { %v5621_v42 = vor.u32 %v5802_v57, %v5618_v28  ;;  %v5577_v28 = vor.u32 %v5793_v45, %v5576_v38 }
 0x63e   : > { %v3368_v9 = vpop.f32.mrf.mxu2 }
 0x63f   : > { %v3425_v30 = vadd.f32 %v3368_v9, %v2864_v3  ;;  %v5597_v9 = vor.u32 %v5796_v61, %v5594_v10  ;;  %v5790_v61 = vld [vmem:[%s8702_s11 + $0x14] sm:$0xf]  ;;  %v5569_v10 = vor.u32 %v5791_v41, %v5568_v31 }
 0x646   : > { %v3371_v55 = vpop.f32.mrf.mxu2 }
 0x647   : > { %v3441_v36 = vadd.f32 %v3371_v55, %v2867_v27  ;;  %v5649_v55 = vor.u32 %v5811_v23, %v5648_v21  ;;  %v5570_v21 = vld [vmem:[%s8702_s11 + $0x18] sm:$0xf0] }
 0x648   : > { %v5573_v23 = vor.u32 %v5790_v61, %v5570_v21 }
 0x649   : > { %4044 = vmatpush.bf16.msra.mxu3 %v5649_v55  ;;  %v5789_v55 = vld [vmem:[%s8702_s11 + $0x4] sm:$0xf0] }
 0x64d   : > { %4045 = vmatpush.bf16.msra.mxu3 %v5641_v56 }
 0x64e   : > { %v3373_v52 = vpop.f32.mrf.mxu2 }
 0x64f   : > { %v3457_v0 = vadd.f32 %v3373_v52, %v2869_v54  ;;  %v5810_v54 = vld [vmem:[%s8702_s11 + $0xb4] sm:$0xf]  ;;  %v5650_v52 = vld [vmem:[%s8702_s11 + $0xb8] sm:$0xf0] }
 0x650   : > { %v5653_v27 = vor.u32 %v5810_v54, %v5650_v52  ;;  %v5788_v54 = vld [vmem:[%s8702_s11 + $0x4] sm:$0xf] }
 0x651   : > { %3793 = vmatpush.msrb.mxu0 %v3457_v0  ;;  %v7939_v0 = vpop.f32.mrf.mxu1  ;;  %4046 = vmatpush.bf16.msra.mxu3 %v5633_v6 }
 0x653   : > { %3794 = vmatpush.msrb.mxu0 %v3441_v36 }
 0x655   : > { %3795 = vmatpush.msrb.mxu0 %v3425_v30  ;;  %v5584_v30 = vld [vmem:[%s8702_s11 + $0x30] sm:$0xf] }
 0x656   : > { %v7941_v36 = vpop.f32.mrf.mxu2 }
 0x657   : > { %3796 = vmatpush.msrb.mxu0 %v3409_v15  ;;  %v5795_v15 = vld [vmem:[%s8702_s11 + $0x34] sm:$0xf0] }
 0x658   : > { %5556 = vmatmul.msk.f32.vlgmr.msrb.gmra.mxu0 %vm665_vm0, %v3466_v22  ;;  %v5814_v22 = vld [vmem:[%s8702_s11 + $0xd4] sm:$0xf]  ;;  %v5585_v47 = vor.u32 %v5795_v15, %v5584_v30  ;;  %vm8742_vm0 = vcmask 125952  }
 0x659   : > { %4053 = vmatpush.bf16.msra.mxu0 %v5621_v42  ;;  %v5669_v19 = vor.u32 %v5814_v22, %v5666_v51  ;;  %v3638_v57 = vpop.f32.mrf.mxu1  ;;  %v5792_v42 = vld [vmem:[%s8702_s11 + $0x24] sm:$0xf] }
 0x65a   : > { %4031 = vmatpush.bf16.msra.mxu2 %v5585_v47  ;;  %v5581_v33 = vor.u32 %v5792_v42, %v5578_v37 }
 0x65b   : > { %4068 = vmatpush.bf16.msrb.mxu1 %v5669_v19  ;;  %v5629_v19 = vor.u32 %v5804_v59, %v5626_v25 }
 0x65d   : > { %4054 = vmatpush.bf16.msra.mxu0 %v5613_v53  ;;  %v5805_v53 = vld [vmem:[%s8702_s11 + $0x84] sm:$0xf0] }
 0x65e   : > { %v3593_v48 = vpop.f32.mrf.mxu2  ;;  %4032 = vmatpush.bf16.msra.mxu2 %v5577_v28  ;;  %v5625_v51 = vor.u32 %v5805_v53, %v5624_v58 }
 0x65f   : > { %4069 = vmatpush.bf16.msrb.mxu1 %v5661_v50 }
 0x660   : > { %4047 = vmatpush.bf16.msra.mxu3 %v5625_v51 }
 0x661   : > { %4055 = vmatpush.bf16.msra.mxu0 %v5605_v62  ;;  %v3823_v62 = vld [vmem:[#allocation9] sm:$0x3] }
 0x662   : > { %v3826_v17 = vperm.slane %v3823_v62, 1  ;;  %4033 = vmatpush.bf16.msra.mxu2 %v5569_v10  ;;  %v3825_v26 = vperm.slane %v3823_v62, 0 }
 0x663   : > { %4070 = vmatpush.bf16.msrb.mxu1 %v5653_v27  ;;  %v5562_v27 = vld [vmem:[%s8702_s11 + $0x8] sm:$0xf0] }
 0x665   : > { %4056 = vmatpush.bf16.msra.mxu0 %v5597_v9  ;;  %v5560_v9 = vld [vmem:[%s8702_s11] sm:$0xf] }
 0x666   : > { %v5561_v52 = vor.u32 %v5789_v55, %v5560_v9  ;;  %v3663_v43 = vpop.f32.mrf.mxu2 }
 0x667   : > { %4071 = vmatpush.bf16.msrb.mxu1 %v5645_v11 }
 0x668   : > { %4034 = vmatpush.bf16.msra.mxu2 %v5561_v52 }
 0x669   : > { %4057 = vmatpush.bf16.msra.mxu0 %v5589_v46 }
 0x66b   : > { %4072 = vmatpush.bf16.msrb.mxu1 %v5637_v4 }
 0x66d   : > { %4058 = vmatpush.bf16.msra.mxu0 %v5581_v33 }
 0x66f   : > { %4073 = vmatpush.bf16.msrb.mxu1 %v5629_v19 }
 0x671   : > { %4059 = vmatpush.bf16.msra.mxu0 %v5573_v23 }
 0x677   : > { %v3728_v63 = vpop.f32.mrf.mxu1 }
 0x67b   : > { %v7913_v40 = vpop.f32.mrf.mxu3 }
 0x67c   : > { %v3531_v32 = vadd.f32 %v7941_v36, %v7913_v40 }
 0x67e   : > { %v3596_v12 = vadd.f32 %v7939_v0, %v3531_v32  ;;  %v4079_v0 = vld [vmem:[#allocation11] sm:$0x3] }
 0x67f   : > { %v3818_v49 = vpop.f32.mrf.mxu1  ;;  %v4082_v37 = vperm.slane %v4079_v0, 1  ;;  %v4081_v14 = vperm.slane %v4079_v0, 0 }
 0x683   : > { %v3550_v3 = vpop.f32.mrf.mxu3 }
 0x684   : > { %v3551_v20 = vadd.f32 %v3550_v3, %v3507_v60  ;;  %v5565_v3 = vor.u32 %v5788_v54, %v5562_v27  ;;  %v3753_v47 = vpop.f32.mrf.mxu2  ;;  %v8911_v54 = vld [vmem:[#allocation79_spill] sm:$0xff] }
 0x686   : > { %v3597_v22 = vadd.f32 %v3593_v48, %v3551_v20  ;;  %4060 = vmatpush.bf16.msra.mxu0 %v5565_v3 }
 0x688   : > { %v3642_v16 = vadd.f32 %v3638_v57, %v3597_v22 }
 0x69b   : > { %v3618_v39 = vpop.f32.mrf.mxu3 }
 0x69c   : > { %v3641_v30 = vadd.f32 %v3618_v39, %v3596_v12 }
 0x69e   : > { %v3686_v15 = vadd.f32 %v3663_v43, %v3641_v30 }
 0x6a3   : > { %v3683_v29 = vpop.f32.mrf.mxu3 }
 0x6a4   : > { %v3687_v5 = vadd.f32 %v3683_v29, %v3642_v16 }
 0x6a6   : > { %v3732_v44 = vadd.f32 %v3728_v63, %v3687_v5 }
 0x6ab   : > { %v3773_v60 = vpop.f32.mrf.mxu3 }
 0x6ac   : > { %v3777_v1 = vadd.f32 %v3773_v60, %v3732_v44 }
 0x6ae   : > { %v3822_v35 = vadd.f32 %v3818_v49, %v3777_v1 }
 0x6b0   : > { %v3830_v18 = vadd.f32 %v3826_v17, %v3822_v35  ;;  %v8909_v35 = vld [vmem:[#allocation53_spill] sm:$0xff] }
 0x6b2   : > { %v3832_v50 = vmax.f32 %v3830_v18, 0.0 }
 0x6b4   : > { %v3834_v24 = vpack.c.bf16 %v3832_v50, %v3832_v50 }
 0x6b5   : > { %v3708_v2 = vpop.f32.mrf.mxu0 }
 0x6b6   : > { %4048 = vmatmul.bf16.vlgmr.msra.gmra.mxu3 %v3834_v24  ;;  %4074 = vmatmul.bf16.vlgmr.msrb.gmra.mxu1 %v3834_v24  ;;  %v3731_v56 = vadd.f32 %v3708_v2, %v3686_v15  ;;  %v8910_v24 = vld [vmem:[#allocation77_spill] sm:$0xff] }
 0x6b8   : > { %v3776_v13 = vadd.f32 %v3753_v47, %v3731_v56 }
 0x6d5   : > { %v3798_v46 = vpop.f32.mrf.mxu0 }
 0x6d6   : > { %v3821_v11 = vadd.f32 %v3798_v46, %v3776_v13 }
 0x6d8   : > { %v3829_v38 = vadd.f32 %v3825_v26, %v3821_v11  ;;  %v8912_v26 = vld [vmem:[#allocation81_spill] sm:$0xff] }
 0x6da   : > { %v3831_v45 = vmax.f32 %v3829_v38, 0.0 }
 0x6dc   : > { %v3833_v57 = vpack.c.bf16 %v3831_v45, %v3831_v45 }
 0x6de   : > { %4035 = vmatmul.bf16.vlgmr.msra.gmra.mxu2 %v3833_v57  ;;  %4061 = vmatmul.bf16.vlgmr.msra.gmra.mxu0 %v3833_v57  ;;  %v8913_v57 = vld [vmem:[#allocation84_spill] sm:$0xff] }
 0x733   : > { %v4075_v28 = vpop.f32.mrf.mxu1 }
 0x739   : > { %v4049_v42 = vpop.f32.mrf.mxu3 }
 0x73b   : > { %v4077_v40 = vpop.f32.mrf.mxu1 }
 0x741   : > { %v4051_v36 = vpop.f32.mrf.mxu3 }
 0x742   : > { %v8914_v36 = vld [vmem:[#allocation85_spill] sm:$0xff] }
 0x75b   : > { %v4062_v8 = vpop.f32.mrf.mxu0 }
 0x75c   : > { %v4076_v20 = vadd.f32 %v4075_v28, %v4062_v8 }
 0x75e   : > { %v8030_v33 = vadd.f32 %v4082_v37, %v4076_v20  ;;  %v8915_v37 = vld [vmem:[#allocation80_spill] sm:$0xff] }
 0x760   : > { %v4414_v7 = vsel %vm8742_vm0, %v8030_v33, -inf  ;;  %v4595_v34 = vsel %vm4289_vm6, %v8030_v33, -inf  ;;  %v4520_v6 = vsel %vm4206_vm7, %v8030_v33, -inf  ;;  %v4446_v53 = vsel %vm4123_vm8, %v8030_v33, -inf }
 0x761   : > { %v4036_v4 = vpop.f32.mrf.mxu2  ;;  %4415 = vmax.xlane.f32.xlu1 %v4414_v7  ;;  %4596 = vmax.xlane.f32.xlu0 %v4595_v34  ;;  %v4669_v51 = vsel %vm4371_vm9, %v8030_v33, -inf  ;;  %v4483_v25 = vsel %vm4165_vm10, %v8030_v33, -inf  ;;  %v4559_v63 = vsel %vm4249_vm11, %v8030_v33, -inf  ;;  %v4632_v44 = vsel %vm4330_vm12, %v8030_v33, -inf  ;;  %v8916_v34 = vld [vmem:[#allocation82_spill] sm:$0xff] }
 0x762   : > { %v4050_v39 = vadd.f32 %v4049_v42, %v4036_v4  ;;  %4521 = vmax.xlane.f32.xlu2 %v4520_v6 }
 0x763   : > { %v4064_v48 = vpop.f32.mrf.mxu0 }
 0x764   : > { %v8038_v58 = vadd.f32 %v4081_v14, %v4050_v39 }
 0x766   : > { %v4166_v59 = vsel %vm4165_vm10, %v8038_v58, -inf  ;;  %v4207_v19 = vsel %vm4206_vm7, %v8038_v58, -inf  ;;  %v4090_v16 = vsel %vm8742_vm0, %v8038_v58, -inf  ;;  %v4290_v29 = vsel %vm4289_vm6, %v8038_v58, -inf }
 0x767   : > { %v4124_v5 = vsel %vm4123_vm8, %v8038_v58, -inf  ;;  %v4250_v62 = vsel %vm4249_vm11, %v8038_v58, -inf  ;;  %v4331_v60 = vsel %vm4330_vm12, %v8038_v58, -inf  ;;  %v4372_v49 = vsel %vm4371_vm9, %v8038_v58, -inf }
 0x769   : > { %v4038_v22 = vpop.f32.mrf.mxu2  ;;  %4447 = vmax.xlane.f32.xlu1 %v4446_v53  ;;  %4167 = vmax.xlane.f32.xlu0 %v4166_v59 }
 0x76a   : > { %4670 = vmax.xlane.f32.xlu2 %v4669_v51 }
 0x771   : > { %4484 = vmax.xlane.f32.xlu1 %v4483_v25  ;;  %4208 = vmax.xlane.f32.xlu0 %v4207_v19 }
 0x772   : > { %4091 = vmax.xlane.f32.xlu2 %v4090_v16 }
 0x779   : > { %4560 = vmax.xlane.f32.xlu1 %v4559_v63  ;;  %4291 = vmax.xlane.f32.xlu0 %v4290_v29 }
 0x77a   : > { %4125 = vmax.xlane.f32.xlu2 %v4124_v5 }
 0x781   : > { %4633 = vmax.xlane.f32.xlu1 %v4632_v44 }
 0x789   : > { %4251 = vmax.xlane.f32.xlu1 %v4250_v62 }
 0x791   : > { %4332 = vmax.xlane.f32.xlu1 %v4331_v60 }
 0x799   : > { %4373 = vmax.xlane.f32.xlu1 %v4372_v49 }
 0x7d4   : > { %v8066_v1 = vpop.xlane.xlu1 %4415  ;;  %v8074_v31 = vpop.xlane.xlu0 %4596 }
 0x7d5   : > { %vm4438_vm13 = vcmp.ge.f32.partialorder %v8030_v33, %v8066_v1  ;;  %v8070_v17 = vpop.xlane.xlu2 %4521  ;;  %v4598_v60 = vsub.f32 %v8030_v33, %v8074_v31 }
 0x7d6   : > { %v4439_v18 = vsel %vm4438_vm13, %v8909_v35, 16.0  ;;  %v4523_v48 = vsub.f32 %v8030_v33, %v8070_v17 }
 0x7d7   : > { %v4440_v50 = vsel %vm8742_vm0, %v4439_v18, inf  ;;  %v4599_v18 = vmul.f32 1.442695, %v4598_v60 }
 0x7d8   : > { %4441 = vmin.xlane.f32.xlu0 %v4440_v50  ;;  %v4524_v22 = vmul.f32 1.442695, %v4523_v48 }
 0x7dc   : > { %v4448_v41 = vpop.xlane.xlu1 %4447  ;;  %v8081_v9 = vpop.xlane.xlu0 %4167 }
 0x7dd   : > { %vm4474_vm14 = vcmp.ge.f32.partialorder %v8030_v33, %v4448_v41  ;;  %v8077_v61 = vpop.xlane.xlu2 %4670  ;;  %vm4194_vm2 = vcmp.ge.f32.partialorder %v8038_v58, %v8081_v9  ;;  %v4449_v53 = vsub.f32 %v8030_v33, %v4448_v41 }
 0x7de   : > { %v4475_v10 = vsel %vm4474_vm14, %v8910_v24, 16.0  ;;  %v4198_v43 = vsel %vm4194_vm2, %v8911_v54, 16.0  ;;  %v4672_v44 = vsub.f32 %v8030_v33, %v8077_v61 }
 0x7df   : > { %v4476_v21 = vsel %vm4123_vm8, %v4475_v10, inf  ;;  %v4199_v2 = vsel %vm4165_vm10, %v4198_v43, inf  ;;  %v4450_v51 = vmul.f32 1.442695, %v4449_v53 }
 0x7e0   : > { %4477 = vmin.xlane.f32.xlu1 %v4476_v21  ;;  %v4673_v49 = vmul.f32 1.442695, %v4672_v44 }
 0x7e4   : > { %v4485_v23 = vpop.xlane.xlu1 %4484  ;;  %v8101_v15 = vpop.xlane.xlu0 %4208 }
 0x7e5   : > { %vm4511_vm15 = vcmp.ge.f32.partialorder %v8030_v33, %v4485_v23  ;;  %v8084_v55 = vpop.xlane.xlu2 %4091  ;;  %vm4235_vm4 = vcmp.ge.f32.partialorder %v8038_v58, %v8101_v15  ;;  %v4486_v19 = vsub.f32 %v8030_v33, %v4485_v23  ;;  %v4210_v50 = vsub.f32 %v8038_v58, %v8101_v15 }
 0x7e6   : > { %vm4115_vm1 = vcmp.ge.f32.partialorder %v8038_v58, %v8084_v55  ;;  %v4512_v52 = vsel %vm4511_vm15, %v8911_v54, 16.0  ;;  %v4239_v46 = vsel %vm4235_vm4, %v8912_v26, 16.0 }
 0x7e7   : > { %v4513_v27 = vsel %vm4165_vm10, %v4512_v52, inf  ;;  %v4116_v3 = vsel %vm4115_vm1, %v8909_v35, 16.0  ;;  %v4240_v11 = vsel %vm4206_vm7, %v4239_v46, inf  ;;  %v4487_v5 = vmul.f32 1.442695, %v4486_v19 }
 0x7e8   : > { %4514 = vmin.xlane.f32.xlu2 %v4513_v27  ;;  %v4117_v32 = vsel %vm8742_vm0, %v4116_v3, inf  ;;  %v4211_v10 = vmul.f32 1.442695, %v4210_v50  ;;  %v4417_v27 = vsub.f32 %v8030_v33, %v8066_v1 }
 0x7e9   : > { %4118 = vmin.xlane.f32.xlu1 %v4117_v32 }
 0x7ea   : > { %v4418_v15 = vmul.f32 1.442695, %v4417_v27 }
 0x7ec   : > { %v8094_v12 = vpop.xlane.xlu1 %4560  ;;  %v8113_v45 = vpop.xlane.xlu0 %4291 }
 0x7ed   : > { %v8097_v30 = vpop.xlane.xlu2 %4125  ;;  %v4562_v39 = vsub.f32 %v8030_v33, %v8094_v12 }
 0x7ee   : > { %vm4152_vm3 = vcmp.ge.f32.partialorder %v8038_v58, %v8097_v30  ;;  %v4127_v1 = vsub.f32 %v8038_v58, %v8097_v30  ;;  %v4293_v30 = vsub.f32 %v8038_v58, %v8113_v45 }
 0x7ef   : > { %v4157_v56 = vsel %vm4152_vm3, %v8910_v24, 16.0  ;;  %v4563_v59 = vmul.f32 1.442695, %v4562_v39 }
 0x7f0   : > { %4200 = vmin.xlane.f32.xlu2 %v4199_v2  ;;  %v4158_v47 = vsel %vm4123_vm8, %v4157_v56, inf  ;;  %vm4318_vm8 = vcmp.ge.f32.partialorder %v8038_v58, %v8113_v45  ;;  %v4128_v46 = vmul.f32 1.442695, %v4127_v1  ;;  %v4294_v48 = vmul.f32 1.442695, %v4293_v30 }
 0x7f1   : > { %4159 = vmin.xlane.f32.xlu0 %v4158_v47  ;;  %v4322_v0 = vsel %vm4318_vm8, %v8914_v36, 16.0  ;;  %5982 = vpow2.f32 %v4563_v59 }
 0x7f2   : > { %v4323_v20 = vsel %vm4289_vm6, %v4322_v0, inf  ;;  %5984 = vpow2.f32 %v4524_v22 }
 0x7f3   : > { %5986 = vpow2.f32 %v4450_v51 }
 0x7f4   : > { %v8108_v13 = vpop.xlane.xlu1 %4633 }
 0x7f5   : > { %v4635_v25 = vsub.f32 %v8030_v33, %v8108_v13 }
 0x7f7   : > { %v4636_v16 = vmul.f32 1.442695, %v4635_v25  ;;  %v5983_v63 = vpop.eup %5982 }
 0x7f8   : > { %v5985_v29 = vpop.eup %5984 }
 0x7f9   : > { %4241 = vmin.xlane.f32.xlu0 %v4240_v11  ;;  %5988 = vpow2.f32 %v4636_v16  ;;  %v5987_v62 = vpop.eup %5986 }
 0x7fa   : > { %5990 = vpow2.f32 %v4487_v5 }
 0x7fb   : > { %5992 = vpow2.f32 %v4673_v49 }
 0x7fc   : > { %v4252_v38 = vpop.xlane.xlu1 %4251  ;;  %5994 = vpow2.f32 %v4599_v18 }
 0x7fd   : > { %vm4278_vm5 = vcmp.ge.f32.partialorder %v8038_v58, %v4252_v38  ;;  %v4253_v24 = vsub.f32 %v8038_v58, %v4252_v38  ;;  %5996 = vpow2.f32 %v4211_v10  ;;  %v4169_v38 = vsub.f32 %v8038_v58, %v8081_v9 }
 0x7fe   : > { %v4282_v28 = vsel %vm4278_vm5, %v8913_v57, 16.0 }
 0x7ff   : > { %v4283_v42 = vsel %vm4249_vm11, %v4282_v28, inf  ;;  %v5989_v35 = vpop.eup %5988  ;;  %v4254_v23 = vmul.f32 1.442695, %v4253_v24  ;;  %v4170_v0 = vmul.f32 1.442695, %v4169_v38 }
 0x800   : > { %4284 = vmin.xlane.f32.xlu2 %v4283_v42  ;;  %v5991_v41 = vpop.eup %5990  ;;  %v4093_v42 = vsub.f32 %v8038_v58, %v8084_v55 }
 0x801   : > { %v5993_v21 = vpop.eup %5992  ;;  %5998 = vpow2.f32 %v4254_v23 }
 0x802   : > { %v5995_v54 = vpop.eup %5994 }
 0x803   : > { %v5997_v3 = vpop.eup %5996 }
 0x804   : > { %v4333_v40 = vpop.xlane.xlu1 %4332 }
 0x805   : > { %vm4359_vm10 = vcmp.ge.f32.partialorder %v8038_v58, %v4333_v40  ;;  %v4334_v52 = vsub.f32 %v8038_v58, %v4333_v40 }
 0x806   : > { %v4363_v8 = vsel %vm4359_vm10, %v8915_v37, 16.0 }
 0x807   : > { %v4364_v14 = vsel %vm4330_vm12, %v4363_v8, inf  ;;  %v4335_v32 = vmul.f32 1.442695, %v4334_v52  ;;  %v5999_v43 = vpop.eup %5998 }
 0x808   : > { %4324 = vmin.xlane.f32.xlu2 %v4323_v20  ;;  %4365 = vmin.xlane.f32.xlu1 %v4364_v14  ;;  %v4094_v20 = vmul.f32 1.442695, %v4093_v42  ;;  %v8920_v14 = vld [vmem:[#allocation52_spill] sm:$0xff] }
 0x809   : > { %6000 = vpow2.f32 %v4335_v32  ;;  %vm4120_vm14 = vcmp.eq.s32.totalorder %v8920_v14, 0  ;;  %vm4161_vm15 = vcmp.eq.s32.totalorder %v8920_v14, 1  ;;  %vm8743_vm1 = vcmp.eq.s32.totalorder %v8920_v14, 2 }
 0x80a   : > { %6002 = vpow2.f32 %v4418_v15  ;;  %vm8741_vm2 = vcmp.eq.s32.totalorder %v8920_v14, 3  ;;  %vm4286_vm3 = vcmp.eq.s32.totalorder %v8920_v14, 4  ;;  %vm4326_vm4 = vcmp.eq.s32.totalorder %v8920_v14, 5 }
 0x80b   : > { %6004 = vpow2.f32 %v4128_v46  ;;  %vm4367_vm5 = vcmp.eq.s32.totalorder %v8920_v14, 6  ;;  %vm4408_vm8 = vcmp.eq.s32.totalorder %v8920_v14, 7  ;;  %vm4443_vm10 = vcmp.eq.s32.totalorder %v8920_v14, 8 }
 0x80c   : > { %v8124_v7 = vpop.xlane.xlu1 %4373  ;;  %6006 = vpow2.f32 %v4170_v0 }
 0x80d   : > { %vm4400_vm13 = vcmp.ge.f32.partialorder %v8038_v58, %v8124_v7  ;;  %6008 = vpow2.f32 %v4094_v20  ;;  %v4375_v25 = vsub.f32 %v8038_v58, %v8124_v7 }
 0x80e   : > { %v4404_v6 = vsel %vm4400_vm13, %v8916_v34, 16.0  ;;  %6010 = vpow2.f32 %v4294_v48  ;;  %vm4479_vm13 = vcmp.eq.s32.totalorder %v8920_v14, 9 }
 0x80f   : > { %v4405_v4 = vsel %vm4371_vm9, %v4404_v6, inf  ;;  %v6001_v2 = vpop.eup %6000 }
 0x810   : > { %4406 = vmin.xlane.f32.xlu0 %v4405_v4  ;;  %v6003_v56 = vpop.eup %6002 }
 0x811   : > { %v4420_v47 = vsel %vm8742_vm0, %v6003_v56, 0.0  ;;  %v6005_v8 = vpop.eup %6004 }
 0x812   : > { %v6007_v59 = vpop.eup %6006 }
 0x813   : > { %v6009_v51 = vpop.eup %6008 }
 0x814   : > { %v6011_v44 = vpop.eup %6010 }
 0x820   : > { %4566 = vrot.lane.b32.xlu2 %v5983_v63, %s6343_s16  ;;  %v4096_v63 = vsel %vm8742_vm0, %v6009_v51, 0.0 }
 0x821   : > { %4527 = vrot.lane.b32.xlu1 %v5985_v29, %s6350_s24  ;;  %v4376_v29 = vmul.f32 1.442695, %v4375_v25 }
 0x823   : > { %6012 = vpow2.f32 %v4376_v29 }
 0x824   : > { %4453 = vrot.lane.b32.xlu0 %v5987_v62, %s6348_s14 }
 0x829   : > { %4639 = vrot.lane.b32.xlu1 %v5989_v35, %s6347_s15  ;;  %v6013_v7 = vpop.eup %6012 }
 0x82c   : > { %4490 = vrot.lane.b32.xlu0 %v5991_v41, %s8917_s25 }
 0x831   : > { %4676 = vrot.lane.b32.xlu1 %v5993_v21, %s8918_s18 }
 0x834   : > { %4602 = vrot.lane.b32.xlu0 %v5995_v54, %s8919_s26 }
 0x839   : > { %4214 = vrot.lane.b32.xlu1 %v5997_v3, %s6350_s24  ;;  %s8921_s24 = scalar_lea.vmem [#allocation12], %s7582_s2 }
 0x83a   : > { %s4733_s23 = sshll.u32 %s8921_s24, 4  ;;  %s4734_s23 = int_to_ptr.vmem [resolvable:$true] %s4733_s23 }
 0x83c   : > { %4257 = vrot.lane.b32.xlu0 %v5999_v43, %s6343_s16 }
 0x844   : > { %4338 = vrot.lane.b32.xlu0 %v6001_v2, %s6347_s15 }
 0x849   : > { %4421 = vadd.xlane.f32.xlu2 %v4420_v47 }
 0x84b   : > { %v4442_v40 = vpop.xlane.xlu0 %4441 }
 0x84c   : > { %v4444_v27 = vsel %vm4443_vm10, %v4442_v40, 0.0 }
 0x853   : > { %v8161_v11 = vpop.xlane.xlu1 %4477 }
 0x854   : > { %v4480_v32 = vsel %vm4479_vm13, %v8161_v11, 0.0 }
 0x85b   : > { %v8165_v28 = vpop.xlane.xlu2 %4514 }
 0x85c   : > { %v4119_v6 = vpop.xlane.xlu1 %4118 }
 0x85d   : > { %v4121_v4 = vsel %vm4120_vm14, %v4119_v6, 0.0 }
 0x861   : > { %4131 = vrot.lane.b32.xlu2 %v6005_v8, %s6348_s14  ;;  %s4731_s14 = scalar_lea.hbm %s8704_s13, %s6458_s5 }
 0x862   : > { %s4735_s20 = sshll.u32 %s4731_s14, 4  ;;  %s4736_s20 = int_to_ptr.hbm [resolvable:$true] %s4735_s20 }
 0x863   : > { %v4201_v55 = vpop.xlane.xlu2 %4200  ;;  %s6210_s28 = sshra.s32 %s4736_s20, 4  ;;  %s6211_s28 = int_to_ptr.hbm [resolvable:$true] %s6210_s28 }
 0x864   : > { %v4160_v9 = vpop.xlane.xlu0 %4159  ;;  %v4203_v45 = vsel %vm8743_vm1, %v4201_v55, 0.0  ;;  %s6212_s19 = scalar_lea.hbm %s6211_s28, 1  ;;  %p6217_p3 = scmp.lt.s32.totalorder %s6211_s28, %s8704_s13 }
 0x865   : > { %v4162_v39 = vsel %vm4161_vm15, %v4160_v9, 0.0  ;;  %p6213_p0 = scmp.ne.s32.totalorder %s6211_s28, %s6212_s19  ;;  %p6218_p4 = scmp.lt.s32.totalorder %s6216_s17, %s6212_s19 }
 0x866   : > { %v4163_v53 = vadd.f32 %v4162_v39, %v4121_v4 }
 0x867   : > { %p6214_p1 = pnand %p6213_p0, %p6477_p5  ;;  %p6219_p7 = por %p6218_p4, %p6217_p3 }
 0x868   : > { %v4204_v22 = vadd.f32 %v4203_v45, %v4163_v53 }
 0x869   : > { %4173 = vrot.lane.b32.xlu2 %v6007_v59, %s8917_s25  ;;  %p6215_p2 = pneg %p6214_p1 }
 0x86b   : > { %p6220_p8 = pnand %p6219_p7, %p6215_p2 }
 0x86c   : > { %v4242_v19 = vpop.xlane.xlu0 %4241 }
 0x86d   : > { %v4244_v16 = vsel %vm8741_vm2, %v4242_v19, 0.0 }
 0x86e   : > { %v4245_v5 = vadd.f32 %v4244_v16, %v4204_v22  ;;  %4097 = vadd.xlane.f32.xlu0 %v4096_v63 }
 0x871   : > { %4297 = vrot.lane.b32.xlu2 %v6011_v44, %s8919_s26 }
 0x873   : > { %v4285_v62 = vpop.xlane.xlu2 %4284 }
 0x874   : > { %v4287_v60 = vsel %vm4286_vm3, %v4285_v62, 0.0  ;;  %vm4516_vm3 = vcmp.eq.s32.totalorder %v8920_v14, 10 }
 0x875   : > { %v4288_v58 = vadd.f32 %v4287_v60, %v4245_v5  ;;  %v4517_v15 = vsel %vm4516_vm3, %v8165_v28, 0.0 }
 0x879   : > { %4379 = vrot.lane.b32.xlu2 %v6013_v7, %s8918_s18 }
 0x87b   : > { %v4366_v49 = vpop.xlane.xlu1 %4365  ;;  %v4325_v35 = vpop.xlane.xlu2 %4324 }
 0x87c   : > { %v4327_v18 = vsel %vm4326_vm4, %v4325_v35, 0.0  ;;  %v4368_v41 = vsel %vm4367_vm5, %v4366_v49, 0.0  ;;  %vm4548_vm4 = vcmp.ge.f32.partialorder %v8030_v33, %v8070_v17  ;;  %vm4623_vm5 = vcmp.ge.f32.partialorder %v8030_v33, %v8074_v31 }
 0x87d   : > { %v4328_v50 = vadd.f32 %v4327_v18, %v4288_v58  ;;  %v4549_v46 = vsel %vm4548_vm4, %v8912_v26, 16.0  ;;  %v4624_v30 = vsel %vm4623_vm5, %v8914_v36, 16.0 }
 0x87e   : > { %v4550_v11 = vsel %vm4206_vm7, %v4549_v46, inf  ;;  %v4625_v6 = vsel %vm4289_vm6, %v4624_v30, inf  ;;  %vm4587_vm6 = vcmp.ge.f32.partialorder %v8030_v33, %v8094_v12  ;;  %vm4660_vm7 = vcmp.ge.f32.partialorder %v8030_v33, %v8108_v13 }
 0x87f   : > { %v4369_v24 = vadd.f32 %v4368_v41, %v4328_v50  ;;  %v4661_v63 = vsel %vm4660_vm7, %v8915_v37, 16.0  ;;  %v4588_v29 = vsel %vm4587_vm6, %v8913_v57, 16.0 }
 0x880   : > { %v4662_v5 = vsel %vm4330_vm12, %v4661_v63, inf  ;;  %v4589_v44 = vsel %vm4249_vm11, %v4588_v29, inf }
 0x883   : > { %v4407_v10 = vpop.xlane.xlu0 %4406  ;;  %v4567_v21 = vpop.permute.xlu2 %4566 }
 0x884   : > { %v4409_v23 = vsel %vm4408_vm8, %v4407_v10, 0.0  ;;  %v4569_v54 = vsel %vm8742_vm0, %v4567_v21, 0.0  ;;  %vm4697_vm8 = vcmp.ge.f32.partialorder %v8030_v33, %v8077_v61 }
 0x885   : > { %v4410_v52 = vadd.f32 %v4409_v23, %v4369_v24  ;;  %4570 = vadd.xlane.f32.xlu0 %v4569_v54  ;;  %v4698_v12 = vsel %vm4697_vm8, %v8916_v34, 16.0 }
 0x886   : > { %v4699_v62 = vsel %vm4371_vm9, %v4698_v12, inf }
 0x887   : > { %v4445_v3 = vadd.f32 %v4444_v27, %v4410_v52 }
 0x889   : > { %v4481_v43 = vadd.f32 %v4480_v32, %v4445_v3 }
 0x88b   : > { %v8200_v2 = vadd.f32 %v4517_v15, %v4481_v43 }
 0x893   : > { %v4528_v42 = vpop.permute.xlu1 %4527 }
 0x894   : > { %v4530_v40 = vsel %vm8742_vm0, %v4528_v42, 0.0 }
 0x896   : > { %v4454_v56 = vpop.permute.xlu0 %4453 }
 0x897   : > { %v4456_v47 = vsel %vm8742_vm0, %v4454_v56, 0.0 }
 0x898   : > { %4457 = vadd.xlane.f32.xlu1 %v4456_v47 }
 0x89b   : > { %v4640_v20 = vpop.permute.xlu1 %4639 }
 0x89c   : > { %v4642_v17 = vsel %vm8742_vm0, %v4640_v20, 0.0 }
 0x89e   : > { %v4491_v1 = vpop.permute.xlu0 %4490 }
 0x89f   : > { %v4493_v38 = vsel %vm8742_vm0, %v4491_v1, 0.0 }
 0x8a0   : > { %4494 = vadd.xlane.f32.xlu1 %v4493_v38 }
 0x8a2   : > { %4551 = vmin.xlane.f32.xlu2 %v4550_v11 }
 0x8a3   : > { %v4677_v4 = vpop.permute.xlu1 %4676 }
 0x8a4   : > { %v4679_v19 = vsel %vm8742_vm0, %v4677_v4, 0.0 }
 0x8a6   : > { %v4603_v28 = vpop.permute.xlu0 %4602 }
 0x8a7   : > { %v4605_v16 = vsel %vm8742_vm0, %v4603_v28, 0.0 }
 0x8aa   : > { %4531 = vadd.xlane.f32.xlu2 %v4530_v40 }
 0x8ab   : > { %v4215_v53 = vpop.permute.xlu1 %4214 }
 0x8ac   : > { %v4217_v31 = vsel %vm8742_vm0, %v4215_v53, 0.0 }
 0x8ae   : > { %v4258_v0 = vpop.permute.xlu0 %4257 }
 0x8af   : > { %v4260_v8 = vsel %vm8742_vm0, %v4258_v0, 0.0 }
 0x8b2   : > { %4261 = vadd.xlane.f32.xlu2 %v4260_v8 }
 0x8b6   : > { %v4339_v36 = vpop.permute.xlu0 %4338 }
 0x8b7   : > { %v4341_v51 = vsel %vm8742_vm0, %v4339_v36, 0.0 }
 0x8ba   : > { %4643 = vadd.xlane.f32.xlu2 %v4642_v17 }
 0x8bc   : > { %v8213_v26 = vpop.xlane.xlu2 %4421 }
 0x8c2   : > { %4626 = vmin.xlane.f32.xlu2 %v4625_v6 }
 0x8c4   : > { %v4132_v9 = vpop.permute.xlu2 %4131 }
 0x8c5   : > { %v4134_v55 = vsel %vm8742_vm0, %v4132_v9, 0.0 }
 0x8c6   : > { %4135 = vadd.xlane.f32.xlu0 %v4134_v55 }
 0x8cc   : > { %v4174_v39 = vpop.permute.xlu2 %4173 }
 0x8cd   : > { %v4176_v48 = vsel %vm8742_vm0, %v4174_v39, 0.0 }
 0x8ce   : > { %4177 = vadd.xlane.f32.xlu0 %v4176_v48 }
 0x8d4   : > { %v4298_v45 = vpop.permute.xlu2 %4297 }
 0x8d5   : > { %v4300_v59 = vsel %vm8742_vm0, %v4298_v45, 0.0 }
 0x8d6   : > { %4218 = vadd.xlane.f32.xlu0 %v4217_v31  ;;  %4301 = vadd.xlane.f32.xlu1 %v4300_v59 }
 0x8dc   : > { %v4380_v22 = vpop.permute.xlu2 %4379 }
 0x8dd   : > { %v4382_v25 = vsel %vm8742_vm0, %v4380_v22, 0.0 }
 0x8de   : > { %4342 = vadd.xlane.f32.xlu0 %v4341_v51  ;;  %4383 = vadd.xlane.f32.xlu1 %v4382_v25 }
 0x8e6   : > { %4680 = vadd.xlane.f32.xlu0 %v4679_v19  ;;  %4606 = vadd.xlane.f32.xlu1 %v4605_v16 }
 0x8ee   : > { %4663 = vmin.xlane.f32.xlu0 %v4662_v5  ;;  %4590 = vmin.xlane.f32.xlu1 %v4589_v44 }
 0x8f6   : > { %4700 = vmin.xlane.f32.xlu1 %v4699_v62 }
 0x8f7   : > { %6223 = shalt.err (!%p6220_p8)
}
 0x8f8   : > { %5846 = dma.vmem_to_hbm [thread:$0]  (%p6477_p5), %s4734_s23, 16, %s4736_s20, %s4713_s10   ;;  %v4098_v61 = vpop.xlane.xlu0 %4097  ;;  %6014 = vrcp.f32 %v8213_v26  ;;  %vm4428_vm9 = vweird.f32 %v8213_v26  ;;  %v4434_v15 = vand.u32 2147483648, %v8213_v26  ;;  %v4432_v11 = vand.u32 2147483647, %v8213_v26 }
 0x8f9   : > { %6016 = vrcp.f32 %v4098_v61  ;;  %v4110_v56 = vand.u32 2147483648, %v4098_v61  ;;  %vm4104_vm13 = vweird.f32 %v4098_v61  ;;  %v4108_v42 = vand.u32 2147483647, %v4098_v61  ;;  %s4945_s18 = sshll.u32 %s7582_s2, 2  ;;  %s5688_s26 = sshll.u32 %s6458_s5, 2 }
 0x8fa   : > { %v4435_v20 = vor.u32 1.1754944e-38, %v4434_v15  ;;  %vm4433_vm4 = vcmp.eq.f32.partialorder %v4432_v11, 8.507059e+37  ;;  %s8950_s14 = sld [smem:[#allocation89_spill]]  ;;  %s4716_s23 = sand.u32 1, %s6458_s5  }
 0x8fb   : > { %v4111_v17 = vor.u32 1.1754944e-38, %v4110_v56  ;;  %vm4109_vm5 = vcmp.eq.f32.partialorder %v4108_v42, 8.507059e+37  ;;  %s578_s20 = scalar_lea.vmem [#allocation13], %s4945_s18  ;;  %s8953_s30 = sld [smem:[#allocation90_spill]] }
 0x8fc   : > { %s4747_s10 = sshll.u32 %s578_s20, 4  ;;  %s585_s25 = scalar_lea.vmem [#allocation15], %s4945_s18  ;;  %s4748_s10 = int_to_ptr.vmem [resolvable:$true] %s4747_s10 }
 0x8fd   : > { %s8646_s16 = scalar_lea.sflag [#allocation14], %s4716_s23 }
 0x8fe   : > { %v6015_v57 = vpop.eup %6014 }
 0x8ff   : > { %v6017_v34 = vpop.eup %6016  ;;  %v4424_v58 = vmul.f32 %v6015_v57, %v8213_v26  ;;  %vm4429_vm11 = vweird.f32 %v6015_v57 }
 0x900   : > { %v8259_v37 = vpop.xlane.xlu0 %4570  ;;  %v4100_v7 = vmul.f32 %v6017_v34, %v4098_v61  ;;  %vm4105_vm12 = vweird.f32 %v6017_v34  ;;  %vm8291_vm10 = vmor %vm4428_vm9, %vm4429_vm11  ;;  %vm4553_vm9 = vcmp.eq.s32.totalorder %v8920_v14, 11  ;;  %s8604_s24 = scalar_lea.hbm %s8950_s14, %s5688_s26  ;;  %s6244_s0 = scalar_lea.hbm %s8950_s14, 8 }
 0x901   : > { %6018 = vrcp.f32 %v8259_v37  ;;  %v4425_v35 = vsub.f32 1.0, %v4424_v58  ;;  %vm4106_vm3 = vmor %vm4104_vm13, %vm4105_vm12  ;;  %v4581_v39 = vand.u32 2147483647, %v8259_v37  ;;  %v4583_v31 = vand.u32 2147483648, %v8259_v37  ;;  %s4749_s28 = sshll.u32 %s8604_s24, 4  ;;  %s8633_s17 = scalar_lea.hbm %s8953_s30, %s5688_s26  ;;  %s4750_s28 = int_to_ptr.hbm [resolvable:$true] %s4749_s28 }
 0x902   : > { %v4101_v18 = vsub.f32 1.0, %v4100_v7  ;;  %vm4577_vm8 = vweird.f32 %v8259_v37  ;;  %s4763_s22 = sshll.u32 %s8633_s17, 4  ;;  %s4761_s26 = sshll.u32 %s585_s25, 4  ;;  %s4762_s26 = int_to_ptr.vmem [resolvable:$true] %s4761_s26  ;;  %s4764_s22 = int_to_ptr.hbm [resolvable:$true] %s4763_s22 }
 0x903   : > { %v4426_v24 = vmul.f32 %v6015_v57, %v4425_v35  ;;  %v4584_v62 = vor.u32 1.1754944e-38, %v4583_v31  ;;  %s6238_s15 = sshra.s32 %s4750_s28, 4  ;;  %s6239_s15 = int_to_ptr.hbm [resolvable:$true] %s6238_s15 }
 0x904   : > { %v4102_v21 = vmul.f32 %v6017_v34, %v4101_v18  ;;  %s6240_s24 = scalar_lea.hbm %s6239_s15, 4  ;;  %p6245_p12 = scmp.lt.s32.totalorder %s6239_s15, %s8950_s14 }
 0x905   : > { %v4427_v27 = vadd.f32 %v6015_v57, %v4426_v24  ;;  %p6241_p9 = scmp.ne.s32.totalorder %s6239_s15, %s6240_s24  ;;  %p6246_p13 = scmp.lt.s32.totalorder %s6244_s0, %s6240_s24 }
 0x906   : > { %v4103_v3 = vadd.f32 %v6017_v34, %v4102_v21 }
 0x907   : > { %v8269_v50 = vpop.eup %6018  ;;  %v4431_v28 = vsel %vm8291_vm10, %v6015_v57, %v4427_v27  ;;  %vm4582_vm10 = vcmp.eq.f32.partialorder %v4581_v39, 8.507059e+37  ;;  %p6242_p10 = pnand %p6241_p9, %p6477_p5  ;;  %p6247_p0 = por %p6246_p13, %p6245_p12 }
 0x908   : > { %v4573_v23 = vmul.f32 %v8269_v50, %v8259_v37  ;;  %v4107_v40 = vsel %vm4106_vm3, %v6017_v34, %v4103_v3  ;;  %v8307_v55 = vsel %vm4433_vm4, %v4435_v20, %v4431_v28  ;;  %vm4578_vm6 = vweird.f32 %v8269_v50 }
 0x909   : > { %v8309_v4 = vsel %vm4109_vm5, %v4111_v17, %v4107_v40  ;;  %vm8328_vm11 = vmor %vm4577_vm8, %vm4578_vm6  ;;  %p6243_p11 = pneg %p6242_p10 }
 0x90a   : > { %v4574_v32 = vsub.f32 1.0, %v4573_v23 }
 0x90b   : > { %v8257_v13 = vpop.xlane.xlu1 %4457  ;;  %p6248_p1 = pnand %p6247_p0, %p6243_p11 }
 0x90c   : > { %6020 = vrcp.f32 %v8257_v13  ;;  %v4575_v0 = vmul.f32 %v8269_v50, %v4574_v32  ;;  %v4470_v51 = vand.u32 2147483648, %v8257_v13  ;;  %vm4464_vm12 = vweird.f32 %v8257_v13 }
 0x90d   : > { %v4468_v16 = vand.u32 2147483647, %v8257_v13 }
 0x90e   : > { %v4576_v53 = vadd.f32 %v8269_v50, %v4575_v0  ;;  %v4471_v37 = vor.u32 1.1754944e-38, %v4470_v51 }
 0x90f   : > { %vm4469_vm5 = vcmp.eq.f32.partialorder %v4468_v16, 8.507059e+37 }
 0x910   : > { %v4580_v5 = vsel %vm8328_vm11, %v8269_v50, %v4576_v53 }
 0x911   : > { %v8355_v7 = vsel %vm4582_vm10, %v4584_v62, %v4580_v5 }
 0x912   : > { %v8271_v41 = vpop.eup %6020 }
 0x913   : > { %v8266_v49 = vpop.xlane.xlu1 %4494  ;;  %v4460_v52 = vmul.f32 %v8271_v41, %v8257_v13  ;;  %vm4465_vm7 = vweird.f32 %v8271_v41 }
 0x914   : > { %6022 = vrcp.f32 %v8266_v49  ;;  %v4507_v63 = vand.u32 2147483648, %v8266_v49  ;;  %vm8340_vm13 = vmor %vm4464_vm12, %vm4465_vm7  ;;  %vm4501_vm4 = vweird.f32 %v8266_v49  ;;  %v4505_v34 = vand.u32 2147483647, %v8266_v49 }
 0x915   : > { %v8254_v33 = vpop.xlane.xlu2 %4551  ;;  %v4461_v47 = vsub.f32 1.0, %v4460_v52  ;;  %vm4628_vm12 = vcmp.eq.s32.totalorder %v8920_v14, 13 }
 0x916   : > { %v4508_v18 = vor.u32 1.1754944e-38, %v4507_v63  ;;  %v4554_v21 = vsel %vm4553_vm9, %v8254_v33, 0.0  ;;  %vm4506_vm8 = vcmp.eq.f32.partialorder %v4505_v34, 8.507059e+37 }
 0x917   : > { %v4462_v30 = vmul.f32 %v8271_v41, %v4461_v47  ;;  %v8387_v38 = vadd.f32 %v4554_v21, %v8200_v2 }
 0x919   : > { %v4463_v59 = vadd.f32 %v8271_v41, %v4462_v30 }
 0x91a   : > { %v8278_v54 = vpop.eup %6022 }
 0x91b   : > { %v4497_v43 = vmul.f32 %v8278_v54, %v8266_v49  ;;  %vm4502_vm3 = vweird.f32 %v8278_v54  ;;  %v4467_v61 = vsel %vm8340_vm13, %v8271_v41, %v4463_v59 }
 0x91c   : > { %vm8357_vm6 = vmor %vm4501_vm4, %vm4502_vm3  ;;  %v4472_v41 = vsel %vm4469_vm5, %v4471_v37, %v4467_v61 }
 0x91d   : > { %v8261_v60 = vpop.xlane.xlu2 %4531  ;;  %v4498_v8 = vsub.f32 1.0, %v4497_v43  ;;  %v4482_v47 = vmin.f32 %v8307_v55, %v4472_v41 }
 0x91e   : > { %6024 = vrcp.f32 %v8261_v60  ;;  %v4542_v49 = vand.u32 2147483647, %v8261_v60  ;;  %v4544_v52 = vand.u32 2147483648, %v8261_v60  ;;  %vm4538_vm11 = vweird.f32 %v8261_v60 }
 0x91f   : > { %v4499_v45 = vmul.f32 %v8278_v54, %v4498_v8 }
 0x920   : > { %vm4543_vm10 = vcmp.eq.f32.partialorder %v4542_v49, 8.507059e+37  ;;  %v4545_v28 = vor.u32 1.1754944e-38, %v4544_v52 }
 0x921   : > { %v4500_v12 = vadd.f32 %v8278_v54, %v4499_v45 }
 0x923   : > { %v4504_v24 = vsel %vm8357_vm6, %v8278_v54, %v4500_v12 }
 0x924   : > { %v8289_v46 = vpop.eup %6024  ;;  %v4509_v43 = vsel %vm4506_vm8, %v4508_v18, %v4504_v24 }
 0x925   : > { %v8273_v10 = vpop.xlane.xlu2 %4261  ;;  %v4534_v6 = vmul.f32 %v8289_v46, %v8261_v60  ;;  %vm4539_vm7 = vweird.f32 %v8289_v46  ;;  %v8400_v0 = vmin.f32 %v4482_v47, %v4509_v43 }
 0x926   : > { %6026 = vrcp.f32 %v8273_v10  ;;  %v4272_v15 = vand.u32 2147483647, %v8273_v10  ;;  %vm8391_vm9 = vmor %vm4538_vm11, %vm4539_vm7  ;;  %v4274_v11 = vand.u32 2147483648, %v8273_v10  ;;  %vm4268_vm3 = vweird.f32 %v8273_v10 }
 0x927   : > { %v4535_v36 = vsub.f32 1.0, %v4534_v6 }
 0x928   : > { %vm8407_vm4 = vcmp.eq.f32.partialorder %v4272_v15, 8.507059e+37  ;;  %v4275_v6 = vor.u32 1.1754944e-38, %v4274_v11 }
 0x929   : > { %v4536_v13 = vmul.f32 %v8289_v46, %v4535_v36 }
 0x92b   : > { %v4537_v23 = vadd.f32 %v8289_v46, %v4536_v13 }
 0x92c   : > { %v8305_v9 = vpop.eup %6026 }
 0x92d   : > { %v8303_v26 = vpop.xlane.xlu2 %4643  ;;  %v4264_v25 = vmul.f32 %v8305_v9, %v8273_v10  ;;  %v4541_v42 = vsel %vm8391_vm9, %v8289_v46, %v4537_v23  ;;  %vm4269_vm13 = vweird.f32 %v8305_v9 }
 0x92e   : > { %v8415_v30 = vsel %vm4543_vm10, %v4545_v28, %v4541_v42  ;;  %v4656_v55 = vand.u32 2147483648, %v8303_v26  ;;  %vm8421_vm6 = vmor %vm4268_vm3, %vm4269_vm13  ;;  %v4654_v31 = vand.u32 2147483647, %v8303_v26  ;;  %vm4592_vm10 = vcmp.eq.s32.totalorder %v8920_v14, 12 }
 0x92f   : > { %v4265_v58 = vsub.f32 1.0, %v4264_v25 }
 0x930   : > { %v8453_v12 = vor.u32 1.1754944e-38, %v4656_v55 }
 0x931   : > { %v4266_v33 = vmul.f32 %v8305_v9, %v4265_v58 }
 0x933   : > { %v4267_v2 = vadd.f32 %v8305_v9, %v4266_v33 }
 0x935   : > { %v4271_v25 = vsel %vm8421_vm6, %v8305_v9, %v4267_v2  ;;  %v4627_v19 = vpop.xlane.xlu2 %4626 }
 0x936   : > { %v8458_v13 = vsel %vm8407_vm4, %v4275_v6, %v4271_v25 }
 0x939   : > { %v8287_v1 = vpop.xlane.xlu0 %4135 }
 0x93a   : > { %6028 = vrcp.f32 %v8287_v1  ;;  %v4148_v39 = vand.u32 2147483648, %v8287_v1  ;;  %vm4142_vm7 = vweird.f32 %v8287_v1  ;;  %v4146_v59 = vand.u32 2147483647, %v8287_v1 }
 0x93b   : > { %6030 = vrcp.f32 %v8303_v26 }
 0x93c   : > { %v4149_v62 = vor.u32 1.1754944e-38, %v4148_v39  ;;  %vm4147_vm11 = vcmp.eq.f32.partialorder %v4146_v59, 8.507059e+37 }
 0x940   : > { %v8312_v48 = vpop.eup %6028 }
 0x941   : > { %v8321_v22 = vpop.xlane.xlu0 %4177  ;;  %v4138_v29 = vmul.f32 %v8312_v48, %v8287_v1  ;;  %v8351_v57 = vpop.eup %6030  ;;  %vm4143_vm5 = vweird.f32 %v8312_v48  ;;  %v4556_v1 = vmin.f32 %v8400_v0, %v8415_v30 }
 0x942   : > { %6032 = vrcp.f32 %v8321_v22  ;;  %v4646_v27 = vmul.f32 %v8351_v57, %v8303_v26  ;;  %vm8438_vm8 = vmor %vm4142_vm7, %vm4143_vm5  ;;  %v4190_v5 = vand.u32 2147483648, %v8321_v22  ;;  %vm4184_vm9 = vweird.f32 %v8321_v22 }
 0x943   : > { %v4139_v50 = vsub.f32 1.0, %v4138_v29  ;;  %v4188_v18 = vand.u32 2147483647, %v8321_v22  ;;  %vm4651_vm7 = vweird.f32 %v8351_v57 }
 0x944   : > { %v4647_v40 = vsub.f32 1.0, %v4646_v27 }
 0x945   : > { %v4140_v56 = vmul.f32 %v8312_v48, %v4139_v50  ;;  %v8473_v50 = vor.u32 1.1754944e-38, %v4190_v5  ;;  %vm8495_vm5 = vcmp.eq.f32.partialorder %v4188_v18, 8.507059e+37 }
 0x946   : > { %v4648_v45 = vmul.f32 %v8351_v57, %v4647_v40 }
 0x947   : > { %v4141_v46 = vadd.f32 %v8312_v48, %v4140_v56 }
 0x948   : > { %v8380_v54 = vpop.eup %6032  ;;  %v8461_v37 = vadd.f32 %v8351_v57, %v4648_v45 }
 0x949   : > { %v8373_v3 = vpop.xlane.xlu0 %4218  ;;  %v8375_v32 = vpop.xlane.xlu1 %4301  ;;  %v4180_v8 = vmul.f32 %v8380_v54, %v8321_v22  ;;  %v4145_v9 = vsel %vm8438_vm8, %v8312_v48, %v4141_v46  ;;  %v8465_v48 = vsel %vm4628_vm12, %v4627_v19, 0.0  ;;  %vm4185_vm12 = vweird.f32 %v8380_v54 }
 0x94a   : > { %6034 = vrcp.f32 %v8373_v3  ;;  %v8467_v34 = vsel %vm4147_vm11, %v4149_v62, %v4145_v9  ;;  %v4314_v49 = vand.u32 2147483648, %v8375_v32  ;;  %vm4225_vm3 = vweird.f32 %v8373_v3  ;;  %vm8519_vm8 = vmor %vm4184_vm9, %vm4185_vm12 }
 0x94b   : > { %6036 = vrcp.f32 %v8375_v32  ;;  %v4181_v63 = vsub.f32 1.0, %v4180_v8  ;;  %v4164_v23 = vmin.f32 %v8309_v4, %v8467_v34  ;;  %v4229_v52 = vand.u32 2147483647, %v8373_v3 }
 0x94c   : > { %vm4308_vm4 = vweird.f32 %v8375_v32  ;;  %v4312_v47 = vand.u32 2147483647, %v8375_v32  ;;  %v4231_v42 = vand.u32 2147483648, %v8373_v3  ;;  %v4315_v8 = vor.u32 1.1754944e-38, %v4314_v49 }
 0x94d   : > { %v4182_v58 = vmul.f32 %v8380_v54, %v4181_v63  ;;  %vm4650_vm9 = vweird.f32 %v8303_v26 }
 0x94e   : > { %v4232_v18 = vor.u32 1.1754944e-38, %v4231_v42 }
 0x94f   : > { %v4183_v56 = vadd.f32 %v8380_v54, %v4182_v58 }
 0x950   : > { %v8413_v17 = vpop.eup %6034 }
 0x951   : > { %v8419_v53 = vpop.eup %6036  ;;  %v8429_v36 = vpop.xlane.xlu0 %4342  ;;  %v4221_v44 = vmul.f32 %v8413_v17, %v8373_v3 }
 0x952   : > { %v8431_v51 = vpop.xlane.xlu1 %4383  ;;  %v4304_v29 = vmul.f32 %v8419_v53, %v8375_v32  ;;  %6038 = vrcp.f32 %v8429_v36  ;;  %vm4309_vm13 = vweird.f32 %v8419_v53  ;;  %v4353_v20 = vand.u32 2147483647, %v8429_v36 }
 0x953   : > { %6040 = vrcp.f32 %v8431_v51  ;;  %v4222_v41 = vsub.f32 1.0, %v4221_v44  ;;  %vm8503_vm6 = vmor %vm4308_vm4, %vm4309_vm13  ;;  %v4355_v46 = vand.u32 2147483648, %v8429_v36  ;;  %vm4665_vm13 = vcmp.eq.s32.totalorder %v8920_v14, 14 }
 0x954   : > { %v4305_v61 = vsub.f32 1.0, %v4304_v29  ;;  %vm4226_vm4 = vweird.f32 %v8413_v17  ;;  %vm4349_vm2 = vweird.f32 %v8429_v36  ;;  %vm4354_vm0 = vcmp.eq.f32.partialorder %v4353_v20, 8.507059e+37 }
 0x955   : > { %v4223_v11 = vmul.f32 %v8413_v17, %v4222_v41  ;;  %v4356_v19 = vor.u32 1.1754944e-38, %v4355_v46  ;;  %v4396_v16 = vand.u32 2147483648, %v8431_v51  ;;  %v4394_v62 = vand.u32 2147483647, %v8431_v51 }
 0x956   : > { %v4306_v35 = vmul.f32 %v8419_v53, %v4305_v61 }
 0x957   : > { %v4224_v22 = vadd.f32 %v8413_v17, %v4223_v11  ;;  %v4397_v49 = vor.u32 1.1754944e-38, %v4396_v16 }
 0x958   : > { %v6039_v24 = vpop.eup %6038  ;;  %v4307_v21 = vadd.f32 %v8419_v53, %v4306_v35 }
 0x959   : > { %v4345_v27 = vmul.f32 %v6039_v24, %v8429_v36  ;;  %v8485_v33 = vpop.xlane.xlu0 %4680  ;;  %v8489_v15 = vpop.eup %6040  ;;  %vm4350_vm11 = vweird.f32 %v6039_v24 }
 0x95a   : > { %v8487_v43 = vpop.xlane.xlu1 %4606  ;;  %6042 = vrcp.f32 %v8485_v33  ;;  %v4386_v32 = vmul.f32 %v8489_v15, %v8431_v51  ;;  %v4311_v2 = vsel %vm8503_vm6, %v8419_v53, %v4307_v21  ;;  %v4187_v53 = vsel %vm8519_vm8, %v8380_v54, %v4183_v56  ;;  %vm4351_vm12 = vmor %vm4349_vm2, %vm4350_vm11 }
 0x95b   : > { %v4346_v40 = vsub.f32 1.0, %v4345_v27  ;;  %6044 = vrcp.f32 %v8487_v43  ;;  %vm4313_vm6 = vcmp.eq.f32.partialorder %v4312_v47, 8.507059e+37  ;;  %vm4390_vm8 = vweird.f32 %v8431_v51  ;;  %vm8545_vm2 = vmor %vm4225_vm3, %vm4226_vm4 }
 0x95c   : > { %v4387_v39 = vsub.f32 1.0, %v4386_v32  ;;  %v4316_v10 = vsel %vm4313_vm6, %v4315_v8, %v4311_v2  ;;  %vm4391_vm1 = vweird.f32 %v8489_v15  ;;  %v4228_v35 = vsel %vm8545_vm2, %v8413_v17, %v4224_v22 }
 0x95d   : > { %v4347_v55 = vmul.f32 %v6039_v24, %v4346_v40  ;;  %v4329_v5 = vmin.f32 %v8458_v13, %v4316_v10  ;;  %vm8558_vm3 = vmor %vm4390_vm8, %vm4391_vm1  ;;  %vm4702_vm1 = vcmp.eq.s32.totalorder %v8920_v14, 15  ;;  %v4617_v11 = vand.u32 2147483647, %v8487_v43 }
 0x95e   : > { %v4388_v59 = vmul.f32 %v8489_v15, %v4387_v39  ;;  %vm4613_vm4 = vweird.f32 %v8487_v43  ;;  %v4691_v6 = vand.u32 2147483647, %v8485_v33  ;;  %vm8954_vm2 = vcmp.eq.s32.totalorder %v8920_v14, 2 }
 0x95f   : > { %v4348_v45 = vadd.f32 %v6039_v24, %v4347_v55 }
 0x960   : > { %v8533_v25 = vpop.eup %6042  ;;  %v4389_v36 = vadd.f32 %v8489_v15, %v4388_v59 }
 0x961   : > { %v4352_v54 = vsel %vm4351_vm12, %v6039_v24, %v4348_v45  ;;  %v4683_v63 = vmul.f32 %v8533_v25, %v8485_v33  ;;  %v6045_v58 = vpop.eup %6044  ;;  %v4192_v24 = vsel %vm8495_vm5, %v8473_v50, %v4187_v53  ;;  %v4664_v27 = vpop.xlane.xlu0 %4663  ;;  %vm8584_vm5 = vmor %vm4650_vm9, %vm4651_vm7  ;;  %vm4688_vm7 = vweird.f32 %v8533_v25 }
 0x962   : > { %v4591_v29 = vpop.xlane.xlu1 %4590  ;;  %v4357_v44 = vsel %vm4354_vm0, %v4356_v19, %v4352_v54  ;;  %v4393_v17 = vsel %vm8558_vm3, %v8489_v15, %v4389_v36  ;;  %v4609_v51 = vmul.f32 %v6045_v58, %v8487_v43  ;;  %vm4230_vm0 = vcmp.eq.f32.partialorder %v4229_v52, 8.507059e+37 }
 0x963   : > { %v4593_v61 = vsel %vm4592_vm10, %v4591_v29, 0.0  ;;  %v4684_v41 = vsub.f32 1.0, %v4683_v63  ;;  %v4370_v21 = vmin.f32 %v4329_v5, %v4357_v44  ;;  %vm4395_vm10 = vcmp.eq.f32.partialorder %v4394_v62, 8.507059e+37 }
 0x964   : > { %v4594_v13 = vadd.f32 %v4593_v61, %v8387_v38  ;;  %v4233_v38 = vsel %vm4230_vm0, %v4232_v18, %v4228_v35  ;;  %v4610_v47 = vsub.f32 1.0, %v4609_v51  ;;  %v4205_v60 = vmin.f32 %v4164_v23, %v4192_v24 }
 0x965   : > { %v4685_v50 = vmul.f32 %v8533_v25, %v4684_v41  ;;  %v4398_v15 = vsel %vm4395_vm10, %v4397_v49, %v4393_v17  ;;  %v4619_v52 = vand.u32 2147483648, %v8487_v43  ;;  %vm4614_vm11 = vweird.f32 %v6045_v58 }
 0x966   : > { %v4630_v56 = vadd.f32 %v8465_v48, %v4594_v13  ;;  %v4411_v42 = vmin.f32 %v4370_v21, %v4398_v15  ;;  %v4611_v28 = vmul.f32 %v6045_v58, %v4610_v47  ;;  %v4666_v4 = vsel %vm4665_vm13, %v4664_v27, 0.0  ;;  %vm4615_vm6 = vmor %vm4613_vm4, %vm4614_vm11 }
 0x967   : > { %v4653_v34 = vsel %vm8584_vm5, %v8351_v57, %v8461_v37  ;;  %v4246_v23 = vmin.f32 %v4205_v60, %v4233_v38  ;;  %v4686_v2 = vadd.f32 %v8533_v25, %v4685_v50  ;;  %vm4687_vm13 = vweird.f32 %v8485_v33 }
 0x968   : > { %v4667_v32 = vadd.f32 %v4666_v4, %v4630_v56  ;;  %v4612_v8 = vadd.f32 %v6045_v58, %v4611_v28  ;;  %v4693_v57 = vand.u32 2147483648, %v8485_v33  ;;  %v4620_v37 = vor.u32 1.1754944e-38, %v4619_v52  ;;  %vm8612_vm12 = vmor %vm4687_vm13, %vm4688_vm7 }
 0x969   : > { %v4412_v46 = vsel %vm4161_vm15, %v4411_v42, 0.0  ;;  %vm4618_vm9 = vcmp.eq.f32.partialorder %v4617_v11, 8.507059e+37  ;;  %vm4655_vm15 = vcmp.eq.f32.partialorder %v4654_v31, 8.507059e+37  ;;  %v4247_v33 = vsel %vm4120_vm14, %v4246_v23, 0.0 }
 0x96a   : > { %v4701_v40 = vpop.xlane.xlu1 %4700  ;;  %v4616_v55 = vsel %vm4615_vm6, %v6045_v58, %v4612_v8  ;;  %v4690_v45 = vsel %vm8612_vm12, %v8533_v25, %v4686_v2  ;;  %v4658_v19 = vsel %vm4655_vm15, %v8453_v12, %v4653_v34  ;;  %v4413_v54 = vadd.f32 %v4412_v46, %v4247_v33 }
 0x96b   : > { %v4703_v20 = vsel %vm4702_vm1, %v4701_v40, 0.0  ;;  %v4621_v53 = vsel %vm4618_vm9, %v4620_v37, %v4616_v55  ;;  %v4694_v36 = vor.u32 1.1754944e-38, %v4693_v57  ;;  %vm4692_vm14 = vcmp.eq.f32.partialorder %v4691_v6, 8.507059e+37 }
 0x96c   : > { %v4704_v43 = vadd.f32 %v4703_v20, %v4667_v32  ;;  %v4631_v59 = vmin.f32 %v8355_v7, %v4621_v53  ;;  %v4557_v12 = vsel %vm8954_vm2, %v4556_v1, 0.0  ;;  %vm8955_vm3 = vcmask 125952  }
 0x96d   : > { %v4695_v7 = vsel %vm4692_vm14, %v4694_v36, %v4690_v45  ;;  %v4558_v63 = vadd.f32 %v4557_v12, %v4413_v54 }
 0x96e   : > { %vm5821_vm8 = vcmp.lt.s32.totalorder %v4704_v43, 0  ;;  %v5822_v22 = vceil.f32 %v4704_v43  ;;  %v5823_v10 = vfloor.f32 %v4704_v43  ;;  %v4668_v26 = vmin.f32 %v4631_v59, %v4658_v19 }
 0x970   : > { %v5824_v16 = vsel %vm5821_vm8, %v5822_v22, %v5823_v10  ;;  %v4705_v25 = vmin.f32 %v4668_v26, %v4695_v7 }
 0x971   : > { %v5825_v31 = vcvt.f32.s32 %v5824_v16 }
 0x973   : > { %4709 = vst.msk [vmem:[%s578_s20] sm:$0xf] %vm8955_vm3, %v5825_v31 }
 0x974   : > { %6251 = shalt.err (!%p6248_p1)
}
 0x975   : > { %5847 = dma.vmem_to_hbm [thread:$0]  (%p6477_p5), %s4748_s10, 64, %s4750_s28, %s8646_s16   ;;  %vm8956_vm0 = vcmp.eq.s32.totalorder %v8920_v14, 3  ;;  %vm4710_vm1 = vcmask 27648  }
 0x976   : > { %v4706_v0 = vsel %vm8956_vm0, %v4705_v25, 0.0  ;;  %s6266_s5 = sshra.s32 %s4764_s22, 4  ;;  %s6272_s23 = scalar_lea.hbm %s8953_s30, 8  ;;  %s6267_s5 = int_to_ptr.hbm [resolvable:$true] %s6266_s5 }
 0x977   : > { %v4707_v30 = vadd.f32 %v4706_v0, %v4558_v63  ;;  %s6268_s2 = scalar_lea.hbm %s6267_s5, 4  ;;  %p6273_p7 = scmp.lt.s32.totalorder %s6267_s5, %s8953_s30 }
 0x978   : > { %p6269_p2 = scmp.ne.s32.totalorder %s6267_s5, %s6268_s2  ;;  %p6274_p8 = scmp.lt.s32.totalorder %s6272_s23, %s6268_s2 }
 0x979   : > { %4711 = vst.msk [vmem:[%s585_s25] sm:$0xf] %vm4710_vm1, %v4707_v30 }
 0x97a   : > { %p6270_p3 = pnand %p6269_p2, %p6477_p5  ;;  %p6275_p9 = por %p6274_p8, %p6273_p7 }
 0x97c   : > { %p6271_p4 = pneg %p6270_p3 }
 0x97e   : > { %p6276_p10 = pnand %p6275_p9, %p6271_p4 }
 0x980   : > { %6279 = shalt.err (!%p6276_p10)
}
 0x981   : > { %5848 = dma.vmem_to_hbm [thread:$0]  (%p6477_p5), %s4762_s26, 64, %s4764_s22, %s8646_s16  }
 0x982 PF: > { %s8957_s25 = sld [smem:[#allocation23_spill]] }
 0x983   : > { %s8958_s15 = sld [smem:[#allocation21_spill]] }
 0x988   : > { %p5888_p11 = scmp.ge.s32.totalorder %s8957_s25, 2 }
 0x989   : > { %s4775_s19 = sand.u32 1, %s8958_s15  }
 0x98a   : > { %p5869_p12 = pnand %p5888_p11, %p6481_p6  ;;  %s4776_s27 = scalar_lea.sflag [#allocation5], %s4775_s19 }
 0x98c   : > { %p5870_p13 = pneg %p5869_p12 }
 0x98e   : > { %6309 = dma.done.wait (%p5870_p13), %s4776_s27, 16  }
 0x98f   : > { %6311 = vsyncadd (%p5870_p13), %s4776_s27, 4294967280  ;;  %s8960_s20 = sadd.s32 4294967294, %s8957_s25  }
 0x990   : > { %s4784_s17 = sand.u32 1, %s8960_s20  }
 0x991   : > { %s4785_s5 = scalar_lea.sflag [#allocation14], %s4784_s17 }
 0x992   : > { %6313 = dma.done.wait (%p5870_p13), %s4785_s5, 128  }
 0x993   : > { %6315 = vsyncadd (%p5870_p13), %s4785_s5, 4294967168  ;;  %s8961_s23 = sld [smem:[#allocation24_spill]]  ;;  %s8964_s20 = smov %s6322_s21 }
 0x994   : > { %s8962_s29 = sld [smem:[#allocation22_spill]] }
 0x995   : > { %s8963_s22 = sld [smem:[#allocation25_spill]] }
 0x999   : > { %p34_p5 = scmp.ge.s32.totalorder %s8961_s23, 4  }
 0x99a   : > { %s8965_s21 = smov %s8962_s29 }
 0x99b   :  { %36 = sbr.rel (!%p34_p5) target bundleno = 14 (0xe), region = 164 }
 0x9a0   :  { %4801 = vsyncpa [#allocation4], 1 }
 0x9a1   :  { %4803 = vsyncpa [#allocation4 + $0x1], 1 }
 0x9a2   :  { %4804 = vsyncpa [#allocation7], 1 }
 0x9a3   :  { %4805 = vsyncpa [#allocation10], 1 }
 0x9a4   :  { %4806 = vsyncpa [#allocation5], 1 }
 0x9a5   :  { %4808 = vsyncpa [#allocation5 + $0x1], 1 }
 0x9a6   :  { %4809 = vsyncpa [#allocation14], 1 }
 0x9a7   :  { %4811 = vsyncpa [#allocation14 + $0x1], 1 }

</bundles_post_ra>
